<compile_context>
chip_gen: v7x
topology: tpu7x:2x2x1
jax: 0.10.0
libtpu: 0.0.40
codegen_flags: <defaults>
</compile_context>

<pallas_src>
import functools
import math

import jax
import jax.numpy as jnp
from jax import lax
from jax.experimental import pallas as pl
from jax.experimental.pallas import tpu as pltpu

EMBED = 512          # embedding_size
HID = 128            # recurrent_size
GATES = 3 * HID      # 3 * recurrent_size

T_BLOCK_CAP = 128            # timesteps per recurrent grid step (multiple of 8)
GATES_BLOCK_BYTES = 2 << 20  # soft VMEM cap for one precomputed-gates block
ROW_TILE_CAP = 512           # rows per projection grid step (multiple of 16)
VOCAB_TILE = 2048            # vocab tile for the vocab-tiled projection path
PROJ_VMEM_BUDGET = 48 << 20  # safe under v7x's 64 MiB physical VMEM
UNROLL = 8                   # inner-loop unroll factor of the recurrence


def _round_up(n, m):
    return -(-n // m) * m


def _compiler_params(semantics, vmem_est_bytes):
    # Explicit scoped-VMEM limit (v5e default is only 16 MiB); capped below the
    # v7x 64 MiB physical size.
    limit = int(min(max(vmem_est_bytes + (16 << 20), 32 << 20), 56 << 20))
    return pltpu.CompilerParams(dimension_semantics=semantics,
                                vmem_limit_bytes=limit)


# --------------------------------------------------------------------------
# Kernel 1: fused bidirectional GRU recurrence (PyTorch loop semantics: the
# hidden state is recorded BEFORE consuming the step's gates).
# --------------------------------------------------------------------------
def gru_kernel(gf_ref, gb_ref, w_ref, b2n_ref, of_ref, ob_ref, hcat_ref, *,
               t_block, batch):
    """One time-block grid step; both directions fused (single-TC friendly).

    gf_ref  : (t_block, B, GATES) f32  forward  emb@U.T + b1 (+ b2[r,i]),
              natural time order (sequence padding, if any, at the END).
    gb_ref  : (t_block, B, GATES) f32  backward pre-computed gates, natural time
              order (padding at the FRONT); the block index_map walks blocks
              right-to-left and the kernel indexes each block reversed, so the
              backward chain sees original times S-1 .. 0 without any jnp.flip.
    w_ref   : (2*HID, GATES) bf16  [W^T ; W_b^T] stacked along K.
    b2n_ref : (2, 1, HID) f32  n-chunk of bias_2 per direction (stays in-step,
              it is scaled by the reset gate).
    of_ref  : (t_block, B, HID) bf16  pre-update forward hidden states.
    ob_ref  : (t_block, B, HID) bf16  pre-update backward hidden states.
    hcat_ref: (2B, 2*HID) f32 scratch, block-diagonal carry:
              [0:B, 0:HID] = h_fwd, [B:2B, HID:2HID] = h_bwd, off-diag == 0,
              so one (2B,256)x(256,GATES) MXU matmul yields both directions'
              recurrent contributions (K=256 fills the 256-deep MXU).
    """
    B = batch

    @pl.when(pl.program_id(0) == 0)
    def _():
        hcat_ref[...] = jnp.zeros_like(hcat_ref)

    w = w_ref[...]                                          # (2*HID, GATES) bf16
    b2n_f = jnp.broadcast_to(b2n_ref[0], (B, HID))          # hoisted broadcasts
    b2n_b = jnp.broadcast_to(b2n_ref[1], (B, HID))

    def gru_update(h, gi, gh, b2n):
        # gi already holds b1 (+ b2[r,i]); gh is the raw h @ W^T contribution.
        r = jax.nn.sigmoid(gi[:, 0:HID] + gh[:, 0:HID])
        z = jax.nn.sigmoid(gi[:, HID:2 * HID] + gh[:, HID:2 * HID])
        n = jnp.tanh(gi[:, 2 * HID:GATES] + r * (gh[:, 2 * HID:GATES] + b2n))
        return n + z * (h - n)

    def step(t):
        tr = t_block - 1 - t
        hf = hcat_ref[0:B, 0:HID]
        hb = hcat_ref[B:2 * B, HID:2 * HID]
        of_ref[t] = hf.astype(of_ref.dtype)                 # record pre-update h
        ob_ref[tr] = hb.astype(ob_ref.dtype)
        # Fused K=256 block-diagonal matmul: rows 0..B-1 -> h_f @ W^T,
        # rows B..2B-1 -> h_b @ W_b^T (off-diagonal zeros contribute exactly 0).
        gh = jnp.dot(hcat_ref[...].astype(jnp.bfloat16), w,
                     preferred_element_type=jnp.float32)    # (2B, GATES) f32
        # The update after each chain's globally-last real timestep is computed
        # but never read again -- matches the PyTorch `break`.
        hcat_ref[0:B, 0:HID] = gru_update(hf, gf_ref[t], gh[0:B], b2n_f)
        hcat_ref[B:2 * B, HID:2 * HID] = gru_update(hb, gb_ref[tr],
                                                    gh[B:2 * B], b2n_b)

    if t_block <= 16:
        for t in range(t_block):                            # fully unrolled
            step(t)
    else:
        # Manually unrolled-by-UNROLL loop: static offsets off an aligned base.
        def body(c, carry):
            base = pl.multiple_of(c * UNROLL, UNROLL)
            for u in range(UNROLL):
                step(base + u)
            return carry

        lax.fori_loop(0, t_block // UNROLL, body, 0)


def gru_recurrence(gates_f, gates_b, w_cat, b2n):
    """gates_*: (S, B, GATES) f32; w_cat: (2*HID, GATES) bf16; b2n: (2,1,HID) f32.

    Returns (forward_pass, backward_pass), each (S, B, HID) bf16 pre-update h."""
    S, B, G = gates_f.shape

    max_tb = max(8, (GATES_BLOCK_BYTES // (B * G * 4)) // 8 * 8)
    cap = min(T_BLOCK_CAP, max_tb)
    nb = -(-S // cap)
    t_block = _round_up(-(-S // nb), 8)       # multiple of 8 (divisible by UNROLL)
    s_pad = nb * t_block
    pad = s_pad - S
    if pad:
        gates_f = jnp.pad(gates_f, ((0, pad), (0, 0), (0, 0)))   # pad at the end
        gates_b = jnp.pad(gates_b, ((pad, 0), (0, 0), (0, 0)))   # pad at the front

    kernel = functools.partial(gru_kernel, t_block=t_block, batch=B)
    est = (2 * 2 * t_block * B * G * 4           # two gate inputs, double-buffered
           + 2 * 2 * t_block * 16 * HID * 2      # two bf16 outputs (sublane-padded)
           + 2 * (2 * HID) * G * 2)              # recurrent weights

    out_f, out_b = pl.pallas_call(
        kernel,
        out_shape=(jax.ShapeDtypeStruct((s_pad, B, HID), jnp.bfloat16),
                   jax.ShapeDtypeStruct((s_pad, B, HID), jnp.bfloat16)),
        grid_spec=pltpu.PrefetchScalarGridSpec(
            num_scalar_prefetch=0,
            grid=(nb,),
            in_specs=[
                pl.BlockSpec((t_block, B, G), lambda i: (i, 0, 0)),
                pl.BlockSpec((t_block, B, G), lambda i: (nb - 1 - i, 0, 0)),
                pl.BlockSpec((2 * HID, G), lambda i: (0, 0)),
                pl.BlockSpec((2, 1, HID), lambda i: (0, 0, 0)),
            ],
            out_specs=[
                pl.BlockSpec((t_block, B, HID), lambda i: (i, 0, 0)),
                pl.BlockSpec((t_block, B, HID), lambda i: (nb - 1 - i, 0, 0)),
            ],
            scratch_shapes=[pltpu.VMEM((2 * B, 2 * HID), jnp.float32)],
        ),
        compiler_params=_compiler_params(("arbitrary",), est),
    )(gates_f, gates_b, w_cat, b2n)
    return out_f[:S], out_b[pad:]


# --------------------------------------------------------------------------
# Kernel 2: fused output projection + log_softmax over vocab.
# --------------------------------------------------------------------------
def proj_full_kernel(h_ref, v_ref, out_ref):
    # h_ref: (2, tile_r, HID) bf16; v_ref: (2, HID, vocab) bf16; out: (tile_r, vocab)
    logits = (jnp.dot(h_ref[0], v_ref[0], preferred_element_type=jnp.float32)
              + jnp.dot(h_ref[1], v_ref[1], preferred_element_type=jnp.float32))
    m = jnp.max(logits, axis=-1, keepdims=True)
    lse = m + jnp.log(jnp.sum(jnp.exp(logits - m), axis=-1, keepdims=True))
    # TODO(synk): emit bf16 log-probs (or fuse the downstream NLL gather) if the
    # consumer tolerates it -- the projection is HBM-write-bound at large vocab.
    out_ref[...] = logits - lse


def _proj_full(h2, v_stack, tile_r):
    _, T, _ = h2.shape
    vocab = v_stack.shape[-1]
    nr = -(-T // tile_r)
    t_pad = nr * tile_r
    if t_pad != T:
        h2 = jnp.pad(h2, ((0, 0), (0, t_pad - T), (0, 0)))

    v_bytes = 2 * HID * vocab * 2
    if v_bytes > (8 << 20):
        # Large resident weight slab: single-buffer it (constant index_map).
        v_spec = pl.BlockSpec((2, HID, vocab), lambda i: (0, 0, 0),
                              pipeline_mode=pl.Buffered(1))
        v_buf = 1
    else:
        v_spec = pl.BlockSpec((2, HID, vocab), lambda i: (0, 0, 0))
        v_buf = 2
    est = v_buf * v_bytes + 2 * tile_r * vocab * 4 + 2 * 2 * tile_r * HID * 2

    out = pl.pallas_call(
        proj_full_kernel,
        out_shape=jax.ShapeDtypeStruct((t_pad, vocab), jnp.float32),
        grid_spec=pltpu.PrefetchScalarGridSpec(
            num_scalar_prefetch=0,
            grid=(nr,),
            in_specs=[pl.BlockSpec((2, tile_r, HID), lambda i: (0, i, 0)), v_spec],
            out_specs=pl.BlockSpec((tile_r, vocab), lambda i: (i, 0)),
        ),
        compiler_params=_compiler_params(("parallel",), est),
    )(h2, v_stack)
    return out[:T]


def proj_tiled_kernel(h_ref, v_ref, out_ref, m_ref, l_ref, *, vocab, tile_v):
    # Grid axes: (row tile i, pass p in {0,1}, vocab tile j).  Pass 0 accumulates
    # the online (max, sum-exp) statistics across vocab tiles; pass 1 recomputes
    # each logits tile and writes log-probs.  During pass 0 all out blocks map to
    # vocab-block 0, so nothing is written back until pass 1 overwrites them.
    p = pl.program_id(1)
    j = pl.program_id(2)
    logits = (jnp.dot(h_ref[0], v_ref[0], preferred_element_type=jnp.float32)
              + jnp.dot(h_ref[1], v_ref[1], preferred_element_type=jnp.float32))

    @pl.when(p == 0)
    def _():
        @pl.when(j == 0)
        def _():
            m_ref[...] = jnp.full_like(m_ref, -jnp.inf)
            l_ref[...] = jnp.zeros_like(l_ref)

        col = lax.broadcasted_iota(jnp.int32, logits.shape, 1) + j * tile_v
        masked = jnp.where(col < vocab, logits, -jnp.inf)   # ragged last tile
        m_prev = m_ref[...]
        m_new = jnp.maximum(m_prev, jnp.max(masked, axis=-1, keepdims=True))
        l_ref[...] = (l_ref[...] * jnp.exp(m_prev - m_new)
                      + jnp.sum(jnp.exp(masked - m_new), axis=-1, keepdims=True))
        m_ref[...] = m_new

    @pl.when(p == 1)
    def _():
        out_ref[...] = logits - (m_ref[...] + jnp.log(l_ref[...]))


def _proj_tiled(h2, v_stack, tile_r, tile_v):
    _, T, _ = h2.shape
    vocab = v_stack.shape[-1]
    nr = -(-T // tile_r)
    t_pad = nr * tile_r
    nv = -(-vocab // tile_v)
    v_pad = nv * tile_v
    if t_pad != T:
        h2 = jnp.pad(h2, ((0, 0), (0, t_pad - T), (0, 0)))
    if v_pad != vocab:
        v_stack = jnp.pad(v_stack, ((0, 0), (0, 0), (0, v_pad - vocab)))

    kernel = functools.partial(proj_tiled_kernel, vocab=vocab, tile_v=tile_v)
    est = (2 * 2 * HID * tile_v * 2 + 2 * tile_r * tile_v * 4
           + 2 * 2 * tile_r * HID * 2 + 2 * tile_r * 128 * 4)

    out = pl.pallas_call(
        kernel,
        out_shape=jax.ShapeDtypeStruct((t_pad, v_pad), jnp.float32),
        grid_spec=pltpu.PrefetchScalarGridSpec(
            num_scalar_prefetch=0,
            grid=(nr, 2, nv),
            in_specs=[
                pl.BlockSpec((2, tile_r, HID), lambda i, p, j: (0, i, 0)),
                pl.BlockSpec((2, HID, tile_v), lambda i, p, j: (0, 0, j)),
            ],
            out_specs=pl.BlockSpec((tile_r, tile_v), lambda i, p, j: (i, j * p)),
            scratch_shapes=[pltpu.VMEM((tile_r, 1), jnp.float32),
                            pltpu.VMEM((tile_r, 1), jnp.float32)],
        ),
        compiler_params=_compiler_params(("parallel", "arbitrary", "arbitrary"),
                                         est),
    )(h2, v_stack)
    return out[:T, :vocab]


def project_logsoftmax(h_f2, h_b2, V, *, force_vocab_tile=None):
    """h_f2 / h_b2: (T, HID) bf16 row-flattened hidden halves; V: (vocab, 2*HID)."""
    T = h_f2.shape[0]
    vocab = V.shape[0]
    v_stack = jnp.stack([V[:, :HID].T, V[:, HID:].T]).astype(jnp.bfloat16)
    h2 = jnp.stack([h_f2, h_b2])                                   # (2, T, HID)

    v_bytes = 2 * HID * vocab * 2
    v_eff = v_bytes if v_bytes > (8 << 20) else 2 * v_bytes        # buffering
    per_row = 2 * vocab * 4 + 2 * 2 * HID * 2                      # dbl-buffered
    avail = PROJ_VMEM_BUDGET - v_eff - (2 << 20)

    if force_vocab_tile is None and avail >= 16 * per_row:
        tile_r = min(ROW_TILE_CAP, max(16, (avail // per_row) // 16 * 16),
                     _round_up(T, 16))
        return _proj_full(h2, v_stack, tile_r)

    # vocab too large for a resident full-vocab block (e.g. v7x's 64 MiB VMEM):
    # two-pass online log-softmax with the vocab axis tiled.
    tile_v = _round_up(min(force_vocab_tile or VOCAB_TILE, vocab), 128)
    tile_r = min(ROW_TILE_CAP, _round_up(T, 16))
    return _proj_tiled(h2, v_stack, tile_r, tile_v)


# --------------------------------------------------------------------------
# Full BiGRULM forward.
# --------------------------------------------------------------------------
def bigru_lm_forward(input_batch, params, *, force_vocab_tile=None):
    S, B = input_batch.shape

    # ---- plain-XLA glue: embedding gather + hoisted input-side projection ----
    emb = params["embedding"][input_batch]                               # (S,B,EMBED)
    U_all = jnp.stack([params["U"], params["U_b"]])                      # (2,GATES,EMBED)
    b1_all = jnp.stack([params["bias_1"], params["bias_1_b"]])           # (2,GATES)
    b2_all = jnp.stack([params["bias_2"], params["bias_2_b"]])           # (2,GATES)
    # fold b1 and the r/i chunks of b2; the n-chunk of b2 stays inside the step
    # (it is multiplied by the reset gate).
    bias_in = b1_all.at[:, :2 * HID].add(b2_all[:, :2 * HID])
    gates = jnp.einsum(
        "sbe,dge->dsbg", emb.astype(jnp.bfloat16), U_all.astype(jnp.bfloat16),
        preferred_element_type=jnp.float32) + bias_in[:, None, None, :]  # (2,S,B,G)

    w_cat = jnp.concatenate([params["W"].T, params["W_b"].T],
                            axis=0).astype(jnp.bfloat16)                 # (2*HID,GATES)
    b2n = jnp.stack([params["bias_2"][2 * HID:],
                     params["bias_2_b"][2 * HID:]]).reshape(2, 1, HID)

    # ---- Pallas kernel 1: fused bidirectional recurrence ----
    h_f, h_b = gru_recurrence(gates[0], gates[1], w_cat, b2n)            # (S,B,HID) bf16

    # ---- Pallas kernel 2: fused projection + log_softmax (no concat) ----
    out2d = project_logsoftmax(h_f.reshape(S * B, HID), h_b.reshape(S * B, HID),
                               params["V"], force_vocab_tile=force_vocab_tile)
    return out2d.reshape(S, B, -1)


# --------------------------------------------------------------------------
# Pure-JAX reference (mirrors the PyTorch loops).  `mxu_dtype` controls the
# matmul-operand precision so the kernel (bf16 MXU inputs, f32 accum) can be
# checked tightly against an identically-rounded reference, and loosely against
# the full-f32 computation.
# --------------------------------------------------------------------------
def ref_forward(input_batch, p, mxu_dtype=jnp.float32):
    cast = lambda x: x.astype(mxu_dtype)
    emb = p["embedding"][input_batch]
    S, B = input_batch.shape

    def one_dir(emb_seq, U, W, b1, b2):
        def step(h, e):
            gi = jnp.dot(cast(e), cast(U).T,
                         preferred_element_type=jnp.float32) + b1
            gh = jnp.dot(cast(h), cast(W).T,
                         preferred_element_type=jnp.float32) + b2
            i_r, i_i, i_n = gi[:, :HID], gi[:, HID:2 * HID], gi[:, 2 * HID:]
            h_r, h_i, h_n = gh[:, :HID], gh[:, HID:2 * HID], gh[:, 2 * HID:]
            ig = jax.nn.sigmoid(i_i + h_i)
            rg = jax.nn.sigmoid(i_r + h_r)
            ng = jnp.tanh(i_n + rg * h_n)
            return ng + ig * (h - ng), h          # carry new, emit pre-update h

        h0 = jnp.zeros((B, HID), jnp.float32)
        _, outs = lax.scan(step, h0, emb_seq)
        return outs

    fwd = one_dir(emb, p["U"], p["W"], p["bias_1"], p["bias_2"])
    bwd = jnp.flip(one_dir(jnp.flip(emb, 0), p["U_b"], p["W_b"],
                           p["bias_1_b"], p["bias_2_b"]), 0)
    th = jnp.concatenate([fwd, bwd], axis=2)
    logits = jnp.dot(cast(th.reshape(S * B, 2 * HID)), cast(p["V"]).T,
                     preferred_element_type=jnp.float32).reshape(S, B, -1)
    m = jnp.max(logits, axis=2, keepdims=True)
    lse = m + jnp.log(jnp.sum(jnp.exp(logits - m), axis=2, keepdims=True))
    return logits - lse


# --------------------------------------------------------------------------
def init_params(key, vocab_size):
    stdv = 1.0 / math.sqrt(HID)
    names_shapes = {
        "embedding": (vocab_size, EMBED),
        "U": (GATES, EMBED),
        "W": (GATES, HID),
        "U_b": (GATES, EMBED),
        "W_b": (GATES, HID),
        "V": (vocab_size, 2 * HID),
        "bias_1": (GATES,),
        "bias_2": (GATES,),
        "bias_1_b": (GATES,),
        "bias_2_b": (GATES,),
    }
    params = {}
    for name, shape in names_shapes.items():
        key, sub = jax.random.split(key)
        params[name] = jax.random.uniform(sub, shape, jnp.float32, -stdv, stdv)
    return params


if __name__ == "__main__":
    key = jax.random.PRNGKey(0)
    # seq chosen odd and > T_BLOCK_CAP so the recurrence spans multiple (padded)
    # time blocks and the hidden-state carry is exercised.  Note: batch that is
    # a multiple of 8 would fill the vregs/MXU much better than B=2.
    seq_len, batch = 161, 2
    vocab_size = 256

    k_params, k_tokens, k_params2 = jax.random.split(key, 3)
    params = init_params(k_params, vocab_size)
    tokens = jax.random.randint(k_tokens, (seq_len, batch), 0, vocab_size,
                                dtype=jnp.int32)

    fwd = jax.jit(bigru_lm_forward)
    out = jax.block_until_ready(fwd(tokens, params))
    assert out.shape == (seq_len, batch, vocab_size), out.shape

    ref_fn = jax.jit(ref_forward, static_argnames=("mxu_dtype",))

    # Tight check: reference with identical bf16 MXU-operand rounding.
    ref_bf16 = jax.block_until_ready(ref_fn(tokens, params,
                                            mxu_dtype=jnp.bfloat16))
    err_bf16 = float(jnp.max(jnp.abs(out - ref_bf16)))
    assert err_bf16 < 1e-2, err_bf16

    # Sanity check: full-f32 PyTorch-equivalent reference (bounds bf16 drift).
    ref_f32 = jax.block_until_ready(ref_fn(tokens, params,
                                           mxu_dtype=jnp.float32))
    err_f32 = float(jnp.max(jnp.abs(out - ref_f32)))
    assert err_f32 < 0.3, err_f32

    # Exercise the vocab-tiled two-pass log-softmax path, including the masked
    # ragged last vocab tile (vocab=200 with tile_v=128).
    vocab2 = 200
    params2 = init_params(k_params2, vocab2)
    tokens2 = jax.random.randint(k_tokens, (seq_len, batch), 0, vocab2,
                                 dtype=jnp.int32)
    fwd_tiled = jax.jit(functools.partial(bigru_lm_forward, force_vocab_tile=128))
    out2 = jax.block_until_ready(fwd_tiled(tokens2, params2))
    assert out2.shape == (seq_len, batch, vocab2), out2.shape
    ref2 = jax.block_until_ready(ref_fn(tokens2, params2, mxu_dtype=jnp.bfloat16))
    err2 = float(jnp.max(jnp.abs(out2 - ref2)))
    assert err2 < 1e-2, err2

    print("KERNEL_OK")
</pallas_src>

<mosaic_0001>
module attributes {stable_mosaic.version = 11 : i64} {
  func.func @gru_kernel(%arg0: i32, %arg1: memref<88x2x384xf32, #tpu.memory_space<vmem>>, %arg2: memref<88x2x384xf32, #tpu.memory_space<vmem>>, %arg3: memref<256x384xbf16, #tpu.memory_space<vmem>>, %arg4: memref<2x1x128xf32, #tpu.memory_space<vmem>>, %arg5: memref<88x2x128xbf16, #tpu.memory_space<vmem>>, %arg6: memref<88x2x128xbf16, #tpu.memory_space<vmem>>, %arg7: memref<4x256xf32, #tpu.memory_space<vmem>>) attributes {dimension_semantics = [#tpu.dimension_semantics<arbitrary>], iteration_bounds = array<i64: 2>, scalar_prefetch = 0 : i64, scratch_operands = 1 : i64, tpu.core_type = #tpu.core_type<tc>, window_params = [{transform_indices = @transform_0, window_bounds = array<i64: 88, 2, 384>}, {transform_indices = @transform_1, window_bounds = array<i64: 88, 2, 384>}, {pipeline_mode = #tpu.pipeline_mode<synchronous>, transform_indices = @transform_2, window_bounds = array<i64: 256, 384>}, {pipeline_mode = #tpu.pipeline_mode<synchronous>, transform_indices = @transform_3, window_bounds = array<i64: 2, 1, 128>}, {transform_indices = @transform_4, window_bounds = array<i64: 88, 2, 128>}, {transform_indices = @transform_5, window_bounds = array<i64: 88, 2, 128>}]} {
    %c0_i32 = arith.constant 0 : i32
    %0 = arith.cmpi eq, %arg0, %c0_i32 : i32
    %1 = arith.extui %0 : i1 to i32
    %c0_i32_0 = arith.constant 0 : i32
    %2 = arith.cmpi ne, %1, %c0_i32_0 : i32
    scf.if %2 {
      %cst = arith.constant 0.000000e+00 : f32
      %13 = vector.broadcast %cst : f32 to vector<4x256xf32>
      %c0_9 = arith.constant 0 : index
      %c0_10 = arith.constant 0 : index
      %14 = vector.load %arg7[%c0_9, %c0_10] : memref<4x256xf32, #tpu.memory_space<vmem>>, vector<4x256xf32>
      tpu.vector_store %arg7[%c0_9, %c0_10], %13 {strides = array<i32>} : memref<4x256xf32, #tpu.memory_space<vmem>>, vector<4x256xf32>,
    } else {
    }
    %c0 = arith.constant 0 : index
    %c0_1 = arith.constant 0 : index
    %3 = vector.load %arg3[%c0, %c0_1] : memref<256x384xbf16, #tpu.memory_space<vmem>>, vector<256x384xbf16>
    %c0_2 = arith.constant 0 : index
    %c0_3 = arith.constant 0 : index
    %c0_4 = arith.constant 0 : index
    %4 = vector.load %arg4[%c0_2, %c0_3, %c0_4] : memref<2x1x128xf32, #tpu.memory_space<vmem>>, vector<1x1x128xf32>
    %5 = vector.shape_cast %4 : vector<1x1x128xf32> to vector<1x128xf32>
    %6 = vector.shape_cast %5 : vector<1x128xf32> to vector<1x128xf32>
    %7 = vector.broadcast %6 : vector<1x128xf32> to vector<2x128xf32>
    %c1 = arith.constant 1 : index
    %c0_5 = arith.constant 0 : index
    %c0_6 = arith.constant 0 : index
    %8 = vector.load %arg4[%c1, %c0_5, %c0_6] : memref<2x1x128xf32, #tpu.memory_space<vmem>>, vector<1x1x128xf32>
    %9 = vector.shape_cast %8 : vector<1x1x128xf32> to vector<1x128xf32>
    %10 = vector.shape_cast %9 : vector<1x128xf32> to vector<1x128xf32>
    %11 = vector.broadcast %10 : vector<1x128xf32> to vector<2x128xf32>
    %c0_i32_7 = arith.constant 0 : i32
    %c11_i32 = arith.constant 11 : i32
    %12 = arith.addi %c0_i32_7, %c11_i32 : i32
    %c1_i32 = arith.constant 1 : i32
    scf.for %arg8 = %c0_i32_7 to %12 step %c1_i32  : i32 {
      %c8_i32 = arith.constant 8 : i32
      %13 = arith.muli %arg8, %c8_i32 : i32
      %14 = tpu.assume_multiple %13, 8 : i32
      %c0_i32_9 = arith.constant 0 : i32
      %15 = arith.addi %14, %c0_i32_9 : i32
      %c87_i32 = arith.constant 87 : i32
      %16 = arith.subi %c87_i32, %15 : i32
      %c0_10 = arith.constant 0 : index
      %c0_11 = arith.constant 0 : index
      %17 = vector.load %arg7[%c0_10, %c0_11] : memref<4x256xf32, #tpu.memory_space<vmem>>, vector<2x128xf32>
      %c2 = arith.constant 2 : index
      %c128 = arith.constant 128 : index
      %18 = vector.load %arg7[%c2, %c128] : memref<4x256xf32, #tpu.memory_space<vmem>>, vector<2x128xf32>
      %19 = arith.truncf %17 : vector<2x128xf32> to vector<2x128xbf16>
      %20 = arith.index_cast %15 : i32 to index
      %c0_12 = arith.constant 0 : index
      %c0_13 = arith.constant 0 : index
      %21 = vector.load %arg5[%20, %c0_12, %c0_13] : memref<88x2x128xbf16, #tpu.memory_space<vmem>>, vector<1x2x128xbf16>
      %22 = vector.shape_cast %21 : vector<1x2x128xbf16> to vector<2x128xbf16>
      %23 = vector.shape_cast %19 : vector<2x128xbf16> to vector<1x2x128xbf16>
      tpu.vector_store %arg5[%20, %c0_12, %c0_13], %23 {strides = array<i32>} : memref<88x2x128xbf16, #tpu.memory_space<vmem>>, vector<1x2x128xbf16>,
      %24 = arith.truncf %18 : vector<2x128xf32> to vector<2x128xbf16>
      %25 = arith.index_cast %16 : i32 to index
      %c0_14 = arith.constant 0 : index
      %c0_15 = arith.constant 0 : index
      %26 = vector.load %arg6[%25, %c0_14, %c0_15] : memref<88x2x128xbf16, #tpu.memory_space<vmem>>, vector<1x2x128xbf16>
      %27 = vector.shape_cast %26 : vector<1x2x128xbf16> to vector<2x128xbf16>
      %28 = vector.shape_cast %24 : vector<2x128xbf16> to vector<1x2x128xbf16>
      tpu.vector_store %arg6[%25, %c0_14, %c0_15], %28 {strides = array<i32>} : memref<88x2x128xbf16, #tpu.memory_space<vmem>>, vector<1x2x128xbf16>,
      %c0_16 = arith.constant 0 : index
      %c0_17 = arith.constant 0 : index
      %29 = vector.load %arg7[%c0_16, %c0_17] : memref<4x256xf32, #tpu.memory_space<vmem>>, vector<4x256xf32>
      %30 = arith.truncf %29 : vector<4x256xf32> to vector<4x256xbf16>
      %cst = arith.constant dense<0.000000e+00> : vector<4x384xf32>
      %31 = tpu.matmul %30, %3, %cst {dimension_numbers = #tpu.dot_dimension_numbers<[1], [0], [0], [1], [0, 0, 1, 1], [], []>} : vector<4x256xbf16>, vector<256x384xbf16>, vector<4x384xf32> -> vector<4x384xf32>
      %32 = arith.index_cast %15 : i32 to index
      %c0_18 = arith.constant 0 : index
      %c0_19 = arith.constant 0 : index
      %33 = vector.load %arg1[%32, %c0_18, %c0_19] : memref<88x2x384xf32, #tpu.memory_space<vmem>>, vector<1x2x384xf32>
      %34 = vector.shape_cast %33 : vector<1x2x384xf32> to vector<2x384xf32>
      %35 = vector.extract_strided_slice %31 {offsets = [0, 0], sizes = [2, 384], strides = [1, 1]} : vector<4x384xf32> to vector<2x384xf32>
      %36 = vector.extract_strided_slice %34 {offsets = [0, 0], sizes = [2, 128], strides = [1, 1]} : vector<2x384xf32> to vector<2x128xf32>
      %37 = vector.extract_strided_slice %35 {offsets = [0, 0], sizes = [2, 128], strides = [1, 1]} : vector<2x384xf32> to vector<2x128xf32>
      %38 = arith.addf %36, %37 : vector<2x128xf32>
      %39 = arith.negf %38 : vector<2x128xf32>
      %40 = math.exp %39 : vector<2x128xf32>
      %cst_20 = arith.constant 1.000000e+00 : f32
      %41 = vector.broadcast %cst_20 : f32 to vector<2x128xf32>
      %42 = arith.addf %41, %40 : vector<2x128xf32>
      %43 = arith.divf %41, %42 : vector<2x128xf32>
      %44 = vector.extract_strided_slice %34 {offsets = [0, 128], sizes = [2, 128], strides = [1, 1]} : vector<2x384xf32> to vector<2x128xf32>
      %45 = vector.extract_strided_slice %35 {offsets = [0, 128], sizes = [2, 128], strides = [1, 1]} : vector<2x384xf32> to vector<2x128xf32>
      %46 = arith.addf %44, %45 : vector<2x128xf32>
      %47 = arith.negf %46 : vector<2x128xf32>
      %48 = math.exp %47 : vector<2x128xf32>
      %cst_21 = arith.constant 1.000000e+00 : f32
      %49 = vector.broadcast %cst_21 : f32 to vector<2x128xf32>
      %50 = arith.addf %49, %48 : vector<2x128xf32>
      %51 = arith.divf %49, %50 : vector<2x128xf32>
      %52 = vector.extract_strided_slice %34 {offsets = [0, 256], sizes = [2, 128], strides = [1, 1]} : vector<2x384xf32> to vector<2x128xf32>
      %53 = vector.extract_strided_slice %35 {offsets = [0, 256], sizes = [2, 128], strides = [1, 1]} : vector<2x384xf32> to vector<2x128xf32>
      %54 = arith.addf %53, %7 : vector<2x128xf32>
      %55 = arith.mulf %43, %54 : vector<2x128xf32>
      %56 = arith.addf %52, %55 : vector<2x128xf32>
      %57 = math.tanh %56 : vector<2x128xf32>
      %58 = arith.subf %17, %57 : vector<2x128xf32>
      %59 = arith.mulf %51, %58 : vector<2x128xf32>
      %60 = arith.addf %57, %59 : vector<2x128xf32>
      %c0_22 = arith.constant 0 : index
      %c0_23 = arith.constant 0 : index
      %61 = vector.load %arg7[%c0_22, %c0_23] : memref<4x256xf32, #tpu.memory_space<vmem>>, vector<2x128xf32>
      tpu.vector_store %arg7[%c0_22, %c0_23], %60 {strides = array<i32>} : memref<4x256xf32, #tpu.memory_space<vmem>>, vector<2x128xf32>,
      %62 = arith.index_cast %16 : i32 to index
      %c0_24 = arith.constant 0 : index
      %c0_25 = arith.constant 0 : index
      %63 = vector.load %arg2[%62, %c0_24, %c0_25] : memref<88x2x384xf32, #tpu.memory_space<vmem>>, vector<1x2x384xf32>
      %64 = vector.shape_cast %63 : vector<1x2x384xf32> to vector<2x384xf32>
      %65 = vector.extract_strided_slice %31 {offsets = [2, 0], sizes = [2, 384], strides = [1, 1]} : vector<4x384xf32> to vector<2x384xf32>
      %66 = vector.extract_strided_slice %64 {offsets = [0, 0], sizes = [2, 128], strides = [1, 1]} : vector<2x384xf32> to vector<2x128xf32>
      %67 = vector.extract_strided_slice %65 {offsets = [0, 0], sizes = [2, 128], strides = [1, 1]} : vector<2x384xf32> to vector<2x128xf32>
      %68 = arith.addf %66, %67 : vector<2x128xf32>
      %69 = arith.negf %68 : vector<2x128xf32>
      %70 = math.exp %69 : vector<2x128xf32>
      %cst_26 = arith.constant 1.000000e+00 : f32
      %71 = vector.broadcast %cst_26 : f32 to vector<2x128xf32>
      %72 = arith.addf %71, %70 : vector<2x128xf32>
      %73 = arith.divf %71, %72 : vector<2x128xf32>
      %74 = vector.extract_strided_slice %64 {offsets = [0, 128], sizes = [2, 128], strides = [1, 1]} : vector<2x384xf32> to vector<2x128xf32>
      %75 = vector.extract_strided_slice %65 {offsets = [0, 128], sizes = [2, 128], strides = [1, 1]} : vector<2x384xf32> to vector<2x128xf32>
      %76 = arith.addf %74, %75 : vector<2x128xf32>
      %77 = arith.negf %76 : vector<2x128xf32>
      %78 = math.exp %77 : vector<2x128xf32>
      %cst_27 = arith.constant 1.000000e+00 : f32
      %79 = vector.broadcast %cst_27 : f32 to vector<2x128xf32>
      %80 = arith.addf %79, %78 : vector<2x128xf32>
      %81 = arith.divf %79, %80 : vector<2x128xf32>
      %82 = vector.extract_strided_slice %64 {offsets = [0, 256], sizes = [2, 128], strides = [1, 1]} : vector<2x384xf32> to vector<2x128xf32>
      %83 = vector.extract_strided_slice %65 {offsets = [0, 256], sizes = [2, 128], strides = [1, 1]} : vector<2x384xf32> to vector<2x128xf32>
      %84 = arith.addf %83, %11 : vector<2x128xf32>
      %85 = arith.mulf %73, %84 : vector<2x128xf32>
      %86 = arith.addf %82, %85 : vector<2x128xf32>
      %87 = math.tanh %86 : vector<2x128xf32>
      %88 = arith.subf %18, %87 : vector<2x128xf32>
      %89 = arith.mulf %81, %88 : vector<2x128xf32>
      %90 = arith.addf %87, %89 : vector<2x128xf32>
      %c2_28 = arith.constant 2 : index
      %c128_29 = arith.constant 128 : index
      %91 = vector.load %arg7[%c2_28, %c128_29] : memref<4x256xf32, #tpu.memory_space<vmem>>, vector<2x128xf32>
      tpu.vector_store %arg7[%c2_28, %c128_29], %90 {strides = array<i32>} : memref<4x256xf32, #tpu.memory_space<vmem>>, vector<2x128xf32>,
      %c1_i32_30 = arith.constant 1 : i32
      %92 = arith.addi %14, %c1_i32_30 : i32
      %c87_i32_31 = arith.constant 87 : i32
      %93 = arith.subi %c87_i32_31, %92 : i32
      %c0_32 = arith.constant 0 : index
      %c0_33 = arith.constant 0 : index
      %94 = vector.load %arg7[%c0_32, %c0_33] : memref<4x256xf32, #tpu.memory_space<vmem>>, vector<2x128xf32>
      %c2_34 = arith.constant 2 : index
      %c128_35 = arith.constant 128 : index
      %95 = vector.load %arg7[%c2_34, %c128_35] : memref<4x256xf32, #tpu.memory_space<vmem>>, vector<2x128xf32>
      %96 = arith.truncf %94 : vector<2x128xf32> to vector<2x128xbf16>
      %97 = arith.index_cast %92 : i32 to index
      %c0_36 = arith.constant 0 : index
      %c0_37 = arith.constant 0 : index
      %98 = vector.load %arg5[%97, %c0_36, %c0_37] : memref<88x2x128xbf16, #tpu.memory_space<vmem>>, vector<1x2x128xbf16>
      %99 = vector.shape_cast %98 : vector<1x2x128xbf16> to vector<2x128xbf16>
      %100 = vector.shape_cast %96 : vector<2x128xbf16> to vector<1x2x128xbf16>
      tpu.vector_store %arg5[%97, %c0_36, %c0_37], %100 {strides = array<i32>} : memref<88x2x128xbf16, #tpu.memory_space<vmem>>, vector<1x2x128xbf16>,
      %101 = arith.truncf %95 : vector<2x128xf32> to vector<2x128xbf16>
      %102 = arith.index_cast %93 : i32 to index
      %c0_38 = arith.constant 0 : index
      %c0_39 = arith.constant 0 : index
      %103 = vector.load %arg6[%102, %c0_38, %c0_39] : memref<88x2x128xbf16, #tpu.memory_space<vmem>>, vector<1x2x128xbf16>
      %104 = vector.shape_cast %103 : vector<1x2x128xbf16> to vector<2x128xbf16>
      %105 = vector.shape_cast %101 : vector<2x128xbf16> to vector<1x2x128xbf16>
      tpu.vector_store %arg6[%102, %c0_38, %c0_39], %105 {strides = array<i32>} : memref<88x2x128xbf16, #tpu.memory_space<vmem>>, vector<1x2x128xbf16>,
      %c0_40 = arith.constant 0 : index
      %c0_41 = arith.constant 0 : index
      %106 = vector.load %arg7[%c0_40, %c0_41] : memref<4x256xf32, #tpu.memory_space<vmem>>, vector<4x256xf32>
      %107 = arith.truncf %106 : vector<4x256xf32> to vector<4x256xbf16>
      %cst_42 = arith.constant dense<0.000000e+00> : vector<4x384xf32>
      %108 = tpu.matmul %107, %3, %cst_42 {dimension_numbers = #tpu.dot_dimension_numbers<[1], [0], [0], [1], [0, 0, 1, 1], [], []>} : vector<4x256xbf16>, vector<256x384xbf16>, vector<4x384xf32> -> vector<4x384xf32>
      %109 = arith.index_cast %92 : i32 to index
      %c0_43 = arith.constant 0 : index
      %c0_44 = arith.constant 0 : index
      %110 = vector.load %arg1[%109, %c0_43, %c0_44] : memref<88x2x384xf32, #tpu.memory_space<vmem>>, vector<1x2x384xf32>
      %111 = vector.shape_cast %110 : vector<1x2x384xf32> to vector<2x384xf32>
      %112 = vector.extract_strided_slice %108 {offsets = [0, 0], sizes = [2, 384], strides = [1, 1]} : vector<4x384xf32> to vector<2x384xf32>
      %113 = vector.extract_strided_slice %111 {offsets = [0, 0], sizes = [2, 128], strides = [1, 1]} : vector<2x384xf32> to vector<2x128xf32>
      %114 = vector.extract_strided_slice %112 {offsets = [0, 0], sizes = [2, 128], strides = [1, 1]} : vector<2x384xf32> to vector<2x128xf32>
      %115 = arith.addf %113, %114 : vector<2x128xf32>
      %116 = arith.negf %115 : vector<2x128xf32>
      %117 = math.exp %116 : vector<2x128xf32>
      %cst_45 = arith.constant 1.000000e+00 : f32
      %118 = vector.broadcast %cst_45 : f32 to vector<2x128xf32>
      %119 = arith.addf %118, %117 : vector<2x128xf32>
      %120 = arith.divf %118, %119 : vector<2x128xf32>
      %121 = vector.extract_strided_slice %111 {offsets = [0, 128], sizes = [2, 128], strides = [1, 1]} : vector<2x384xf32> to vector<2x128xf32>
      %122 = vector.extract_strided_slice %112 {offsets = [0, 128], sizes = [2, 128], strides = [1, 1]} : vector<2x384xf32> to vector<2x128xf32>
      %123 = arith.addf %121, %122 : vector<2x128xf32>
      %124 = arith.negf %123 : vector<2x128xf32>
      %125 = math.exp %124 : vector<2x128xf32>
      %cst_46 = arith.constant 1.000000e+00 : f32
      %126 = vector.broadcast %cst_46 : f32 to vector<2x128xf32>
      %127 = arith.addf %126, %125 : vector<2x128xf32>
      %128 = arith.divf %126, %127 : vector<2x128xf32>
      %129 = vector.extract_strided_slice %111 {offsets = [0, 256], sizes = [2, 128], strides = [1, 1]} : vector<2x384xf32> to vector<2x128xf32>
      %130 = vector.extract_strided_slice %112 {offsets = [0, 256], sizes = [2, 128], strides = [1, 1]} : vector<2x384xf32> to vector<2x128xf32>
      %131 = arith.addf %130, %7 : vector<2x128xf32>
      %132 = arith.mulf %120, %131 : vector<2x128xf32>
      %133 = arith.addf %129, %132 : vector<2x128xf32>
      %134 = math.tanh %133 : vector<2x128xf32>
      %135 = arith.subf %94, %134 : vector<2x128xf32>
      %136 = arith.mulf %128, %135 : vector<2x128xf32>
      %137 = arith.addf %134, %136 : vector<2x128xf32>
      %c0_47 = arith.constant 0 : index
      %c0_48 = arith.constant 0 : index
      %138 = vector.load %arg7[%c0_47, %c0_48] : memref<4x256xf32, #tpu.memory_space<vmem>>, vector<2x128xf32>
      tpu.vector_store %arg7[%c0_47, %c0_48], %137 {strides = array<i32>} : memref<4x256xf32, #tpu.memory_space<vmem>>, vector<2x128xf32>,
      %139 = arith.index_cast %93 : i32 to index
      %c0_49 = arith.constant 0 : index
      %c0_50 = arith.constant 0 : index
      %140 = vector.load %arg2[%139, %c0_49, %c0_50] : memref<88x2x384xf32, #tpu.memory_space<vmem>>, vector<1x2x384xf32>
      %141 = vector.shape_cast %140 : vector<1x2x384xf32> to vector<2x384xf32>
      %142 = vector.extract_strided_slice %108 {offsets = [2, 0], sizes = [2, 384], strides = [1, 1]} : vector<4x384xf32> to vector<2x384xf32>
      %143 = vector.extract_strided_slice %141 {offsets = [0, 0], sizes = [2, 128], strides = [1, 1]} : vector<2x384xf32> to vector<2x128xf32>
      %144 = vector.extract_strided_slice %142 {offsets = [0, 0], sizes = [2, 128], strides = [1, 1]} : vector<2x384xf32> to vector<2x128xf32>
      %145 = arith.addf %143, %144 : vector<2x128xf32>
      %146 = arith.negf %145 : vector<2x128xf32>
      %147 = math.exp %146 : vector<2x128xf32>
      %cst_51 = arith.constant 1.000000e+00 : f32
      %148 = vector.broadcast %cst_51 : f32 to vector<2x128xf32>
      %149 = arith.addf %148, %147 : vector<2x128xf32>
      %150 = arith.divf %148, %149 : vector<2x128xf32>
      %151 = vector.extract_strided_slice %141 {offsets = [0, 128], sizes = [2, 128], strides = [1, 1]} : vector<2x384xf32> to vector<2x128xf32>
      %152 = vector.extract_strided_slice %142 {offsets = [0, 128], sizes = [2, 128], strides = [1, 1]} : vector<2x384xf32> to vector<2x128xf32>
      %153 = arith.addf %151, %152 : vector<2x128xf32>
      %154 = arith.negf %153 : vector<2x128xf32>
      %155 = math.exp %154 : vector<2x128xf32>
      %cst_52 = arith.constant 1.000000e+00 : f32
      %156 = vector.broadcast %cst_52 : f32 to vector<2x128xf32>
      %157 = arith.addf %156, %155 : vector<2x128xf32>
      %158 = arith.divf %156, %157 : vector<2x128xf32>
      %159 = vector.extract_strided_slice %141 {offsets = [0, 256], sizes = [2, 128], strides = [1, 1]} : vector<2x384xf32> to vector<2x128xf32>
      %160 = vector.extract_strided_slice %142 {offsets = [0, 256], sizes = [2, 128], strides = [1, 1]} : vector<2x384xf32> to vector<2x128xf32>
      %161 = arith.addf %160, %11 : vector<2x128xf32>
      %162 = arith.mulf %150, %161 : vector<2x128xf32>
      %163 = arith.addf %159, %162 : vector<2x128xf32>
      %164 = math.tanh %163 : vector<2x128xf32>
      %165 = arith.subf %95, %164 : vector<2x128xf32>
      %166 = arith.mulf %158, %165 : vector<2x128xf32>
      %167 = arith.addf %164, %166 : vector<2x128xf32>
      %c2_53 = arith.constant 2 : index
      %c128_54 = arith.constant 128 : index
      %168 = vector.load %arg7[%c2_53, %c128_54] : memref<4x256xf32, #tpu.memory_space<vmem>>, vector<2x128xf32>
      tpu.vector_store %arg7[%c2_53, %c128_54], %167 {strides = array<i32>} : memref<4x256xf32, #tpu.memory_space<vmem>>, vector<2x128xf32>,
      %c2_i32 = arith.constant 2 : i32
      %169 = arith.addi %14, %c2_i32 : i32
      %c87_i32_55 = arith.constant 87 : i32
      %170 = arith.subi %c87_i32_55, %169 : i32
      %c0_56 = arith.constant 0 : index
      %c0_57 = arith.constant 0 : index
      %171 = vector.load %arg7[%c0_56, %c0_57] : memref<4x256xf32, #tpu.memory_space<vmem>>, vector<2x128xf32>
      %c2_58 = arith.constant 2 : index
      %c128_59 = arith.constant 128 : index
      %172 = vector.load %arg7[%c2_58, %c128_59] : memref<4x256xf32, #tpu.memory_space<vmem>>, vector<2x128xf32>
      %173 = arith.truncf %171 : vector<2x128xf32> to vector<2x128xbf16>
      %174 = arith.index_cast %169 : i32 to index
      %c0_60 = arith.constant 0 : index
      %c0_61 = arith.constant 0 : index
      %175 = vector.load %arg5[%174, %c0_60, %c0_61] : memref<88x2x128xbf16, #tpu.memory_space<vmem>>, vector<1x2x128xbf16>
      %176 = vector.shape_cast %175 : vector<1x2x128xbf16> to vector<2x128xbf16>
      %177 = vector.shape_cast %173 : vector<2x128xbf16> to vector<1x2x128xbf16>
      tpu.vector_store %arg5[%174, %c0_60, %c0_61], %177 {strides = array<i32>} : memref<88x2x128xbf16, #tpu.memory_space<vmem>>, vector<1x2x128xbf16>,
      %178 = arith.truncf %172 : vector<2x128xf32> to vector<2x128xbf16>
      %179 = arith.index_cast %170 : i32 to index
      %c0_62 = arith.constant 0 : index
      %c0_63 = arith.constant 0 : index
      %180 = vector.load %arg6[%179, %c0_62, %c0_63] : memref<88x2x128xbf16, #tpu.memory_space<vmem>>, vector<1x2x128xbf16>
      %181 = vector.shape_cast %180 : vector<1x2x128xbf16> to vector<2x128xbf16>
      %182 = vector.shape_cast %178 : vector<2x128xbf16> to vector<1x2x128xbf16>
      tpu.vector_store %arg6[%179, %c0_62, %c0_63], %182 {strides = array<i32>} : memref<88x2x128xbf16, #tpu.memory_space<vmem>>, vector<1x2x128xbf16>,
      %c0_64 = arith.constant 0 : index
      %c0_65 = arith.constant 0 : index
      %183 = vector.load %arg7[%c0_64, %c0_65] : memref<4x256xf32, #tpu.memory_space<vmem>>, vector<4x256xf32>
      %184 = arith.truncf %183 : vector<4x256xf32> to vector<4x256xbf16>
      %cst_66 = arith.constant dense<0.000000e+00> : vector<4x384xf32>
      %185 = tpu.matmul %184, %3, %cst_66 {dimension_numbers = #tpu.dot_dimension_numbers<[1], [0], [0], [1], [0, 0, 1, 1], [], []>} : vector<4x256xbf16>, vector<256x384xbf16>, vector<4x384xf32> -> vector<4x384xf32>
      %186 = arith.index_cast %169 : i32 to index
      %c0_67 = arith.constant 0 : index
      %c0_68 = arith.constant 0 : index
      %187 = vector.load %arg1[%186, %c0_67, %c0_68] : memref<88x2x384xf32, #tpu.memory_space<vmem>>, vector<1x2x384xf32>
      %188 = vector.shape_cast %187 : vector<1x2x384xf32> to vector<2x384xf32>
      %189 = vector.extract_strided_slice %185 {offsets = [0, 0], sizes = [2, 384], strides = [1, 1]} : vector<4x384xf32> to vector<2x384xf32>
      %190 = vector.extract_strided_slice %188 {offsets = [0, 0], sizes = [2, 128], strides = [1, 1]} : vector<2x384xf32> to vector<2x128xf32>
      %191 = vector.extract_strided_slice %189 {offsets = [0, 0], sizes = [2, 128], strides = [1, 1]} : vector<2x384xf32> to vector<2x128xf32>
      %192 = arith.addf %190, %191 : vector<2x128xf32>
      %193 = arith.negf %192 : vector<2x128xf32>
      %194 = math.exp %193 : vector<2x128xf32>
      %cst_69 = arith.constant 1.000000e+00 : f32
      %195 = vector.broadcast %cst_69 : f32 to vector<2x128xf32>
      %196 = arith.addf %195, %194 : vector<2x128xf32>
      %197 = arith.divf %195, %196 : vector<2x128xf32>
      %198 = vector.extract_strided_slice %188 {offsets = [0, 128], sizes = [2, 128], strides = [1, 1]} : vector<2x384xf32> to vector<2x128xf32>
      %199 = vector.extract_strided_slice %189 {offsets = [0, 128], sizes = [2, 128], strides = [1, 1]} : vector<2x384xf32> to vector<2x128xf32>
      %200 = arith.addf %198, %199 : vector<2x128xf32>
      %201 = arith.negf %200 : vector<2x128xf32>
      %202 = math.exp %201 : vector<2x128xf32>
      %cst_70 = arith.constant 1.000000e+00 : f32
      %203 = vector.broadcast %cst_70 : f32 to vector<2x128xf32>
      %204 = arith.addf %203, %202 : vector<2x128xf32>
      %205 = arith.divf %203, %204 : vector<2x128xf32>
      %206 = vector.extract_strided_slice %188 {offsets = [0, 256], sizes = [2, 128], strides = [1, 1]} : vector<2x384xf32> to vector<2x128xf32>
      %207 = vector.extract_strided_slice %189 {offsets = [0, 256], sizes = [2, 128], strides = [1, 1]} : vector<2x384xf32> to vector<2x128xf32>
      %208 = arith.addf %207, %7 : vector<2x128xf32>
      %209 = arith.mulf %197, %208 : vector<2x128xf32>
      %210 = arith.addf %206, %209 : vector<2x128xf32>
      %211 = math.tanh %210 : vector<2x128xf32>
      %212 = arith.subf %171, %211 : vector<2x128xf32>
      %213 = arith.mulf %205, %212 : vector<2x128xf32>
      %214 = arith.addf %211, %213 : vector<2x128xf32>
      %c0_71 = arith.constant 0 : index
      %c0_72 = arith.constant 0 : index
      %215 = vector.load %arg7[%c0_71, %c0_72] : memref<4x256xf32, #tpu.memory_space<vmem>>, vector<2x128xf32>
      tpu.vector_store %arg7[%c0_71, %c0_72], %214 {strides = array<i32>} : memref<4x256xf32, #tpu.memory_space<vmem>>, vector<2x128xf32>,
      %216 = arith.index_cast %170 : i32 to index
      %c0_73 = arith.constant 0 : index
      %c0_74 = arith.constant 0 : index
      %217 = vector.load %arg2[%216, %c0_73, %c0_74] : memref<88x2x384xf32, #tpu.memory_space<vmem>>, vector<1x2x384xf32>
      %218 = vector.shape_cast %217 : vector<1x2x384xf32> to vector<2x384xf32>
      %219 = vector.extract_strided_slice %185 {offsets = [2, 0], sizes = [2, 384], strides = [1, 1]} : vector<4x384xf32> to vector<2x384xf32>
      %220 = vector.extract_strided_slice %218 {offsets = [0, 0], sizes = [2, 128], strides = [1, 1]} : vector<2x384xf32> to vector<2x128xf32>
      %221 = vector.extract_strided_slice %219 {offsets = [0, 0], sizes = [2, 128], strides = [1, 1]} : vector<2x384xf32> to vector<2x128xf32>
      %222 = arith.addf %220, %221 : vector<2x128xf32>
      %223 = arith.negf %222 : vector<2x128xf32>
      %224 = math.exp %223 : vector<2x128xf32>
      %cst_75 = arith.constant 1.000000e+00 : f32
      %225 = vector.broadcast %cst_75 : f32 to vector<2x128xf32>
      %226 = arith.addf %225, %224 : vector<2x128xf32>
      %227 = arith.divf %225, %226 : vector<2x128xf32>
      %228 = vector.extract_strided_slice %218 {offsets = [0, 128], sizes = [2, 128], strides = [1, 1]} : vector<2x384xf32> to vector<2x128xf32>
      %229 = vector.extract_strided_slice %219 {offsets = [0, 128], sizes = [2, 128], strides = [1, 1]} : vector<2x384xf32> to vector<2x128xf32>
      %230 = arith.addf %228, %229 : vector<2x128xf32>
      %231 = arith.negf %230 : vector<2x128xf32>
      %232 = math.exp %231 : vector<2x128xf32>
      %cst_76 = arith.constant 1.000000e+00 : f32
      %233 = vector.broadcast %cst_76 : f32 to vector<2x128xf32>
      %234 = arith.addf %233, %232 : vector<2x128xf32>
      %235 = arith.divf %233, %234 : vector<2x128xf32>
      %236 = vector.extract_strided_slice %218 {offsets = [0, 256], sizes = [2, 128], strides = [1, 1]} : vector<2x384xf32> to vector<2x128xf32>
      %237 = vector.extract_strided_slice %219 {offsets = [0, 256], sizes = [2, 128], strides = [1, 1]} : vector<2x384xf32> to vector<2x128xf32>
      %238 = arith.addf %237, %11 : vector<2x128xf32>
      %239 = arith.mulf %227, %238 : vector<2x128xf32>
      %240 = arith.addf %236, %239 : vector<2x128xf32>
      %241 = math.tanh %240 : vector<2x128xf32>
      %242 = arith.subf %172, %241 : vector<2x128xf32>
      %243 = arith.mulf %235, %242 : vector<2x128xf32>
      %244 = arith.addf %241, %243 : vector<2x128xf32>
      %c2_77 = arith.constant 2 : index
      %c128_78 = arith.constant 128 : index
      %245 = vector.load %arg7[%c2_77, %c128_78] : memref<4x256xf32, #tpu.memory_space<vmem>>, vector<2x128xf32>
      tpu.vector_store %arg7[%c2_77, %c128_78], %244 {strides = array<i32>} : memref<4x256xf32, #tpu.memory_space<vmem>>, vector<2x128xf32>,
      %c3_i32 = arith.constant 3 : i32
      %246 = arith.addi %14, %c3_i32 : i32
      %c87_i32_79 = arith.constant 87 : i32
      %247 = arith.subi %c87_i32_79, %246 : i32
      %c0_80 = arith.constant 0 : index
      %c0_81 = arith.constant 0 : index
      %248 = vector.load %arg7[%c0_80, %c0_81] : memref<4x256xf32, #tpu.memory_space<vmem>>, vector<2x128xf32>
      %c2_82 = arith.constant 2 : index
      %c128_83 = arith.constant 128 : index
      %249 = vector.load %arg7[%c2_82, %c128_83] : memref<4x256xf32, #tpu.memory_space<vmem>>, vector<2x128xf32>
      %250 = arith.truncf %248 : vector<2x128xf32> to vector<2x128xbf16>
      %251 = arith.index_cast %246 : i32 to index
      %c0_84 = arith.constant 0 : index
      %c0_85 = arith.constant 0 : index
      %252 = vector.load %arg5[%251, %c0_84, %c0_85] : memref<88x2x128xbf16, #tpu.memory_space<vmem>>, vector<1x2x128xbf16>
      %253 = vector.shape_cast %252 : vector<1x2x128xbf16> to vector<2x128xbf16>
      %254 = vector.shape_cast %250 : vector<2x128xbf16> to vector<1x2x128xbf16>
      tpu.vector_store %arg5[%251, %c0_84, %c0_85], %254 {strides = array<i32>} : memref<88x2x128xbf16, #tpu.memory_space<vmem>>, vector<1x2x128xbf16>,
      %255 = arith.truncf %249 : vector<2x128xf32> to vector<2x128xbf16>
      %256 = arith.index_cast %247 : i32 to index
      %c0_86 = arith.constant 0 : index
      %c0_87 = arith.constant 0 : index
      %257 = vector.load %arg6[%256, %c0_86, %c0_87] : memref<88x2x128xbf16, #tpu.memory_space<vmem>>, vector<1x2x128xbf16>
      %258 = vector.shape_cast %257 : vector<1x2x128xbf16> to vector<2x128xbf16>
      %259 = vector.shape_cast %255 : vector<2x128xbf16> to vector<1x2x128xbf16>
      tpu.vector_store %arg6[%256, %c0_86, %c0_87], %259 {strides = array<i32>} : memref<88x2x128xbf16, #tpu.memory_space<vmem>>, vector<1x2x128xbf16>,
      %c0_88 = arith.constant 0 : index
      %c0_89 = arith.constant 0 : index
      %260 = vector.load %arg7[%c0_88, %c0_89] : memref<4x256xf32, #tpu.memory_space<vmem>>, vector<4x256xf32>
      %261 = arith.truncf %260 : vector<4x256xf32> to vector<4x256xbf16>
      %cst_90 = arith.constant dense<0.000000e+00> : vector<4x384xf32>
      %262 = tpu.matmul %261, %3, %cst_90 {dimension_numbers = #tpu.dot_dimension_numbers<[1], [0], [0], [1], [0, 0, 1, 1], [], []>} : vector<4x256xbf16>, vector<256x384xbf16>, vector<4x384xf32> -> vector<4x384xf32>
      %263 = arith.index_cast %246 : i32 to index
      %c0_91 = arith.constant 0 : index
      %c0_92 = arith.constant 0 : index
      %264 = vector.load %arg1[%263, %c0_91, %c0_92] : memref<88x2x384xf32, #tpu.memory_space<vmem>>, vector<1x2x384xf32>
      %265 = vector.shape_cast %264 : vector<1x2x384xf32> to vector<2x384xf32>
      %266 = vector.extract_strided_slice %262 {offsets = [0, 0], sizes = [2, 384], strides = [1, 1]} : vector<4x384xf32> to vector<2x384xf32>
      %267 = vector.extract_strided_slice %265 {offsets = [0, 0], sizes = [2, 128], strides = [1, 1]} : vector<2x384xf32> to vector<2x128xf32>
      %268 = vector.extract_strided_slice %266 {offsets = [0, 0], sizes = [2, 128], strides = [1, 1]} : vector<2x384xf32> to vector<2x128xf32>
      %269 = arith.addf %267, %268 : vector<2x128xf32>
      %270 = arith.negf %269 : vector<2x128xf32>
      %271 = math.exp %270 : vector<2x128xf32>
      %cst_93 = arith.constant 1.000000e+00 : f32
      %272 = vector.broadcast %cst_93 : f32 to vector<2x128xf32>
      %273 = arith.addf %272, %271 : vector<2x128xf32>
      %274 = arith.divf %272, %273 : vector<2x128xf32>
      %275 = vector.extract_strided_slice %265 {offsets = [0, 128], sizes = [2, 128], strides = [1, 1]} : vector<2x384xf32> to vector<2x128xf32>
      %276 = vector.extract_strided_slice %266 {offsets = [0, 128], sizes = [2, 128], strides = [1, 1]} : vector<2x384xf32> to vector<2x128xf32>
      %277 = arith.addf %275, %276 : vector<2x128xf32>
      %278 = arith.negf %277 : vector<2x128xf32>
      %279 = math.exp %278 : vector<2x128xf32>
      %cst_94 = arith.constant 1.000000e+00 : f32
      %280 = vector.broadcast %cst_94 : f32 to vector<2x128xf32>
      %281 = arith.addf %280, %279 : vector<2x128xf32>
      %282 = arith.divf %280, %281 : vector<2x128xf32>
      %283 = vector.extract_strided_slice %265 {offsets = [0, 256], sizes = [2, 128], strides = [1, 1]} : vector<2x384xf32> to vector<2x128xf32>
      %284 = vector.extract_strided_slice %266 {offsets = [0, 256], sizes = [2, 128], strides = [1, 1]} : vector<2x384xf32> to vector<2x128xf32>
      %285 = arith.addf %284, %7 : vector<2x128xf32>
      %286 = arith.mulf %274, %285 : vector<2x128xf32>
      %287 = arith.addf %283, %286 : vector<2x128xf32>
      %288 = math.tanh %287 : vector<2x128xf32>
      %289 = arith.subf %248, %288 : vector<2x128xf32>
      %290 = arith.mulf %282, %289 : vector<2x128xf32>
      %291 = arith.addf %288, %290 : vector<2x128xf32>
      %c0_95 = arith.constant 0 : index
      %c0_96 = arith.constant 0 : index
      %292 = vector.load %arg7[%c0_95, %c0_96] : memref<4x256xf32, #tpu.memory_space<vmem>>, vector<2x128xf32>
      tpu.vector_store %arg7[%c0_95, %c0_96], %291 {strides = array<i32>} : memref<4x256xf32, #tpu.memory_space<vmem>>, vector<2x128xf32>,
      %293 = arith.index_cast %247 : i32 to index
      %c0_97 = arith.constant 0 : index
      %c0_98 = arith.constant 0 : index
      %294 = vector.load %arg2[%293, %c0_97, %c0_98] : memref<88x2x384xf32, #tpu.memory_space<vmem>>, vector<1x2x384xf32>
      %295 = vector.shape_cast %294 : vector<1x2x384xf32> to vector<2x384xf32>
      %296 = vector.extract_strided_slice %262 {offsets = [2, 0], sizes = [2, 384], strides = [1, 1]} : vector<4x384xf32> to vector<2x384xf32>
      %297 = vector.extract_strided_slice %295 {offsets = [0, 0], sizes = [2, 128], strides = [1, 1]} : vector<2x384xf32> to vector<2x128xf32>
      %298 = vector.extract_strided_slice %296 {offsets = [0, 0], sizes = [2, 128], strides = [1, 1]} : vector<2x384xf32> to vector<2x128xf32>
      %299 = arith.addf %297, %298 : vector<2x128xf32>
      %300 = arith.negf %299 : vector<2x128xf32>
      %301 = math.exp %300 : vector<2x128xf32>
      %cst_99 = arith.constant 1.000000e+00 : f32
      %302 = vector.broadcast %cst_99 : f32 to vector<2x128xf32>
      %303 = arith.addf %302, %301 : vector<2x128xf32>
      %304 = arith.divf %302, %303 : vector<2x128xf32>
      %305 = vector.extract_strided_slice %295 {offsets = [0, 128], sizes = [2, 128], strides = [1, 1]} : vector<2x384xf32> to vector<2x128xf32>
      %306 = vector.extract_strided_slice %296 {offsets = [0, 128], sizes = [2, 128], strides = [1, 1]} : vector<2x384xf32> to vector<2x128xf32>
      %307 = arith.addf %305, %306 : vector<2x128xf32>
      %308 = arith.negf %307 : vector<2x128xf32>
      %309 = math.exp %308 : vector<2x128xf32>
      %cst_100 = arith.constant 1.000000e+00 : f32
      %310 = vector.broadcast %cst_100 : f32 to vector<2x128xf32>
      %311 = arith.addf %310, %309 : vector<2x128xf32>
      %312 = arith.divf %310, %311 : vector<2x128xf32>
      %313 = vector.extract_strided_slice %295 {offsets = [0, 256], sizes = [2, 128], strides = [1, 1]} : vector<2x384xf32> to vector<2x128xf32>
      %314 = vector.extract_strided_slice %296 {offsets = [0, 256], sizes = [2, 128], strides = [1, 1]} : vector<2x384xf32> to vector<2x128xf32>
      %315 = arith.addf %314, %11 : vector<2x128xf32>
      %316 = arith.mulf %304, %315 : vector<2x128xf32>
      %317 = arith.addf %313, %316 : vector<2x128xf32>
      %318 = math.tanh %317 : vector<2x128xf32>
      %319 = arith.subf %249, %318 : vector<2x128xf32>
      %320 = arith.mulf %312, %319 : vector<2x128xf32>
      %321 = arith.addf %318, %320 : vector<2x128xf32>
      %c2_101 = arith.constant 2 : index
      %c128_102 = arith.constant 128 : index
      %322 = vector.load %arg7[%c2_101, %c128_102] : memref<4x256xf32, #tpu.memory_space<vmem>>, vector<2x128xf32>
      tpu.vector_store %arg7[%c2_101, %c128_102], %321 {strides = array<i32>} : memref<4x256xf32, #tpu.memory_space<vmem>>, vector<2x128xf32>,
      %c4_i32 = arith.constant 4 : i32
      %323 = arith.addi %14, %c4_i32 : i32
      %c87_i32_103 = arith.constant 87 : i32
      %324 = arith.subi %c87_i32_103, %323 : i32
      %c0_104 = arith.constant 0 : index
      %c0_105 = arith.constant 0 : index
      %325 = vector.load %arg7[%c0_104, %c0_105] : memref<4x256xf32, #tpu.memory_space<vmem>>, vector<2x128xf32>
      %c2_106 = arith.constant 2 : index
      %c128_107 = arith.constant 128 : index
      %326 = vector.load %arg7[%c2_106, %c128_107] : memref<4x256xf32, #tpu.memory_space<vmem>>, vector<2x128xf32>
      %327 = arith.truncf %325 : vector<2x128xf32> to vector<2x128xbf16>
      %328 = arith.index_cast %323 : i32 to index
      %c0_108 = arith.constant 0 : index
      %c0_109 = arith.constant 0 : index
      %329 = vector.load %arg5[%328, %c0_108, %c0_109] : memref<88x2x128xbf16, #tpu.memory_space<vmem>>, vector<1x2x128xbf16>
      %330 = vector.shape_cast %329 : vector<1x2x128xbf16> to vector<2x128xbf16>
      %331 = vector.shape_cast %327 : vector<2x128xbf16> to vector<1x2x128xbf16>
      tpu.vector_store %arg5[%328, %c0_108, %c0_109], %331 {strides = array<i32>} : memref<88x2x128xbf16, #tpu.memory_space<vmem>>, vector<1x2x128xbf16>,
      %332 = arith.truncf %326 : vector<2x128xf32> to vector<2x128xbf16>
      %333 = arith.index_cast %324 : i32 to index
      %c0_110 = arith.constant 0 : index
      %c0_111 = arith.constant 0 : index
      %334 = vector.load %arg6[%333, %c0_110, %c0_111] : memref<88x2x128xbf16, #tpu.memory_space<vmem>>, vector<1x2x128xbf16>
      %335 = vector.shape_cast %334 : vector<1x2x128xbf16> to vector<2x128xbf16>
      %336 = vector.shape_cast %332 : vector<2x128xbf16> to vector<1x2x128xbf16>
      tpu.vector_store %arg6[%333, %c0_110, %c0_111], %336 {strides = array<i32>} : memref<88x2x128xbf16, #tpu.memory_space<vmem>>, vector<1x2x128xbf16>,
      %c0_112 = arith.constant 0 : index
      %c0_113 = arith.constant 0 : index
      %337 = vector.load %arg7[%c0_112, %c0_113] : memref<4x256xf32, #tpu.memory_space<vmem>>, vector<4x256xf32>
      %338 = arith.truncf %337 : vector<4x256xf32> to vector<4x256xbf16>
      %cst_114 = arith.constant dense<0.000000e+00> : vector<4x384xf32>
      %339 = tpu.matmul %338, %3, %cst_114 {dimension_numbers = #tpu.dot_dimension_numbers<[1], [0], [0], [1], [0, 0, 1, 1], [], []>} : vector<4x256xbf16>, vector<256x384xbf16>, vector<4x384xf32> -> vector<4x384xf32>
      %340 = arith.index_cast %323 : i32 to index
      %c0_115 = arith.constant 0 : index
      %c0_116 = arith.constant 0 : index
      %341 = vector.load %arg1[%340, %c0_115, %c0_116] : memref<88x2x384xf32, #tpu.memory_space<vmem>>, vector<1x2x384xf32>
      %342 = vector.shape_cast %341 : vector<1x2x384xf32> to vector<2x384xf32>
      %343 = vector.extract_strided_slice %339 {offsets = [0, 0], sizes = [2, 384], strides = [1, 1]} : vector<4x384xf32> to vector<2x384xf32>
      %344 = vector.extract_strided_slice %342 {offsets = [0, 0], sizes = [2, 128], strides = [1, 1]} : vector<2x384xf32> to vector<2x128xf32>
      %345 = vector.extract_strided_slice %343 {offsets = [0, 0], sizes = [2, 128], strides = [1, 1]} : vector<2x384xf32> to vector<2x128xf32>
      %346 = arith.addf %344, %345 : vector<2x128xf32>
      %347 = arith.negf %346 : vector<2x128xf32>
      %348 = math.exp %347 : vector<2x128xf32>
      %cst_117 = arith.constant 1.000000e+00 : f32
      %349 = vector.broadcast %cst_117 : f32 to vector<2x128xf32>
      %350 = arith.addf %349, %348 : vector<2x128xf32>
      %351 = arith.divf %349, %350 : vector<2x128xf32>
      %352 = vector.extract_strided_slice %342 {offsets = [0, 128], sizes = [2, 128], strides = [1, 1]} : vector<2x384xf32> to vector<2x128xf32>
      %353 = vector.extract_strided_slice %343 {offsets = [0, 128], sizes = [2, 128], strides = [1, 1]} : vector<2x384xf32> to vector<2x128xf32>
      %354 = arith.addf %352, %353 : vector<2x128xf32>
      %355 = arith.negf %354 : vector<2x128xf32>
      %356 = math.exp %355 : vector<2x128xf32>
      %cst_118 = arith.constant 1.000000e+00 : f32
      %357 = vector.broadcast %cst_118 : f32 to vector<2x128xf32>
      %358 = arith.addf %357, %356 : vector<2x128xf32>
      %359 = arith.divf %357, %358 : vector<2x128xf32>
      %360 = vector.extract_strided_slice %342 {offsets = [0, 256], sizes = [2, 128], strides = [1, 1]} : vector<2x384xf32> to vector<2x128xf32>
      %361 = vector.extract_strided_slice %343 {offsets = [0, 256], sizes = [2, 128], strides = [1, 1]} : vector<2x384xf32> to vector<2x128xf32>
      %362 = arith.addf %361, %7 : vector<2x128xf32>
      %363 = arith.mulf %351, %362 : vector<2x128xf32>
      %364 = arith.addf %360, %363 : vector<2x128xf32>
      %365 = math.tanh %364 : vector<2x128xf32>
      %366 = arith.subf %325, %365 : vector<2x128xf32>
      %367 = arith.mulf %359, %366 : vector<2x128xf32>
      %368 = arith.addf %365, %367 : vector<2x128xf32>
      %c0_119 = arith.constant 0 : index
      %c0_120 = arith.constant 0 : index
      %369 = vector.load %arg7[%c0_119, %c0_120] : memref<4x256xf32, #tpu.memory_space<vmem>>, vector<2x128xf32>
      tpu.vector_store %arg7[%c0_119, %c0_120], %368 {strides = array<i32>} : memref<4x256xf32, #tpu.memory_space<vmem>>, vector<2x128xf32>,
      %370 = arith.index_cast %324 : i32 to index
      %c0_121 = arith.constant 0 : index
      %c0_122 = arith.constant 0 : index
      %371 = vector.load %arg2[%370, %c0_121, %c0_122] : memref<88x2x384xf32, #tpu.memory_space<vmem>>, vector<1x2x384xf32>
      %372 = vector.shape_cast %371 : vector<1x2x384xf32> to vector<2x384xf32>
      %373 = vector.extract_strided_slice %339 {offsets = [2, 0], sizes = [2, 384], strides = [1, 1]} : vector<4x384xf32> to vector<2x384xf32>
      %374 = vector.extract_strided_slice %372 {offsets = [0, 0], sizes = [2, 128], strides = [1, 1]} : vector<2x384xf32> to vector<2x128xf32>
      %375 = vector.extract_strided_slice %373 {offsets = [0, 0], sizes = [2, 128], strides = [1, 1]} : vector<2x384xf32> to vector<2x128xf32>
      %376 = arith.addf %374, %375 : vector<2x128xf32>
      %377 = arith.negf %376 : vector<2x128xf32>
      %378 = math.exp %377 : vector<2x128xf32>
      %cst_123 = arith.constant 1.000000e+00 : f32
      %379 = vector.broadcast %cst_123 : f32 to vector<2x128xf32>
      %380 = arith.addf %379, %378 : vector<2x128xf32>
      %381 = arith.divf %379, %380 : vector<2x128xf32>
      %382 = vector.extract_strided_slice %372 {offsets = [0, 128], sizes = [2, 128], strides = [1, 1]} : vector<2x384xf32> to vector<2x128xf32>
      %383 = vector.extract_strided_slice %373 {offsets = [0, 128], sizes = [2, 128], strides = [1, 1]} : vector<2x384xf32> to vector<2x128xf32>
      %384 = arith.addf %382, %383 : vector<2x128xf32>
      %385 = arith.negf %384 : vector<2x128xf32>
      %386 = math.exp %385 : vector<2x128xf32>
      %cst_124 = arith.constant 1.000000e+00 : f32
      %387 = vector.broadcast %cst_124 : f32 to vector<2x128xf32>
      %388 = arith.addf %387, %386 : vector<2x128xf32>
      %389 = arith.divf %387, %388 : vector<2x128xf32>
      %390 = vector.extract_strided_slice %372 {offsets = [0, 256], sizes = [2, 128], strides = [1, 1]} : vector<2x384xf32> to vector<2x128xf32>
      %391 = vector.extract_strided_slice %373 {offsets = [0, 256], sizes = [2, 128], strides = [1, 1]} : vector<2x384xf32> to vector<2x128xf32>
      %392 = arith.addf %391, %11 : vector<2x128xf32>
      %393 = arith.mulf %381, %392 : vector<2x128xf32>
      %394 = arith.addf %390, %393 : vector<2x128xf32>
      %395 = math.tanh %394 : vector<2x128xf32>
      %396 = arith.subf %326, %395 : vector<2x128xf32>
      %397 = arith.mulf %389, %396 : vector<2x128xf32>
      %398 = arith.addf %395, %397 : vector<2x128xf32>
      %c2_125 = arith.constant 2 : index
      %c128_126 = arith.constant 128 : index
      %399 = vector.load %arg7[%c2_125, %c128_126] : memref<4x256xf32, #tpu.memory_space<vmem>>, vector<2x128xf32>
      tpu.vector_store %arg7[%c2_125, %c128_126], %398 {strides = array<i32>} : memref<4x256xf32, #tpu.memory_space<vmem>>, vector<2x128xf32>,
      %c5_i32 = arith.constant 5 : i32
      %400 = arith.addi %14, %c5_i32 : i32
      %c87_i32_127 = arith.constant 87 : i32
      %401 = arith.subi %c87_i32_127, %400 : i32
      %c0_128 = arith.constant 0 : index
      %c0_129 = arith.constant 0 : index
      %402 = vector.load %arg7[%c0_128, %c0_129] : memref<4x256xf32, #tpu.memory_space<vmem>>, vector<2x128xf32>
      %c2_130 = arith.constant 2 : index
      %c128_131 = arith.constant 128 : index
      %403 = vector.load %arg7[%c2_130, %c128_131] : memref<4x256xf32, #tpu.memory_space<vmem>>, vector<2x128xf32>
      %404 = arith.truncf %402 : vector<2x128xf32> to vector<2x128xbf16>
      %405 = arith.index_cast %400 : i32 to index
      %c0_132 = arith.constant 0 : index
      %c0_133 = arith.constant 0 : index
      %406 = vector.load %arg5[%405, %c0_132, %c0_133] : memref<88x2x128xbf16, #tpu.memory_space<vmem>>, vector<1x2x128xbf16>
      %407 = vector.shape_cast %406 : vector<1x2x128xbf16> to vector<2x128xbf16>
      %408 = vector.shape_cast %404 : vector<2x128xbf16> to vector<1x2x128xbf16>
      tpu.vector_store %arg5[%405, %c0_132, %c0_133], %408 {strides = array<i32>} : memref<88x2x128xbf16, #tpu.memory_space<vmem>>, vector<1x2x128xbf16>,
      %409 = arith.truncf %403 : vector<2x128xf32> to vector<2x128xbf16>
      %410 = arith.index_cast %401 : i32 to index
      %c0_134 = arith.constant 0 : index
      %c0_135 = arith.constant 0 : index
      %411 = vector.load %arg6[%410, %c0_134, %c0_135] : memref<88x2x128xbf16, #tpu.memory_space<vmem>>, vector<1x2x128xbf16>
      %412 = vector.shape_cast %411 : vector<1x2x128xbf16> to vector<2x128xbf16>
      %413 = vector.shape_cast %409 : vector<2x128xbf16> to vector<1x2x128xbf16>
      tpu.vector_store %arg6[%410, %c0_134, %c0_135], %413 {strides = array<i32>} : memref<88x2x128xbf16, #tpu.memory_space<vmem>>, vector<1x2x128xbf16>,
      %c0_136 = arith.constant 0 : index
      %c0_137 = arith.constant 0 : index
      %414 = vector.load %arg7[%c0_136, %c0_137] : memref<4x256xf32, #tpu.memory_space<vmem>>, vector<4x256xf32>
      %415 = arith.truncf %414 : vector<4x256xf32> to vector<4x256xbf16>
      %cst_138 = arith.constant dense<0.000000e+00> : vector<4x384xf32>
      %416 = tpu.matmul %415, %3, %cst_138 {dimension_numbers = #tpu.dot_dimension_numbers<[1], [0], [0], [1], [0, 0, 1, 1], [], []>} : vector<4x256xbf16>, vector<256x384xbf16>, vector<4x384xf32> -> vector<4x384xf32>
      %417 = arith.index_cast %400 : i32 to index
      %c0_139 = arith.constant 0 : index
      %c0_140 = arith.constant 0 : index
      %418 = vector.load %arg1[%417, %c0_139, %c0_140] : memref<88x2x384xf32, #tpu.memory_space<vmem>>, vector<1x2x384xf32>
      %419 = vector.shape_cast %418 : vector<1x2x384xf32> to vector<2x384xf32>
      %420 = vector.extract_strided_slice %416 {offsets = [0, 0], sizes = [2, 384], strides = [1, 1]} : vector<4x384xf32> to vector<2x384xf32>
      %421 = vector.extract_strided_slice %419 {offsets = [0, 0], sizes = [2, 128], strides = [1, 1]} : vector<2x384xf32> to vector<2x128xf32>
      %422 = vector.extract_strided_slice %420 {offsets = [0, 0], sizes = [2, 128], strides = [1, 1]} : vector<2x384xf32> to vector<2x128xf32>
      %423 = arith.addf %421, %422 : vector<2x128xf32>
      %424 = arith.negf %423 : vector<2x128xf32>
      %425 = math.exp %424 : vector<2x128xf32>
      %cst_141 = arith.constant 1.000000e+00 : f32
      %426 = vector.broadcast %cst_141 : f32 to vector<2x128xf32>
      %427 = arith.addf %426, %425 : vector<2x128xf32>
      %428 = arith.divf %426, %427 : vector<2x128xf32>
      %429 = vector.extract_strided_slice %419 {offsets = [0, 128], sizes = [2, 128], strides = [1, 1]} : vector<2x384xf32> to vector<2x128xf32>
      %430 = vector.extract_strided_slice %420 {offsets = [0, 128], sizes = [2, 128], strides = [1, 1]} : vector<2x384xf32> to vector<2x128xf32>
      %431 = arith.addf %429, %430 : vector<2x128xf32>
      %432 = arith.negf %431 : vector<2x128xf32>
      %433 = math.exp %432 : vector<2x128xf32>
      %cst_142 = arith.constant 1.000000e+00 : f32
      %434 = vector.broadcast %cst_142 : f32 to vector<2x128xf32>
      %435 = arith.addf %434, %433 : vector<2x128xf32>
      %436 = arith.divf %434, %435 : vector<2x128xf32>
      %437 = vector.extract_strided_slice %419 {offsets = [0, 256], sizes = [2, 128], strides = [1, 1]} : vector<2x384xf32> to vector<2x128xf32>
      %438 = vector.extract_strided_slice %420 {offsets = [0, 256], sizes = [2, 128], strides = [1, 1]} : vector<2x384xf32> to vector<2x128xf32>
      %439 = arith.addf %438, %7 : vector<2x128xf32>
      %440 = arith.mulf %428, %439 : vector<2x128xf32>
      %441 = arith.addf %437, %440 : vector<2x128xf32>
      %442 = math.tanh %441 : vector<2x128xf32>
      %443 = arith.subf %402, %442 : vector<2x128xf32>
      %444 = arith.mulf %436, %443 : vector<2x128xf32>
      %445 = arith.addf %442, %444 : vector<2x128xf32>
      %c0_143 = arith.constant 0 : index
      %c0_144 = arith.constant 0 : index
      %446 = vector.load %arg7[%c0_143, %c0_144] : memref<4x256xf32, #tpu.memory_space<vmem>>, vector<2x128xf32>
      tpu.vector_store %arg7[%c0_143, %c0_144], %445 {strides = array<i32>} : memref<4x256xf32, #tpu.memory_space<vmem>>, vector<2x128xf32>,
      %447 = arith.index_cast %401 : i32 to index
      %c0_145 = arith.constant 0 : index
      %c0_146 = arith.constant 0 : index
      %448 = vector.load %arg2[%447, %c0_145, %c0_146] : memref<88x2x384xf32, #tpu.memory_space<vmem>>, vector<1x2x384xf32>
      %449 = vector.shape_cast %448 : vector<1x2x384xf32> to vector<2x384xf32>
      %450 = vector.extract_strided_slice %416 {offsets = [2, 0], sizes = [2, 384], strides = [1, 1]} : vector<4x384xf32> to vector<2x384xf32>
      %451 = vector.extract_strided_slice %449 {offsets = [0, 0], sizes = [2, 128], strides = [1, 1]} : vector<2x384xf32> to vector<2x128xf32>
      %452 = vector.extract_strided_slice %450 {offsets = [0, 0], sizes = [2, 128], strides = [1, 1]} : vector<2x384xf32> to vector<2x128xf32>
      %453 = arith.addf %451, %452 : vector<2x128xf32>
      %454 = arith.negf %453 : vector<2x128xf32>
      %455 = math.exp %454 : vector<2x128xf32>
      %cst_147 = arith.constant 1.000000e+00 : f32
      %456 = vector.broadcast %cst_147 : f32 to vector<2x128xf32>
      %457 = arith.addf %456, %455 : vector<2x128xf32>
      %458 = arith.divf %456, %457 : vector<2x128xf32>
      %459 = vector.extract_strided_slice %449 {offsets = [0, 128], sizes = [2, 128], strides = [1, 1]} : vector<2x384xf32> to vector<2x128xf32>
      %460 = vector.extract_strided_slice %450 {offsets = [0, 128], sizes = [2, 128], strides = [1, 1]} : vector<2x384xf32> to vector<2x128xf32>
      %461 = arith.addf %459, %460 : vector<2x128xf32>
      %462 = arith.negf %461 : vector<2x128xf32>
      %463 = math.exp %462 : vector<2x128xf32>
      %cst_148 = arith.constant 1.000000e+00 : f32
      %464 = vector.broadcast %cst_148 : f32 to vector<2x128xf32>
      %465 = arith.addf %464, %463 : vector<2x128xf32>
      %466 = arith.divf %464, %465 : vector<2x128xf32>
      %467 = vector.extract_strided_slice %449 {offsets = [0, 256], sizes = [2, 128], strides = [1, 1]} : vector<2x384xf32> to vector<2x128xf32>
      %468 = vector.extract_strided_slice %450 {offsets = [0, 256], sizes = [2, 128], strides = [1, 1]} : vector<2x384xf32> to vector<2x128xf32>
      %469 = arith.addf %468, %11 : vector<2x128xf32>
      %470 = arith.mulf %458, %469 : vector<2x128xf32>
      %471 = arith.addf %467, %470 : vector<2x128xf32>
      %472 = math.tanh %471 : vector<2x128xf32>
      %473 = arith.subf %403, %472 : vector<2x128xf32>
      %474 = arith.mulf %466, %473 : vector<2x128xf32>
      %475 = arith.addf %472, %474 : vector<2x128xf32>
      %c2_149 = arith.constant 2 : index
      %c128_150 = arith.constant 128 : index
      %476 = vector.load %arg7[%c2_149, %c128_150] : memref<4x256xf32, #tpu.memory_space<vmem>>, vector<2x128xf32>
      tpu.vector_store %arg7[%c2_149, %c128_150], %475 {strides = array<i32>} : memref<4x256xf32, #tpu.memory_space<vmem>>, vector<2x128xf32>,
      %c6_i32 = arith.constant 6 : i32
      %477 = arith.addi %14, %c6_i32 : i32
      %c87_i32_151 = arith.constant 87 : i32
      %478 = arith.subi %c87_i32_151, %477 : i32
      %c0_152 = arith.constant 0 : index
      %c0_153 = arith.constant 0 : index
      %479 = vector.load %arg7[%c0_152, %c0_153] : memref<4x256xf32, #tpu.memory_space<vmem>>, vector<2x128xf32>
      %c2_154 = arith.constant 2 : index
      %c128_155 = arith.constant 128 : index
      %480 = vector.load %arg7[%c2_154, %c128_155] : memref<4x256xf32, #tpu.memory_space<vmem>>, vector<2x128xf32>
      %481 = arith.truncf %479 : vector<2x128xf32> to vector<2x128xbf16>
      %482 = arith.index_cast %477 : i32 to index
      %c0_156 = arith.constant 0 : index
      %c0_157 = arith.constant 0 : index
      %483 = vector.load %arg5[%482, %c0_156, %c0_157] : memref<88x2x128xbf16, #tpu.memory_space<vmem>>, vector<1x2x128xbf16>
      %484 = vector.shape_cast %483 : vector<1x2x128xbf16> to vector<2x128xbf16>
      %485 = vector.shape_cast %481 : vector<2x128xbf16> to vector<1x2x128xbf16>
      tpu.vector_store %arg5[%482, %c0_156, %c0_157], %485 {strides = array<i32>} : memref<88x2x128xbf16, #tpu.memory_space<vmem>>, vector<1x2x128xbf16>,
      %486 = arith.truncf %480 : vector<2x128xf32> to vector<2x128xbf16>
      %487 = arith.index_cast %478 : i32 to index
      %c0_158 = arith.constant 0 : index
      %c0_159 = arith.constant 0 : index
      %488 = vector.load %arg6[%487, %c0_158, %c0_159] : memref<88x2x128xbf16, #tpu.memory_space<vmem>>, vector<1x2x128xbf16>
      %489 = vector.shape_cast %488 : vector<1x2x128xbf16> to vector<2x128xbf16>
      %490 = vector.shape_cast %486 : vector<2x128xbf16> to vector<1x2x128xbf16>
      tpu.vector_store %arg6[%487, %c0_158, %c0_159], %490 {strides = array<i32>} : memref<88x2x128xbf16, #tpu.memory_space<vmem>>, vector<1x2x128xbf16>,
      %c0_160 = arith.constant 0 : index
      %c0_161 = arith.constant 0 : index
      %491 = vector.load %arg7[%c0_160, %c0_161] : memref<4x256xf32, #tpu.memory_space<vmem>>, vector<4x256xf32>
      %492 = arith.truncf %491 : vector<4x256xf32> to vector<4x256xbf16>
      %cst_162 = arith.constant dense<0.000000e+00> : vector<4x384xf32>
      %493 = tpu.matmul %492, %3, %cst_162 {dimension_numbers = #tpu.dot_dimension_numbers<[1], [0], [0], [1], [0, 0, 1, 1], [], []>} : vector<4x256xbf16>, vector<256x384xbf16>, vector<4x384xf32> -> vector<4x384xf32>
      %494 = arith.index_cast %477 : i32 to index
      %c0_163 = arith.constant 0 : index
      %c0_164 = arith.constant 0 : index
      %495 = vector.load %arg1[%494, %c0_163, %c0_164] : memref<88x2x384xf32, #tpu.memory_space<vmem>>, vector<1x2x384xf32>
      %496 = vector.shape_cast %495 : vector<1x2x384xf32> to vector<2x384xf32>
      %497 = vector.extract_strided_slice %493 {offsets = [0, 0], sizes = [2, 384], strides = [1, 1]} : vector<4x384xf32> to vector<2x384xf32>
      %498 = vector.extract_strided_slice %496 {offsets = [0, 0], sizes = [2, 128], strides = [1, 1]} : vector<2x384xf32> to vector<2x128xf32>
      %499 = vector.extract_strided_slice %497 {offsets = [0, 0], sizes = [2, 128], strides = [1, 1]} : vector<2x384xf32> to vector<2x128xf32>
      %500 = arith.addf %498, %499 : vector<2x128xf32>
      %501 = arith.negf %500 : vector<2x128xf32>
      %502 = math.exp %501 : vector<2x128xf32>
      %cst_165 = arith.constant 1.000000e+00 : f32
      %503 = vector.broadcast %cst_165 : f32 to vector<2x128xf32>
      %504 = arith.addf %503, %502 : vector<2x128xf32>
      %505 = arith.divf %503, %504 : vector<2x128xf32>
      %506 = vector.extract_strided_slice %496 {offsets = [0, 128], sizes = [2, 128], strides = [1, 1]} : vector<2x384xf32> to vector<2x128xf32>
      %507 = vector.extract_strided_slice %497 {offsets = [0, 128], sizes = [2, 128], strides = [1, 1]} : vector<2x384xf32> to vector<2x128xf32>
      %508 = arith.addf %506, %507 : vector<2x128xf32>
      %509 = arith.negf %508 : vector<2x128xf32>
      %510 = math.exp %509 : vector<2x128xf32>
      %cst_166 = arith.constant 1.000000e+00 : f32
      %511 = vector.broadcast %cst_166 : f32 to vector<2x128xf32>
      %512 = arith.addf %511, %510 : vector<2x128xf32>
      %513 = arith.divf %511, %512 : vector<2x128xf32>
      %514 = vector.extract_strided_slice %496 {offsets = [0, 256], sizes = [2, 128], strides = [1, 1]} : vector<2x384xf32> to vector<2x128xf32>
      %515 = vector.extract_strided_slice %497 {offsets = [0, 256], sizes = [2, 128], strides = [1, 1]} : vector<2x384xf32> to vector<2x128xf32>
      %516 = arith.addf %515, %7 : vector<2x128xf32>
      %517 = arith.mulf %505, %516 : vector<2x128xf32>
      %518 = arith.addf %514, %517 : vector<2x128xf32>
      %519 = math.tanh %518 : vector<2x128xf32>
      %520 = arith.subf %479, %519 : vector<2x128xf32>
      %521 = arith.mulf %513, %520 : vector<2x128xf32>
      %522 = arith.addf %519, %521 : vector<2x128xf32>
      %c0_167 = arith.constant 0 : index
      %c0_168 = arith.constant 0 : index
      %523 = vector.load %arg7[%c0_167, %c0_168] : memref<4x256xf32, #tpu.memory_space<vmem>>, vector<2x128xf32>
      tpu.vector_store %arg7[%c0_167, %c0_168], %522 {strides = array<i32>} : memref<4x256xf32, #tpu.memory_space<vmem>>, vector<2x128xf32>,
      %524 = arith.index_cast %478 : i32 to index
      %c0_169 = arith.constant 0 : index
      %c0_170 = arith.constant 0 : index
      %525 = vector.load %arg2[%524, %c0_169, %c0_170] : memref<88x2x384xf32, #tpu.memory_space<vmem>>, vector<1x2x384xf32>
      %526 = vector.shape_cast %525 : vector<1x2x384xf32> to vector<2x384xf32>
      %527 = vector.extract_strided_slice %493 {offsets = [2, 0], sizes = [2, 384], strides = [1, 1]} : vector<4x384xf32> to vector<2x384xf32>
      %528 = vector.extract_strided_slice %526 {offsets = [0, 0], sizes = [2, 128], strides = [1, 1]} : vector<2x384xf32> to vector<2x128xf32>
      %529 = vector.extract_strided_slice %527 {offsets = [0, 0], sizes = [2, 128], strides = [1, 1]} : vector<2x384xf32> to vector<2x128xf32>
      %530 = arith.addf %528, %529 : vector<2x128xf32>
      %531 = arith.negf %530 : vector<2x128xf32>
      %532 = math.exp %531 : vector<2x128xf32>
      %cst_171 = arith.constant 1.000000e+00 : f32
      %533 = vector.broadcast %cst_171 : f32 to vector<2x128xf32>
      %534 = arith.addf %533, %532 : vector<2x128xf32>
      %535 = arith.divf %533, %534 : vector<2x128xf32>
      %536 = vector.extract_strided_slice %526 {offsets = [0, 128], sizes = [2, 128], strides = [1, 1]} : vector<2x384xf32> to vector<2x128xf32>
      %537 = vector.extract_strided_slice %527 {offsets = [0, 128], sizes = [2, 128], strides = [1, 1]} : vector<2x384xf32> to vector<2x128xf32>
      %538 = arith.addf %536, %537 : vector<2x128xf32>
      %539 = arith.negf %538 : vector<2x128xf32>
      %540 = math.exp %539 : vector<2x128xf32>
      %cst_172 = arith.constant 1.000000e+00 : f32
      %541 = vector.broadcast %cst_172 : f32 to vector<2x128xf32>
      %542 = arith.addf %541, %540 : vector<2x128xf32>
      %543 = arith.divf %541, %542 : vector<2x128xf32>
      %544 = vector.extract_strided_slice %526 {offsets = [0, 256], sizes = [2, 128], strides = [1, 1]} : vector<2x384xf32> to vector<2x128xf32>
      %545 = vector.extract_strided_slice %527 {offsets = [0, 256], sizes = [2, 128], strides = [1, 1]} : vector<2x384xf32> to vector<2x128xf32>
      %546 = arith.addf %545, %11 : vector<2x128xf32>
      %547 = arith.mulf %535, %546 : vector<2x128xf32>
      %548 = arith.addf %544, %547 : vector<2x128xf32>
      %549 = math.tanh %548 : vector<2x128xf32>
      %550 = arith.subf %480, %549 : vector<2x128xf32>
      %551 = arith.mulf %543, %550 : vector<2x128xf32>
      %552 = arith.addf %549, %551 : vector<2x128xf32>
      %c2_173 = arith.constant 2 : index
      %c128_174 = arith.constant 128 : index
      %553 = vector.load %arg7[%c2_173, %c128_174] : memref<4x256xf32, #tpu.memory_space<vmem>>, vector<2x128xf32>
      tpu.vector_store %arg7[%c2_173, %c128_174], %552 {strides = array<i32>} : memref<4x256xf32, #tpu.memory_space<vmem>>, vector<2x128xf32>,
      %c7_i32 = arith.constant 7 : i32
      %554 = arith.addi %14, %c7_i32 : i32
      %c87_i32_175 = arith.constant 87 : i32
      %555 = arith.subi %c87_i32_175, %554 : i32
      %c0_176 = arith.constant 0 : index
      %c0_177 = arith.constant 0 : index
      %556 = vector.load %arg7[%c0_176, %c0_177] : memref<4x256xf32, #tpu.memory_space<vmem>>, vector<2x128xf32>
      %c2_178 = arith.constant 2 : index
      %c128_179 = arith.constant 128 : index
      %557 = vector.load %arg7[%c2_178, %c128_179] : memref<4x256xf32, #tpu.memory_space<vmem>>, vector<2x128xf32>
      %558 = arith.truncf %556 : vector<2x128xf32> to vector<2x128xbf16>
      %559 = arith.index_cast %554 : i32 to index
      %c0_180 = arith.constant 0 : index
      %c0_181 = arith.constant 0 : index
      %560 = vector.load %arg5[%559, %c0_180, %c0_181] : memref<88x2x128xbf16, #tpu.memory_space<vmem>>, vector<1x2x128xbf16>
      %561 = vector.shape_cast %560 : vector<1x2x128xbf16> to vector<2x128xbf16>
      %562 = vector.shape_cast %558 : vector<2x128xbf16> to vector<1x2x128xbf16>
      tpu.vector_store %arg5[%559, %c0_180, %c0_181], %562 {strides = array<i32>} : memref<88x2x128xbf16, #tpu.memory_space<vmem>>, vector<1x2x128xbf16>,
      %563 = arith.truncf %557 : vector<2x128xf32> to vector<2x128xbf16>
      %564 = arith.index_cast %555 : i32 to index
      %c0_182 = arith.constant 0 : index
      %c0_183 = arith.constant 0 : index
      %565 = vector.load %arg6[%564, %c0_182, %c0_183] : memref<88x2x128xbf16, #tpu.memory_space<vmem>>, vector<1x2x128xbf16>
      %566 = vector.shape_cast %565 : vector<1x2x128xbf16> to vector<2x128xbf16>
      %567 = vector.shape_cast %563 : vector<2x128xbf16> to vector<1x2x128xbf16>
      tpu.vector_store %arg6[%564, %c0_182, %c0_183], %567 {strides = array<i32>} : memref<88x2x128xbf16, #tpu.memory_space<vmem>>, vector<1x2x128xbf16>,
      %c0_184 = arith.constant 0 : index
      %c0_185 = arith.constant 0 : index
      %568 = vector.load %arg7[%c0_184, %c0_185] : memref<4x256xf32, #tpu.memory_space<vmem>>, vector<4x256xf32>
      %569 = arith.truncf %568 : vector<4x256xf32> to vector<4x256xbf16>
      %cst_186 = arith.constant dense<0.000000e+00> : vector<4x384xf32>
      %570 = tpu.matmul %569, %3, %cst_186 {dimension_numbers = #tpu.dot_dimension_numbers<[1], [0], [0], [1], [0, 0, 1, 1], [], []>} : vector<4x256xbf16>, vector<256x384xbf16>, vector<4x384xf32> -> vector<4x384xf32>
      %571 = arith.index_cast %554 : i32 to index
      %c0_187 = arith.constant 0 : index
      %c0_188 = arith.constant 0 : index
      %572 = vector.load %arg1[%571, %c0_187, %c0_188] : memref<88x2x384xf32, #tpu.memory_space<vmem>>, vector<1x2x384xf32>
      %573 = vector.shape_cast %572 : vector<1x2x384xf32> to vector<2x384xf32>
      %574 = vector.extract_strided_slice %570 {offsets = [0, 0], sizes = [2, 384], strides = [1, 1]} : vector<4x384xf32> to vector<2x384xf32>
      %575 = vector.extract_strided_slice %573 {offsets = [0, 0], sizes = [2, 128], strides = [1, 1]} : vector<2x384xf32> to vector<2x128xf32>
      %576 = vector.extract_strided_slice %574 {offsets = [0, 0], sizes = [2, 128], strides = [1, 1]} : vector<2x384xf32> to vector<2x128xf32>
      %577 = arith.addf %575, %576 : vector<2x128xf32>
      %578 = arith.negf %577 : vector<2x128xf32>
      %579 = math.exp %578 : vector<2x128xf32>
      %cst_189 = arith.constant 1.000000e+00 : f32
      %580 = vector.broadcast %cst_189 : f32 to vector<2x128xf32>
      %581 = arith.addf %580, %579 : vector<2x128xf32>
      %582 = arith.divf %580, %581 : vector<2x128xf32>
      %583 = vector.extract_strided_slice %573 {offsets = [0, 128], sizes = [2, 128], strides = [1, 1]} : vector<2x384xf32> to vector<2x128xf32>
      %584 = vector.extract_strided_slice %574 {offsets = [0, 128], sizes = [2, 128], strides = [1, 1]} : vector<2x384xf32> to vector<2x128xf32>
      %585 = arith.addf %583, %584 : vector<2x128xf32>
      %586 = arith.negf %585 : vector<2x128xf32>
      %587 = math.exp %586 : vector<2x128xf32>
      %cst_190 = arith.constant 1.000000e+00 : f32
      %588 = vector.broadcast %cst_190 : f32 to vector<2x128xf32>
      %589 = arith.addf %588, %587 : vector<2x128xf32>
      %590 = arith.divf %588, %589 : vector<2x128xf32>
      %591 = vector.extract_strided_slice %573 {offsets = [0, 256], sizes = [2, 128], strides = [1, 1]} : vector<2x384xf32> to vector<2x128xf32>
      %592 = vector.extract_strided_slice %574 {offsets = [0, 256], sizes = [2, 128], strides = [1, 1]} : vector<2x384xf32> to vector<2x128xf32>
      %593 = arith.addf %592, %7 : vector<2x128xf32>
      %594 = arith.mulf %582, %593 : vector<2x128xf32>
      %595 = arith.addf %591, %594 : vector<2x128xf32>
      %596 = math.tanh %595 : vector<2x128xf32>
      %597 = arith.subf %556, %596 : vector<2x128xf32>
      %598 = arith.mulf %590, %597 : vector<2x128xf32>
      %599 = arith.addf %596, %598 : vector<2x128xf32>
      %c0_191 = arith.constant 0 : index
      %c0_192 = arith.constant 0 : index
      %600 = vector.load %arg7[%c0_191, %c0_192] : memref<4x256xf32, #tpu.memory_space<vmem>>, vector<2x128xf32>
      tpu.vector_store %arg7[%c0_191, %c0_192], %599 {strides = array<i32>} : memref<4x256xf32, #tpu.memory_space<vmem>>, vector<2x128xf32>,
      %601 = arith.index_cast %555 : i32 to index
      %c0_193 = arith.constant 0 : index
      %c0_194 = arith.constant 0 : index
      %602 = vector.load %arg2[%601, %c0_193, %c0_194] : memref<88x2x384xf32, #tpu.memory_space<vmem>>, vector<1x2x384xf32>
      %603 = vector.shape_cast %602 : vector<1x2x384xf32> to vector<2x384xf32>
      %604 = vector.extract_strided_slice %570 {offsets = [2, 0], sizes = [2, 384], strides = [1, 1]} : vector<4x384xf32> to vector<2x384xf32>
      %605 = vector.extract_strided_slice %603 {offsets = [0, 0], sizes = [2, 128], strides = [1, 1]} : vector<2x384xf32> to vector<2x128xf32>
      %606 = vector.extract_strided_slice %604 {offsets = [0, 0], sizes = [2, 128], strides = [1, 1]} : vector<2x384xf32> to vector<2x128xf32>
      %607 = arith.addf %605, %606 : vector<2x128xf32>
      %608 = arith.negf %607 : vector<2x128xf32>
      %609 = math.exp %608 : vector<2x128xf32>
      %cst_195 = arith.constant 1.000000e+00 : f32
      %610 = vector.broadcast %cst_195 : f32 to vector<2x128xf32>
      %611 = arith.addf %610, %609 : vector<2x128xf32>
      %612 = arith.divf %610, %611 : vector<2x128xf32>
      %613 = vector.extract_strided_slice %603 {offsets = [0, 128], sizes = [2, 128], strides = [1, 1]} : vector<2x384xf32> to vector<2x128xf32>
      %614 = vector.extract_strided_slice %604 {offsets = [0, 128], sizes = [2, 128], strides = [1, 1]} : vector<2x384xf32> to vector<2x128xf32>
      %615 = arith.addf %613, %614 : vector<2x128xf32>
      %616 = arith.negf %615 : vector<2x128xf32>
      %617 = math.exp %616 : vector<2x128xf32>
      %cst_196 = arith.constant 1.000000e+00 : f32
      %618 = vector.broadcast %cst_196 : f32 to vector<2x128xf32>
      %619 = arith.addf %618, %617 : vector<2x128xf32>
      %620 = arith.divf %618, %619 : vector<2x128xf32>
      %621 = vector.extract_strided_slice %603 {offsets = [0, 256], sizes = [2, 128], strides = [1, 1]} : vector<2x384xf32> to vector<2x128xf32>
      %622 = vector.extract_strided_slice %604 {offsets = [0, 256], sizes = [2, 128], strides = [1, 1]} : vector<2x384xf32> to vector<2x128xf32>
      %623 = arith.addf %622, %11 : vector<2x128xf32>
      %624 = arith.mulf %612, %623 : vector<2x128xf32>
      %625 = arith.addf %621, %624 : vector<2x128xf32>
      %626 = math.tanh %625 : vector<2x128xf32>
      %627 = arith.subf %557, %626 : vector<2x128xf32>
      %628 = arith.mulf %620, %627 : vector<2x128xf32>
      %629 = arith.addf %626, %628 : vector<2x128xf32>
      %c2_197 = arith.constant 2 : index
      %c128_198 = arith.constant 128 : index
      %630 = vector.load %arg7[%c2_197, %c128_198] : memref<4x256xf32, #tpu.memory_space<vmem>>, vector<2x128xf32>
      tpu.vector_store %arg7[%c2_197, %c128_198], %629 {strides = array<i32>} : memref<4x256xf32, #tpu.memory_space<vmem>>, vector<2x128xf32>,
    }
    %c11_i32_8 = arith.constant 11 : i32
    return
  }
  func.func @transform_0(%arg0: i32) -> (i32, i32, i32) {
    %c0_i32 = arith.constant 0 : i32
    %c0_i32_0 = arith.constant 0 : i32
    %c0_i32_1 = arith.constant 0 : i32
    return %arg0, %c0_i32, %c0_i32_0 : i32, i32, i32
  }
  func.func @transform_1(%arg0: i32) -> (i32, i32, i32) {
    %c1_i32 = arith.constant 1 : i32
    %0 = arith.subi %c1_i32, %arg0 : i32
    %c0_i32 = arith.constant 0 : i32
    %c0_i32_0 = arith.constant 0 : i32
    %c0_i32_1 = arith.constant 0 : i32
    return %0, %c0_i32, %c0_i32_0 : i32, i32, i32
  }
  func.func @transform_2(%arg0: i32) -> (i32, i32) {
    %c0_i32 = arith.constant 0 : i32
    %c0_i32_0 = arith.constant 0 : i32
    %c0_i32_1 = arith.constant 0 : i32
    return %c0_i32, %c0_i32_0 : i32, i32
  }
  func.func @transform_3(%arg0: i32) -> (i32, i32, i32) {
    %c0_i32 = arith.constant 0 : i32
    %c0_i32_0 = arith.constant 0 : i32
    %c0_i32_1 = arith.constant 0 : i32
    %c0_i32_2 = arith.constant 0 : i32
    return %c0_i32, %c0_i32_0, %c0_i32_1 : i32, i32, i32
  }
  func.func @transform_4(%arg0: i32) -> (i32, i32, i32) {
    %c0_i32 = arith.constant 0 : i32
    %c0_i32_0 = arith.constant 0 : i32
    %c0_i32_1 = arith.constant 0 : i32
    return %arg0, %c0_i32, %c0_i32_0 : i32, i32, i32
  }
  func.func @transform_5(%arg0: i32) -> (i32, i32, i32) {
    %c1_i32 = arith.constant 1 : i32
    %0 = arith.subi %c1_i32, %arg0 : i32
    %c0_i32 = arith.constant 0 : i32
    %c0_i32_0 = arith.constant 0 : i32
    %c0_i32_1 = arith.constant 0 : i32
    return %0, %c0_i32, %c0_i32_0 : i32, i32, i32
  }
}

module attributes {stable_mosaic.version = 11 : i64} {
  func.func @proj_full_kernel(%arg0: i32, %arg1: memref<2x336x128xbf16, #tpu.memory_space<vmem>>, %arg2: memref<2x128x256xbf16, #tpu.memory_space<vmem>>, %arg3: memref<336x256xf32, #tpu.memory_space<vmem>>) attributes {dimension_semantics = [#tpu.dimension_semantics<parallel>], iteration_bounds = array<i64: 1>, scalar_prefetch = 0 : i64, scratch_operands = 0 : i64, tpu.core_type = #tpu.core_type<tc>, window_params = [{transform_indices = @transform_0, window_bounds = array<i64: 2, 336, 128>}, {pipeline_mode = #tpu.pipeline_mode<synchronous>, transform_indices = @transform_1, window_bounds = array<i64: 2, 128, 256>}, {transform_indices = @transform_2, window_bounds = array<i64: 336, 256>}]} {
    %c0 = arith.constant 0 : index
    %c0_0 = arith.constant 0 : index
    %c0_1 = arith.constant 0 : index
    %0 = vector.load %arg1[%c0, %c0_0, %c0_1] : memref<2x336x128xbf16, #tpu.memory_space<vmem>>, vector<1x336x128xbf16>
    %1 = vector.shape_cast %0 : vector<1x336x128xbf16> to vector<336x128xbf16>
    %c0_2 = arith.constant 0 : index
    %c0_3 = arith.constant 0 : index
    %c0_4 = arith.constant 0 : index
    %2 = vector.load %arg2[%c0_2, %c0_3, %c0_4] : memref<2x128x256xbf16, #tpu.memory_space<vmem>>, vector<1x128x256xbf16>
    %3 = vector.shape_cast %2 : vector<1x128x256xbf16> to vector<128x256xbf16>
    %cst = arith.constant dense<0.000000e+00> : vector<336x256xf32>
    %4 = tpu.matmul %1, %3, %cst {dimension_numbers = #tpu.dot_dimension_numbers<[1], [0], [0], [1], [0, 0, 1, 1], [], []>} : vector<336x128xbf16>, vector<128x256xbf16>, vector<336x256xf32> -> vector<336x256xf32>
    %c1 = arith.constant 1 : index
    %c0_5 = arith.constant 0 : index
    %c0_6 = arith.constant 0 : index
    %5 = vector.load %arg1[%c1, %c0_5, %c0_6] : memref<2x336x128xbf16, #tpu.memory_space<vmem>>, vector<1x336x128xbf16>
    %6 = vector.shape_cast %5 : vector<1x336x128xbf16> to vector<336x128xbf16>
    %c1_7 = arith.constant 1 : index
    %c0_8 = arith.constant 0 : index
    %c0_9 = arith.constant 0 : index
    %7 = vector.load %arg2[%c1_7, %c0_8, %c0_9] : memref<2x128x256xbf16, #tpu.memory_space<vmem>>, vector<1x128x256xbf16>
    %8 = vector.shape_cast %7 : vector<1x128x256xbf16> to vector<128x256xbf16>
    %cst_10 = arith.constant dense<0.000000e+00> : vector<336x256xf32>
    %9 = tpu.matmul %6, %8, %cst_10 {dimension_numbers = #tpu.dot_dimension_numbers<[1], [0], [0], [1], [0, 0, 1, 1], [], []>} : vector<336x128xbf16>, vector<128x256xbf16>, vector<336x256xf32> -> vector<336x256xf32>
    %10 = arith.addf %4, %9 : vector<336x256xf32>
    %cst_11 = arith.constant dense<0xFF800000> : vector<336xf32>
    %11 = vector.multi_reduction <maximumf>, %10, %cst_11 [1] : vector<336x256xf32> to vector<336xf32>
    %12 = vector.shape_cast %11 : vector<336xf32> to vector<336x1xf32>
    %13 = vector.broadcast %12 : vector<336x1xf32> to vector<336x256xf32>
    %14 = arith.subf %10, %13 : vector<336x256xf32>
    %15 = math.exp %14 : vector<336x256xf32>
    %cst_12 = arith.constant dense<0.000000e+00> : vector<336xf32>
    %16 = vector.multi_reduction <add>, %15, %cst_12 [1] : vector<336x256xf32> to vector<336xf32>
    %17 = vector.shape_cast %16 : vector<336xf32> to vector<336x1xf32>
    %18 = math.log %17 : vector<336x1xf32>
    %19 = arith.addf %12, %18 : vector<336x1xf32>
    %20 = vector.broadcast %19 : vector<336x1xf32> to vector<336x256xf32>
    %21 = arith.subf %10, %20 : vector<336x256xf32>
    %c0_13 = arith.constant 0 : index
    %c0_14 = arith.constant 0 : index
    %22 = vector.load %arg3[%c0_13, %c0_14] : memref<336x256xf32, #tpu.memory_space<vmem>>, vector<336x256xf32>
    tpu.vector_store %arg3[%c0_13, %c0_14], %21 {strides = array<i32>} : memref<336x256xf32, #tpu.memory_space<vmem>>, vector<336x256xf32>,
    return
  }
  func.func @transform_0(%arg0: i32) -> (i32, i32, i32) {
    %c0_i32 = arith.constant 0 : i32
    %c0_i32_0 = arith.constant 0 : i32
    %c0_i32_1 = arith.constant 0 : i32
    return %c0_i32, %arg0, %c0_i32_0 : i32, i32, i32
  }
  func.func @transform_1(%arg0: i32) -> (i32, i32, i32) {
    %c0_i32 = arith.constant 0 : i32
    %c0_i32_0 = arith.constant 0 : i32
    %c0_i32_1 = arith.constant 0 : i32
    %c0_i32_2 = arith.constant 0 : i32
    return %c0_i32, %c0_i32_0, %c0_i32_1 : i32, i32, i32
  }
  func.func @transform_2(%arg0: i32) -> (i32, i32) {
    %c0_i32 = arith.constant 0 : i32
    %c0_i32_0 = arith.constant 0 : i32
    return %arg0, %c0_i32 : i32, i32
  }
}

</mosaic_0001>

<bundles_post_ra>
// kernel: bigru_lm_forward.2
= control target key start
LH: loop header
LB: loop body
LE: loop exit
PB: predicated region body
PF: predicated region fallthrough
CT: control target
= control target key end

     0   :  { %s3266_s18 = smov 0   ;;  %s4454_s0 = inlined_call_operand.vmem [shape: f32[176,2,384], index: 0, kind: input, shape index: {}]   ;;  %s4455_s1 = inlined_call_operand.vmem [shape: f32[176,2,384], index: 1, kind: input, shape index: {}]   ;;  %s4456_s2 = inlined_call_operand.vmem [shape: bf16[256,384], index: 2, kind: input, shape index: {}]   ;;  %s4457_s3 = inlined_call_operand.vmem [shape: f32[2,1,128], index: 3, kind: input, shape index: {}]   ;;  %s4458_s4 = inlined_call_operand.vmem [shape: bf16[176,2,128], index: 4, kind: output, shape index: {0}]   ;;  %s4459_s5 = inlined_call_operand.vmem [shape: bf16[176,2,128], index: 5, kind: output, shape index: {1}]  }
   0x1 LB: > { %s2688_s19 = sadd.s32 4294967295, %s3227_s18   ;;  %p2692_p0 = scmp.ge.s32.totalorder %s3227_s18, 1  ;;  %s3227_s18 = sphi %s3266_s18, %s16_s18  }
   0x2   : > { %p210_p1 = scmp.lt.s32.totalorder %s3227_s18, 3 }
   0x4   : > { %p211_p2 = pnand %p2692_p0, %p210_p1 }
   0x5   : > { %s250_s20 = smul.u32 (!%p211_p2), 88, %s2688_s19  ;;  %s257_s21 = ssub.s32 (!%p211_p2), 1, %s2688_s19 }
   0x6   : > { %214 = sbr.rel (%p211_p2) target bundleno = 2428 (0x97c), region = 36  ;;  %p2695_p5 = scmp.ne.s32.totalorder (!%p211_p2), %s2688_s19, 0 }
   0x7   : > { %s258_s22 = smul.u32 (!%p211_p2), 88, %s257_s21  ;;  %p251_p3 = scmp.lt.s32.totalorder (!%p211_p2), %s250_s20, 175 }
   0x9   : > { %p259_p4 = scmp.lt.s32.totalorder (!%p211_p2), %s258_s22, 175 }
   0xd   : > { %s4738_s20 = smov (!%p251_p3, %s250_s20), 175  ;;  %s4740_s22 = smov (!%p259_p4, %s258_s22), 175 }
   0xe   : > { %s3028_s23 = smul.u32 6, %s4738_s20  ;;  %s269_s26 = scalar_lea.vmem %s4458_s4, %s4738_s20  ;;  %v3233_v0 = vmov (!%p2695_p5), 0.0  }
   0xf   : > { %s3029_s27 = smul.u32 6, %s4740_s22  ;;  %s3284_s30 = scalar_lea.vmem %s4459_s5, %s4740_s22  ;;  %283 = vst [vmem:[#allocation2] sm:$0xff] (!%p2695_p5), %v3233_v0 }
  0x10   : > { %s3289_s8 = scalar_lea.vmem %s4454_s0, %s3028_s23  ;;  %282 = sbr.rel (%p2695_p5) target bundleno = 23 (0x17), region = 40 }
  0x11   : > { %s3294_s11 = scalar_lea.vmem %s4455_s1, %s3029_s27 }
  0x17 PF: > { %v3299_v1 = vld [vmem:[%s4456_s2] sm:$0xff]  ;;  %v3304_v2 = vld [vmem:[%s4456_s2 + $0x8] sm:$0xf]  ;;  %v3309_v3 = vld [vmem:[%s4456_s2 + $0xc] sm:$0xff]  ;;  %s3626_s10 = smov 0  }
  0x18   : > { %4524 = vst [vmem:[#allocation3_spill] sm:$0xff] %v3299_v1  ;;  %4525 = vst [vmem:[#allocation4_spill] sm:$0xff] %v3304_v2  ;;  %v3314_v4 = vld [vmem:[%s4456_s2 + $0x14] sm:$0xf]  ;;  %v3319_v5 = vld [vmem:[%s4456_s2 + $0x18] sm:$0xff] }
  0x19   : > { %4526 = vst [vmem:[#allocation5_spill] sm:$0xff] %v3309_v3  ;;  %4527 = vst [vmem:[#allocation6_spill] sm:$0xff] %v3314_v4  ;;  %v3324_v6 = vld [vmem:[%s4456_s2 + $0x20] sm:$0xf]  ;;  %v3329_v7 = vld [vmem:[%s4456_s2 + $0x24] sm:$0xff] }
  0x1a   : > { %4528 = vst [vmem:[#allocation7_spill] sm:$0xff] %v3319_v5  ;;  %4529 = vst [vmem:[#allocation8_spill] sm:$0xff] %v3324_v6  ;;  %v3334_v8 = vld [vmem:[%s4456_s2 + $0x2c] sm:$0xf]  ;;  %v3339_v9 = vld [vmem:[%s4456_s2 + $0x30] sm:$0xff] }
  0x1b   : > { %4530 = vst [vmem:[#allocation9_spill] sm:$0xff] %v3329_v7  ;;  %4531 = vst [vmem:[#allocation10_spill] sm:$0xff] %v3334_v8  ;;  %v3344_v10 = vld [vmem:[%s4456_s2 + $0x38] sm:$0xf]  ;;  %v3349_v11 = vld [vmem:[%s4456_s2 + $0x3c] sm:$0xff] }
  0x1c   : > { %4532 = vst [vmem:[#allocation11_spill] sm:$0xff] %v3339_v9  ;;  %4533 = vst [vmem:[#allocation12_spill] sm:$0xff] %v3344_v10  ;;  %v3354_v12 = vld [vmem:[%s4456_s2 + $0x44] sm:$0xf]  ;;  %v3359_v13 = vld [vmem:[%s4456_s2 + $0x48] sm:$0xff] }
  0x1d   : > { %4534 = vst [vmem:[#allocation13_spill] sm:$0xff] %v3349_v11  ;;  %4535 = vst [vmem:[#allocation14_spill] sm:$0xff] %v3354_v12  ;;  %v3364_v14 = vld [vmem:[%s4456_s2 + $0x50] sm:$0xf]  ;;  %v3369_v15 = vld [vmem:[%s4456_s2 + $0x54] sm:$0xff] }
  0x1e   : > { %4536 = vst [vmem:[#allocation15_spill] sm:$0xff] %v3359_v13  ;;  %4537 = vst [vmem:[#allocation16_spill] sm:$0xff] %v3364_v14  ;;  %v3374_v16 = vld [vmem:[%s4456_s2 + $0x5c] sm:$0xf]  ;;  %v3379_v17 = vld [vmem:[%s4456_s2 + $0x60] sm:$0xff] }
  0x1f   : > { %4538 = vst [vmem:[#allocation17_spill] sm:$0xff] %v3369_v15  ;;  %4539 = vst [vmem:[#allocation18_spill] sm:$0xff] %v3374_v16  ;;  %v3384_v18 = vld [vmem:[%s4456_s2 + $0x68] sm:$0xf]  ;;  %v3389_v19 = vld [vmem:[%s4456_s2 + $0x6c] sm:$0xff] }
  0x20   : > { %4540 = vst [vmem:[#allocation19_spill] sm:$0xff] %v3379_v17  ;;  %4541 = vst [vmem:[#allocation20_spill] sm:$0xff] %v3384_v18  ;;  %v3394_v20 = vld [vmem:[%s4456_s2 + $0x74] sm:$0xf]  ;;  %v3399_v21 = vld [vmem:[%s4456_s2 + $0x78] sm:$0xff] }
  0x21   : > { %4542 = vst [vmem:[#allocation21_spill] sm:$0xff] %v3389_v19  ;;  %4543 = vst [vmem:[#allocation22_spill] sm:$0xff] %v3394_v20  ;;  %v3404_v22 = vld [vmem:[%s4456_s2 + $0x80] sm:$0xf]  ;;  %v3409_v23 = vld [vmem:[%s4456_s2 + $0x84] sm:$0xff] }
  0x22   : > { %4544 = vst [vmem:[#allocation23_spill] sm:$0xff] %v3399_v21  ;;  %4545 = vst [vmem:[#allocation24_spill] sm:$0xff] %v3404_v22  ;;  %v3414_v24 = vld [vmem:[%s4456_s2 + $0x8c] sm:$0xf]  ;;  %v3419_v25 = vld [vmem:[%s4456_s2 + $0x90] sm:$0xff] }
  0x23   : > { %4546 = vst [vmem:[#allocation25_spill] sm:$0xff] %v3409_v23  ;;  %4547 = vst [vmem:[#allocation26_spill] sm:$0xff] %v3414_v24  ;;  %v3424_v26 = vld [vmem:[%s4456_s2 + $0x98] sm:$0xf]  ;;  %v3429_v27 = vld [vmem:[%s4456_s2 + $0x9c] sm:$0xff] }
  0x24   : > { %4548 = vst [vmem:[#allocation27_spill] sm:$0xff] %v3419_v25  ;;  %4549 = vst [vmem:[#allocation28_spill] sm:$0xff] %v3424_v26  ;;  %v3434_v28 = vld [vmem:[%s4456_s2 + $0xa4] sm:$0xf]  ;;  %v3439_v29 = vld [vmem:[%s4456_s2 + $0xa8] sm:$0xff] }
  0x25   : > { %4550 = vst [vmem:[#allocation29_spill] sm:$0xff] %v3429_v27  ;;  %4551 = vst [vmem:[#allocation30_spill] sm:$0xff] %v3434_v28  ;;  %v3444_v30 = vld [vmem:[%s4456_s2 + $0xb0] sm:$0xf]  ;;  %v3449_v31 = vld [vmem:[%s4456_s2 + $0xb4] sm:$0xff] }
  0x26   : > { %4552 = vst [vmem:[#allocation31_spill] sm:$0xff] %v3439_v29  ;;  %4553 = vst [vmem:[#allocation32_spill] sm:$0xff] %v3444_v30  ;;  %v3454_v32 = vld [vmem:[%s4456_s2 + $0xbc] sm:$0xf]  ;;  %v3459_v33 = vld [vmem:[%s4456_s2 + $0xc0] sm:$0xff] }
  0x27   : > { %4554 = vst [vmem:[#allocation33_spill] sm:$0xff] %v3449_v31  ;;  %4555 = vst [vmem:[#allocation34_spill] sm:$0xff] %v3454_v32  ;;  %v3464_v34 = vld [vmem:[%s4456_s2 + $0xc8] sm:$0xf]  ;;  %v3469_v35 = vld [vmem:[%s4456_s2 + $0xcc] sm:$0xff] }
  0x28   : > { %4556 = vst [vmem:[#allocation35_spill] sm:$0xff] %v3459_v33  ;;  %4557 = vst [vmem:[#allocation36_spill] sm:$0xff] %v3464_v34  ;;  %v3474_v36 = vld [vmem:[%s4456_s2 + $0xd4] sm:$0xf]  ;;  %v3479_v37 = vld [vmem:[%s4456_s2 + $0xd8] sm:$0xff] }
  0x29   : > { %4558 = vst [vmem:[#allocation37_spill] sm:$0xff] %v3469_v35  ;;  %4559 = vst [vmem:[#allocation38_spill] sm:$0xff] %v3474_v36  ;;  %v3484_v38 = vld [vmem:[%s4456_s2 + $0xe0] sm:$0xf]  ;;  %v3489_v39 = vld [vmem:[%s4456_s2 + $0xe4] sm:$0xff] }
  0x2a   : > { %4560 = vst [vmem:[#allocation39_spill] sm:$0xff] %v3479_v37  ;;  %4561 = vst [vmem:[#allocation40_spill] sm:$0xff] %v3484_v38  ;;  %v3494_v40 = vld [vmem:[%s4456_s2 + $0xec] sm:$0xf]  ;;  %v3499_v41 = vld [vmem:[%s4456_s2 + $0xf0] sm:$0xff] }
  0x2b   : > { %4562 = vst [vmem:[#allocation41_spill] sm:$0xff] %v3489_v39  ;;  %4563 = vst [vmem:[#allocation42_spill] sm:$0xff] %v3494_v40  ;;  %v3504_v42 = vld [vmem:[%s4456_s2 + $0xf8] sm:$0xf]  ;;  %v3509_v43 = vld [vmem:[%s4456_s2 + $0xfc] sm:$0xff] }
  0x2c   : > { %4564 = vst [vmem:[#allocation43_spill] sm:$0xff] %v3499_v41  ;;  %4565 = vst [vmem:[#allocation44_spill] sm:$0xff] %v3504_v42  ;;  %v3514_v44 = vld [vmem:[%s4456_s2 + $0x104] sm:$0xf]  ;;  %v3519_v45 = vld [vmem:[%s4456_s2 + $0x108] sm:$0xff] }
  0x2d   : > { %4566 = vst [vmem:[#allocation45_spill] sm:$0xff] %v3509_v43  ;;  %4567 = vst [vmem:[#allocation46_spill] sm:$0xff] %v3514_v44  ;;  %v3524_v46 = vld [vmem:[%s4456_s2 + $0x110] sm:$0xf]  ;;  %v3529_v47 = vld [vmem:[%s4456_s2 + $0x114] sm:$0xff] }
  0x2e   : > { %4568 = vst [vmem:[#allocation47_spill] sm:$0xff] %v3519_v45  ;;  %4569 = vst [vmem:[#allocation48_spill] sm:$0xff] %v3524_v46  ;;  %v3534_v48 = vld [vmem:[%s4456_s2 + $0x11c] sm:$0xf]  ;;  %v3539_v49 = vld [vmem:[%s4456_s2 + $0x120] sm:$0xff] }
  0x2f   : > { %4570 = vst [vmem:[#allocation49_spill] sm:$0xff] %v3529_v47  ;;  %4571 = vst [vmem:[#allocation50_spill] sm:$0xff] %v3534_v48  ;;  %v3544_v50 = vld [vmem:[%s4456_s2 + $0x128] sm:$0xf]  ;;  %v3549_v51 = vld [vmem:[%s4456_s2 + $0x12c] sm:$0xff] }
  0x30   : > { %4572 = vst [vmem:[#allocation51_spill] sm:$0xff] %v3539_v49  ;;  %4573 = vst [vmem:[#allocation52_spill] sm:$0xff] %v3544_v50  ;;  %v3554_v52 = vld [vmem:[%s4456_s2 + $0x134] sm:$0xf]  ;;  %v3559_v53 = vld [vmem:[%s4456_s2 + $0x138] sm:$0xff] }
  0x31   : > { %4574 = vst [vmem:[#allocation53_spill] sm:$0xff] %v3549_v51  ;;  %4575 = vst [vmem:[#allocation54_spill] sm:$0xff] %v3554_v52  ;;  %v3564_v54 = vld [vmem:[%s4456_s2 + $0x140] sm:$0xf]  ;;  %v3569_v55 = vld [vmem:[%s4456_s2 + $0x144] sm:$0xff] }
  0x32   : > { %4576 = vst [vmem:[#allocation55_spill] sm:$0xff] %v3559_v53  ;;  %4577 = vst [vmem:[#allocation56_spill] sm:$0xff] %v3564_v54  ;;  %v3574_v56 = vld [vmem:[%s4456_s2 + $0x14c] sm:$0xf]  ;;  %v3579_v57 = vld [vmem:[%s4456_s2 + $0x150] sm:$0xff] }
  0x33   : > { %4578 = vst [vmem:[#allocation57_spill] sm:$0xff] %v3569_v55  ;;  %4579 = vst [vmem:[#allocation58_spill] sm:$0xff] %v3574_v56  ;;  %v3584_v58 = vld [vmem:[%s4456_s2 + $0x158] sm:$0xf]  ;;  %v3589_v59 = vld [vmem:[%s4456_s2 + $0x15c] sm:$0xff] }
  0x34   : > { %4580 = vst [vmem:[#allocation59_spill] sm:$0xff] %v3579_v57  ;;  %4581 = vst [vmem:[#allocation60_spill] sm:$0xff] %v3584_v58  ;;  %v3594_v60 = vld [vmem:[%s4456_s2 + $0x164] sm:$0xf]  ;;  %v3599_v61 = vld [vmem:[%s4456_s2 + $0x168] sm:$0xff] }
  0x35   : > { %4582 = vst [vmem:[#allocation61_spill] sm:$0xff] %v3589_v59  ;;  %4583 = vst [vmem:[#allocation62_spill] sm:$0xff] %v3594_v60  ;;  %v3604_v62 = vld [vmem:[%s4456_s2 + $0x170] sm:$0xf]  ;;  %v3609_v63 = vld [vmem:[%s4456_s2 + $0x174] sm:$0xff] }
  0x36   : > { %4584 = vst [vmem:[#allocation63_spill] sm:$0xff] %v3599_v61  ;;  %4585 = vst [vmem:[#allocation64_spill] sm:$0xff] %v3604_v62  ;;  %v3614_v0 = vld [vmem:[%s4456_s2 + $0x17c] sm:$0xf]  ;;  %v3619_v57 = vld [vmem:[%s4457_s3] ss:$0 sm:$0xff] }
  0x37   : > { %4586 = vst [vmem:[#allocation65_spill] sm:$0xff] %v3609_v63  ;;  %4587 = vst [vmem:[#allocation66_spill] sm:$0xff] %v3614_v0  ;;  %v3624_v61 = vld [vmem:[%s4457_s3 + $0x1] ss:$0 sm:$0xff] }
  0x38   : > { %4588 = vst [vmem:[#allocation67_spill] sm:$0xff] %v3619_v57  ;;  %4589 = vst [vmem:[#allocation68_spill] sm:$0xff] %v3624_v61 }
  0x39 LB: >> { %v4590_v51 = vld [vmem:[#allocation53_spill] sm:$0xff]  ;;  %v4591_v49 = vld [vmem:[#allocation51_spill] sm:$0xff]  ;;  %v4616_v36 = vld [vmem:[#allocation38_spill] sm:$0xff]  ;;  %s3728_s12 = sshll.u32 %s3231_s10, 3  ;;  %s2843_s19 = smul.u32 48, %s3231_s10  ;;  %s3231_s10 = sphi %s3626_s10, %s368_s10  }
  0x3a   : >> { %v4592_v47 = vld [vmem:[#allocation49_spill] sm:$0xff]  ;;  %v4593_v45 = vld [vmem:[#allocation47_spill] sm:$0xff]  ;;  %v4617_v34 = vld [vmem:[#allocation36_spill] sm:$0xff]  ;;  %s370_s13 = ssub.s32 87, %s3728_s12  ;;  %s3954_s17 = scalar_lea.vmem %s269_s26, %s3728_s12 }
  0x3b   : >> { %v4594_v43 = vld [vmem:[#allocation45_spill] sm:$0xff]  ;;  %v4595_v41 = vld [vmem:[#allocation43_spill] sm:$0xff]  ;;  %v4619_v4 = vld [vmem:[#allocation6_spill] sm:$0xff]  ;;  %s394_s14 = scalar_lea.vmem %s3284_s30, %s370_s13  ;;  %s3959_s21 = scalar_lea.vmem %s3289_s8, %s2843_s19 }
  0x3c   : >> { %v4596_v39 = vld [vmem:[#allocation41_spill] sm:$0xff]  ;;  %v4597_v37 = vld [vmem:[#allocation39_spill] sm:$0xff]  ;;  %v4620_v2 = vld [vmem:[#allocation4_spill] sm:$0xff]  ;;  %s2844_s22 = smul.u32 6, %s370_s13  ;;  %s862_s24 = ssub.s32 86, %s3728_s12 }
  0x3d   : >> { %v4598_v35 = vld [vmem:[#allocation37_spill] sm:$0xff]  ;;  %v4599_v33 = vld [vmem:[#allocation35_spill] sm:$0xff]  ;;  %v4621_v40 = vld [vmem:[#allocation42_spill] sm:$0xff]  ;;  %s886_s25 = scalar_lea.vmem %s3284_s30, %s862_s24  ;;  %s2845_s27 = smul.u32 6, %s862_s24 }
  0x3e   : >> { %v4600_v31 = vld [vmem:[#allocation33_spill] sm:$0xff]  ;;  %v4601_v29 = vld [vmem:[#allocation31_spill] sm:$0xff]  ;;  %v4622_v38 = vld [vmem:[#allocation40_spill] sm:$0xff]  ;;  %s772_s23 = scalar_lea.vmem %s3294_s11, %s2844_s22  ;;  %s1098_s29 = ssub.s32 85, %s3728_s12 }
  0x3f   : >> { %v4602_v27 = vld [vmem:[#allocation29_spill] sm:$0xff]  ;;  %v4603_v25 = vld [vmem:[#allocation27_spill] sm:$0xff]  ;;  %v4623_v8 = vld [vmem:[#allocation10_spill] sm:$0xff]  ;;  %s1008_s28 = scalar_lea.vmem %s3294_s11, %s2845_s27  ;;  %s1122_s6 = scalar_lea.vmem %s3284_s30, %s1098_s29 }
  0x40   : >> { %v4604_v23 = vld [vmem:[#allocation25_spill] sm:$0xff]  ;;  %v4605_v21 = vld [vmem:[#allocation23_spill] sm:$0xff]  ;;  %v4624_v6 = vld [vmem:[#allocation8_spill] sm:$0xff]  ;;  %s2846_s7 = smul.u32 6, %s1098_s29  ;;  %s1334_s13 = ssub.s32 84, %s3728_s12 }
  0x41   : >> { %v4606_v19 = vld [vmem:[#allocation21_spill] sm:$0xff]  ;;  %v4607_v17 = vld [vmem:[#allocation19_spill] sm:$0xff]  ;;  %v4625_v44 = vld [vmem:[#allocation46_spill] sm:$0xff]  ;;  %s2847_s15 = smul.u32 6, %s1334_s13  ;;  %s1570_s19 = ssub.s32 83, %s3728_s12 }
  0x42   : >> { %v4608_v15 = vld [vmem:[#allocation17_spill] sm:$0xff]  ;;  %v4609_v13 = vld [vmem:[#allocation15_spill] sm:$0xff]  ;;  %v4626_v42 = vld [vmem:[#allocation44_spill] sm:$0xff]  ;;  %s1244_s9 = scalar_lea.vmem %s3294_s11, %s2846_s7  ;;  %s1594_s22 = scalar_lea.vmem %s3284_s30, %s1570_s19 }
  0x43   : >> { %v4610_v11 = vld [vmem:[#allocation13_spill] sm:$0xff]  ;;  %v4611_v9 = vld [vmem:[#allocation11_spill] sm:$0xff]  ;;  %v4627_v12 = vld [vmem:[#allocation14_spill] sm:$0xff]  ;;  %s1480_s16 = scalar_lea.vmem %s3294_s11, %s2847_s15  ;;  %s368_s10 = sadd.s32 1, %s3231_s10  }
  0x44   : >> { %v4612_v7 = vld [vmem:[#allocation9_spill] sm:$0xff]  ;;  %v4613_v5 = vld [vmem:[#allocation7_spill] sm:$0xff]  ;;  %v3652_v53 = vcombine.high %v4611_v9, %v4610_v11  ;;  %v3663_v55 = vcombine.low %v4611_v9, %v4610_v11  ;;  %v3682_v9 = vcombine.low %v4624_v6, %v4623_v8  ;;  %v3694_v11 = vcombine.low %v4609_v13, %v4608_v15  ;;  %v4628_v10 = vld [vmem:[#allocation12_spill] sm:$0xff]  ;;  %p365_p6 = scmp.ge.s32.totalorder %s368_s10, 11  }
  0x45   : >> { %v4614_v3 = vld [vmem:[#allocation5_spill] sm:$0xff]  ;;  %v4615_v1 = vld [vmem:[#allocation3_spill] sm:$0xff]  ;;  %v3641_v57 = vcombine.high %v4613_v5, %v4612_v7  ;;  %v3647_v61 = vcombine.low %v4613_v5, %v4612_v7  ;;  %v3667_v5 = vcombine.low %v4620_v2, %v4619_v4  ;;  %v3671_v7 = vcombine.low %v4622_v38, %v4621_v40  ;;  %v4629_v48 = vld [vmem:[#allocation50_spill] sm:$0xff] }
  0x46   : >> { %v3633_v63 = vcombine.high %v4615_v1, %v4614_v3  ;;  %v3637_v59 = vcombine.low %v4615_v1, %v4614_v3  ;;  %v3656_v1 = vcombine.low %v4617_v34, %v4616_v36  ;;  %v3658_v3 = vld [vmem:[#allocation2] sm:$0xff]  ;;  %v3676_v34 = vcombine.high %v4609_v13, %v4608_v15  ;;  %v4630_v46 = vld [vmem:[#allocation48_spill] sm:$0xff] }
  0x47   : >> { %v398_v2 = vcombine.high %v3658_v3, %v3658_v3  ;;  %v3689_v4 = vcombine.low %v4626_v42, %v4625_v44  ;;  %v3699_v6 = vcombine.high %v4607_v17, %v4606_v19  ;;  %v3704_v8 = vcombine.low %v4628_v10, %v4627_v12  ;;  %v3711_v13 = vld [vmem:[#allocation2 + $0x4] sm:$0xc]  ;;  %v4632_v14 = vld [vmem:[#allocation16_spill] sm:$0xff] }
  0x48   : >> { %658 = vmatprep.subr.bf16.mxu0 %v3633_v63  ;;  %4618 = vst [vmem:[#allocation69_spill] sm:$0xff] %v3656_v1  ;;  %2852 = vmatprep.subr.bf16.mxu1 %v3656_v1  ;;  %v3234_v38 = vmov 1966171168   ;;  %v381_v42 = vlaneseq  ;;  %v3716_v10 = vcombine.low %v4607_v17, %v4606_v19  ;;  %v376_v12 = vpack.c.bf16 %v3711_v13, %v3711_v13  ;;  %v4631_v16 = vld [vmem:[#allocation18_spill] sm:$0xff]  ;;  %v4634_v50 = vld [vmem:[#allocation52_spill] sm:$0xff] }
  0x49   : >> { %659 = vmatpush1.bf16.msra.mxu0 %v3637_v59  ;;  %2853 = vmatpush3.bf16.msra.mxu1 %v3667_v5  ;;  %v401_v36 = vpack.c.bf16 %v398_v2, %v398_v2  ;;  %v379_v40 = vunpack.c.l.s4 %v3234_v38  ;;  %v3709_v2 = vcombine.low %v4630_v46, %v4629_v48  ;;  %v3733_v17 = vcombine.low %v4632_v14, %v4631_v16  ;;  %v4633_v52 = vld [vmem:[#allocation54_spill] sm:$0xff]  ;;  %v4636_v18 = vld [vmem:[#allocation20_spill] sm:$0xff] }
  0x4a   : >> { %660 = vmatprep.subr.bf16.mxu0 %v3641_v57  ;;  %2854 = vmatprep.subr.bf16.mxu1 %v3671_v7  ;;  %v3720_v15 = vshrl.u32 %v381_v42, 7  ;;  %v3741_v42 = vcombine.low %v4634_v50, %v4633_v52  ;;  %v3746_v19 = vcombine.low %v4605_v21, %v4604_v23  ;;  %v4635_v20 = vld [vmem:[#allocation22_spill] sm:$0xff]  ;;  %v4638_v54 = vld [vmem:[#allocation56_spill] sm:$0xff]  ;;  %v3235_v52 = vmov 1983009808  }
  0x4b   : >> { %690 = vmatprep.mubr.bf16.mxu0 %v401_v36  ;;  %731 = vmatprep.mubr.bf16.mxu1 %v401_v36  ;;  %v380_v38 = vunpack.c.0.s8 %v379_v40  ;;  %v3725_v36 = vcombine.high %v4605_v21, %v4604_v23  ;;  %v3761_v14 = vcombine.low %v4636_v18, %v4635_v20  ;;  %v4637_v56 = vld [vmem:[#allocation58_spill] sm:$0xff]  ;;  %v3771_v21 = vcombine.low %v4603_v25, %v4602_v27  ;;  %v4640_v22 = vld [vmem:[#allocation24_spill] sm:$0xff] }
  0x4c   : >> { %v3776_v18 = vcombine.high %v4601_v29, %v4600_v31  ;;  %v4639_v24 = vld [vmem:[#allocation26_spill] sm:$0xff]  ;;  %v4642_v58 = vld [vmem:[#allocation60_spill] sm:$0xff]  ;;  %v3796_v23 = vcombine.high %v4599_v33, %v4598_v35 }
  0x4d   : >> { %661 = vmatpush1.bf16.msra.mxu0 %v3647_v61  ;;  %2855 = vmatpush3.bf16.msra.mxu1 %v3682_v9  ;;  %v3736_v40 = vsub.s32 %v380_v38, %v3720_v15  ;;  %v3753_v38 = vcombine.high %v4603_v25, %v4602_v27  ;;  %v4641_v60 = vld [vmem:[#allocation62_spill] sm:$0xff]  ;;  %v4644_v26 = vld [vmem:[#allocation28_spill] sm:$0xff]  ;;  %v3811_v25 = vcombine.low %v4599_v33, %v4598_v35  ;;  %v4654_v35 = vld [vmem:[#allocation57_spill] sm:$0xff] }
  0x4e   : >> { %662 = vmatprep.subr.bf16.mxu0 %v3652_v53  ;;  %2856 = vmatprep.subr.bf16.mxu1 %v3689_v4  ;;  %v3786_v20 = vcombine.low %v4642_v58, %v4641_v60  ;;  %v4643_v28 = vld [vmem:[#allocation30_spill] sm:$0xff]  ;;  %v4646_v62 = vld [vmem:[#allocation64_spill] sm:$0xff]  ;;  %v3816_v27 = vcombine.high %v4597_v37, %v4596_v39  ;;  %v3865_v33 = vcombine.low %v4591_v49, %v4590_v51 }
  0x4f   : >> { %v384_v44 = vrot.slane %v376_v12, %v3736_v40  ;;  %v3766_v12 = vcombine.low %v4638_v54, %v4637_v56  ;;  %v4645_v0 = vld [vmem:[#allocation66_spill] sm:$0xff]  ;;  %v4648_v30 = vld [vmem:[#allocation32_spill] sm:$0xff]  ;;  %v776_v54 = vunpack.c.l.s4 %v3235_v52 }
  0x50   : >> { %v4647_v32 = vld [vmem:[#allocation34_spill] sm:$0xff]  ;;  %4653 = vst [vmem:[#allocation74_spill] sm:$0xff] %v3865_v33 }
  0x51   : >> { %663 = vmatpush1.bf16.msra.mxu0 %v3663_v55  ;;  %2857 = vmatpush3.bf16.msra.mxu1 %v3704_v8  ;;  %v385_v16 = vcombine.high %v384_v44, %v384_v44  ;;  %v3781_v44 = vcombine.low %v4640_v22, %v4639_v24  ;;  %v3801_v22 = vcombine.low %v4644_v26, %v4643_v28  ;;  %v777_v56 = vunpack.c.0.s8 %v776_v54  ;;  %v742_v60 = vld [vmem:[%s3959_s21] sm:$0x3f] }
  0x52   : >> { %664 = vmatprep.subr.bf16.mxu0 %v3676_v34  ;;  %2858 = vmatprep.subr.bf16.mxu1 %v3709_v2  ;;  %v3806_v24 = vcombine.low %v4646_v62, %v4645_v0  ;;  %v3821_v26 = vcombine.low %v4648_v30, %v4647_v32  ;;  %v3827_v0 = vcombine.low %v4597_v37, %v4596_v39  ;;  %v4655_v37 = vld [vmem:[#allocation55_spill] sm:$0xff] }
  0x53   : >> { %2700 = vst.sshfl [vmem:[%s394_s14] sm:$0x1 pattern:$0x73625140] %v385_v16  ;;  %v3791_v16 = vcombine.low %v4601_v29, %v4600_v31  ;;  %v3832_v28 = vcombine.high %v4595_v41, %v4594_v43  ;;  %v400_v29 = vpack.c.bf16 %v3658_v3, %v3658_v3  ;;  %v3841_v30 = vcombine.low %v4595_v41, %v4594_v43  ;;  %v4658_v43 = vld [vmem:[#allocation61_spill] sm:$0xff]  ;;  %s1358_s14 = scalar_lea.vmem %s3284_s30, %s1334_s13 }
  0x54   : >> { %v3846_v31 = vcombine.high %v4593_v45, %v4592_v47  ;;  %v3853_v3 = vcombine.low %v4593_v45, %v4592_v47  ;;  %v3858_v32 = vcombine.high %v4591_v49, %v4590_v51  ;;  %v3870_v39 = vcombine.high %v4655_v37, %v4654_v35  ;;  %v4659_v45 = vld [vmem:[#allocation59_spill] sm:$0xff] }
  0x55   : >> { %665 = vmatpush1.bf16.msra.mxu0 %v3694_v11  ;;  %2859 = vmatpush3.bf16.msra.mxu1 %v3733_v17  ;;  %4649 = vst [vmem:[#allocation70_spill] sm:$0xff] %v3841_v30  ;;  %v3877_v41 = vcombine.low %v4655_v37, %v4654_v35  ;;  %v3882_v46 = vcombine.high %v4659_v45, %v4658_v43  ;;  %v4662_v35 = vld [vmem:[#allocation65_spill] sm:$0xff]  ;;  %v4663_v37 = vld [vmem:[#allocation63_spill] sm:$0xff] }
  0x56   : >> { %666 = vmatprep.subr.bf16.mxu0 %v3699_v6  ;;  %2860 = vmatprep.subr.bf16.mxu1 %v3741_v42  ;;  %4650 = vst [vmem:[#allocation71_spill] sm:$0xff] %v3846_v31  ;;  %4651 = vst [vmem:[#allocation72_spill] sm:$0xff] %v3853_v3  ;;  %v3889_v47 = vcombine.low %v4659_v45, %v4658_v43  ;;  %v3894_v48 = vcombine.high %v4663_v37, %v4662_v35 }
  0x57   : >> { %4652 = vst [vmem:[#allocation73_spill] sm:$0xff] %v3858_v32  ;;  %4656 = vst [vmem:[#allocation75_spill] sm:$0xff] %v3870_v39  ;;  %v3901_v49 = vcombine.low %v4663_v37, %v4662_v35  ;;  %v3964_v58 = vsub.s32 %v777_v56, %v3720_v15 }
  0x58   : >> { %4657 = vst [vmem:[#allocation76_spill] sm:$0xff] %v3877_v41  ;;  %4660 = vst [vmem:[#allocation77_spill] sm:$0xff] %v3882_v46 }
  0x59   : >> { %667 = vmatpush1.bf16.msra.mxu0 %v3716_v10  ;;  %2861 = vmatpush3.bf16.msra.mxu1 %v3761_v14  ;;  %4661 = vst [vmem:[#allocation78_spill] sm:$0xff] %v3889_v47  ;;  %4664 = vst [vmem:[#allocation79_spill] sm:$0xff] %v3894_v48 }
  0x5a   : >> { %668 = vmatprep.subr.bf16.mxu0 %v3725_v36  ;;  %2862 = vmatprep.subr.bf16.mxu1 %v3766_v12  ;;  %4665 = vst [vmem:[#allocation80_spill] sm:$0xff] %v3901_v49 }
  0x5d   : >> { %669 = vmatpush1.bf16.msra.mxu0 %v3746_v19  ;;  %2863 = vmatpush3.bf16.msra.mxu1 %v3781_v44 }
  0x5e   : >> { %670 = vmatprep.subr.bf16.mxu0 %v3753_v38  ;;  %2864 = vmatprep.subr.bf16.mxu1 %v3786_v20 }
  0x61   : >> { %671 = vmatpush1.bf16.msra.mxu0 %v3771_v21  ;;  %2865 = vmatpush3.bf16.msra.mxu1 %v3801_v22 }
  0x62   : >> { %672 = vmatprep.subr.bf16.mxu0 %v3776_v18  ;;  %2866 = vmatprep.subr.bf16.mxu1 %v3806_v24 }
  0x65   : >> { %673 = vmatpush1.bf16.msra.mxu0 %v3791_v16  ;;  %2867 = vmatpush3.bf16.msra.mxu1 %v3821_v26 }
  0x66   : >> { %674 = vmatprep.subr.bf16.mxu0 %v3796_v23  ;;  %894 = vmatprep.subr.bf16.mxu1 %v3633_v63 }
  0x68   : >> { %732 = vmatmul.mubr.bf16.vlgmr.msra.gmra.mrb[0].mxu1 %v400_v29 }
  0x69   : >> { %675 = vmatpush1.bf16.msra.mxu0 %v3811_v25  ;;  %895 = vmatpush1.bf16.msra.mxu1 %v3637_v59 }
  0x6a   : >> { %676 = vmatprep.subr.bf16.mxu0 %v3816_v27  ;;  %896 = vmatprep.subr.bf16.mxu1 %v3641_v57 }
  0x6d   : >> { %677 = vmatpush1.bf16.msra.mxu0 %v3827_v0  ;;  %897 = vmatpush1.bf16.msra.mxu1 %v3647_v61 }
  0x6e   : >> { %678 = vmatprep.subr.bf16.mxu0 %v3832_v28  ;;  %898 = vmatprep.subr.bf16.mxu1 %v3652_v53 }
  0x71   : >> { %679 = vmatpush1.bf16.msra.mxu0 %v3841_v30  ;;  %899 = vmatpush1.bf16.msra.mxu1 %v3663_v55 }
  0x72   : >> { %680 = vmatprep.subr.bf16.mxu0 %v3846_v31  ;;  %900 = vmatprep.subr.bf16.mxu1 %v3676_v34 }
  0x75   : >> { %681 = vmatpush1.bf16.msra.mxu0 %v3853_v3  ;;  %901 = vmatpush1.bf16.msra.mxu1 %v3694_v11 }
  0x76   : >> { %682 = vmatprep.subr.bf16.mxu0 %v3858_v32  ;;  %902 = vmatprep.subr.bf16.mxu1 %v3699_v6 }
  0x79   : >> { %683 = vmatpush1.bf16.msra.mxu0 %v3865_v33  ;;  %903 = vmatpush1.bf16.msra.mxu1 %v3716_v10 }
  0x7a   : >> { %684 = vmatprep.subr.bf16.mxu0 %v3870_v39  ;;  %904 = vmatprep.subr.bf16.mxu1 %v3725_v36 }
  0x7d   : >> { %685 = vmatpush1.bf16.msra.mxu0 %v3877_v41  ;;  %905 = vmatpush1.bf16.msra.mxu1 %v3746_v19 }
  0x7e   : >> { %686 = vmatprep.subr.bf16.mxu0 %v3882_v46  ;;  %906 = vmatprep.subr.bf16.mxu1 %v3753_v38 }
  0x81   : >> { %687 = vmatpush1.bf16.msra.mxu0 %v3889_v47  ;;  %907 = vmatpush1.bf16.msra.mxu1 %v3771_v21 }
  0x82   : >> { %688 = vmatprep.subr.bf16.mxu0 %v3894_v48  ;;  %908 = vmatprep.subr.bf16.mxu1 %v3776_v18 }
  0x85   : >> { %689 = vmatpush1.bf16.msra.mxu0 %v3901_v49  ;;  %909 = vmatpush1.bf16.msra.mxu1 %v3791_v16 }
  0x86   : >> { %2874 = vmatprep.subr.bf16.mxu0 %v3656_v1  ;;  %910 = vmatprep.subr.bf16.mxu1 %v3796_v23 }
  0x88   : >> { %691 = vmatmul.mubr.bf16.vlgmr.msra.gmra.mrb[0].mxu0 %v400_v29  ;;  %v3944_v29 = vld [vmem:[#allocation2] sm:$0x3] }
  0x89   : >> { %2875 = vmatpush3.bf16.msra.mxu0 %v3667_v5  ;;  %911 = vmatpush1.bf16.msra.mxu1 %v3811_v25  ;;  %v373_v35 = vpack.c.bf16 %v3944_v29, %v3944_v29 }
  0x8a   : >> { %2876 = vmatprep.subr.bf16.mxu0 %v3671_v7  ;;  %912 = vmatprep.subr.bf16.mxu1 %v3816_v27 }
  0x8b   : >> { %375 = vst [vmem:[%s3954_s17] sm:$0x1] %v373_v35 }
  0x8d   : >> { %2877 = vmatpush3.bf16.msra.mxu0 %v3682_v9  ;;  %913 = vmatpush1.bf16.msra.mxu1 %v3827_v0 }
  0x8e   : >> { %2878 = vmatprep.subr.bf16.mxu0 %v3689_v4  ;;  %914 = vmatprep.subr.bf16.mxu1 %v3832_v28 }
  0x91   : >> { %2879 = vmatpush3.bf16.msra.mxu0 %v3704_v8  ;;  %915 = vmatpush1.bf16.msra.mxu1 %v3841_v30 }
  0x92   : >> { %2880 = vmatprep.subr.bf16.mxu0 %v3709_v2  ;;  %916 = vmatprep.subr.bf16.mxu1 %v3846_v31 }
  0x95   : >> { %2881 = vmatpush3.bf16.msra.mxu0 %v3733_v17  ;;  %917 = vmatpush1.bf16.msra.mxu1 %v3853_v3 }
  0x96   : >> { %2882 = vmatprep.subr.bf16.mxu0 %v3741_v42  ;;  %918 = vmatprep.subr.bf16.mxu1 %v3858_v32 }
  0x99   : >> { %2883 = vmatpush3.bf16.msra.mxu0 %v3761_v14  ;;  %919 = vmatpush1.bf16.msra.mxu1 %v3865_v33 }
  0x9a   : >> { %2884 = vmatprep.subr.bf16.mxu0 %v3766_v12  ;;  %920 = vmatprep.subr.bf16.mxu1 %v3870_v39 }
  0x9d   : >> { %2885 = vmatpush3.bf16.msra.mxu0 %v3781_v44  ;;  %921 = vmatpush1.bf16.msra.mxu1 %v3877_v41 }
  0x9e   : >> { %2886 = vmatprep.subr.bf16.mxu0 %v3786_v20  ;;  %922 = vmatprep.subr.bf16.mxu1 %v3882_v46 }
  0xa1   : >> { %2887 = vmatpush3.bf16.msra.mxu0 %v3801_v22  ;;  %923 = vmatpush1.bf16.msra.mxu1 %v3889_v47 }
  0xa2   : >> { %2888 = vmatprep.subr.bf16.mxu0 %v3806_v24  ;;  %924 = vmatprep.subr.bf16.mxu1 %v3894_v48  ;;  %v751_v48 = vrot.slane %v742_v60, 2 }
  0xa5   : >> { %2889 = vmatpush3.bf16.msra.mxu0 %v3821_v26  ;;  %925 = vmatpush1.bf16.msra.mxu1 %v3901_v49 }
  0xa6   : >> { %1130 = vmatprep.subr.bf16.mxu0 %v3633_v63  ;;  %2896 = vmatprep.subr.bf16.mxu1 %v3656_v1 }
 0x13b   : >> { %v2868_v37 = vpop.f32.mrb[0].mxu1 }
 0x13c   : >> { %v2869_v43 = vpop.f32.mrb[1].mxu1 }
 0x13d   : >> { %v2870_v45 = vadd.f32 %v2869_v43, %v2868_v37  ;;  %v2871_v50 = vpop.f32.mrb[2].mxu1 }
 0x13e   : >> { %v2872_v51 = vpop.f32.mrb[3].mxu1  ;;  %v773_v50 = vld [vmem:[%s772_s23] sm:$0x3f]  ;;  %s2848_s23 = smul.u32 6, %s1570_s19 }
 0x140   : >> { %s1716_s24 = scalar_lea.vmem %s3294_s11, %s2848_s23 }
 0x15b   : >> { %v692_v35 = vpop.f32.mrb[0].mxu0 }
 0x15c   : >> { %v743_v62 = vadd.f32 %v742_v60, %v692_v35  ;;  %v781_v37 = vrot.slane %v692_v35, %v3964_v58  ;;  %v694_v43 = vpop.f32.mrb[1].mxu0  ;;  %v792_v35 = vrot.slane %v773_v50, 2 }
 0x15d   : >> { %v696_v51 = vpop.f32.mrb[2].mxu0  ;;  %v753_v46 = vadd.f32 %v751_v48, %v694_v43  ;;  %v801_v56 = vrot.slane %v694_v43, %v3964_v58 }
 0x15e   : >> { %v2751_v52 = vmul.f32 -1.442695, %v743_v62  ;;  %v782_v1 = vcombine.high %v781_v37, %v781_v37  ;;  %v697_v54 = vpop.f32.mrb[3].mxu0  ;;  %v4666_v62 = vld [vmem:[#allocation68_spill] sm:$0xff] }
 0x15f   : >> { %v2752_v15 = vmul.f32 -1.442695, %v753_v46  ;;  %v802_v33 = vcombine.high %v801_v56, %v801_v56  ;;  %v811_v37 = vadd.f32 %v2870_v45, %v4666_v62 }
 0x160   : >> { %3057 = vpow2.f32 %v2751_v52  ;;  %v784_v49 = vadd.f32 %v782_v1, %v773_v50  ;;  %v4667_v1 = vld [vmem:[#allocation67_spill] sm:$0xff] }
 0x161   : >> { %v804_v52 = vadd.f32 %v802_v33, %v792_v35  ;;  %v760_v54 = vadd.f32 %v2870_v45, %v4667_v1 }
 0x162   : >> { %v2754_v47 = vmul.f32 -1.442695, %v784_v49  ;;  %v762_v49 = vrot.slane %v742_v60, 4 }
 0x163   : >> { %v2755_v48 = vmul.f32 -1.442695, %v804_v52 }
 0x164   : >> { %3059 = vpow2.f32 %v2754_v47  ;;  %v819_v47 = vrot.slane %v811_v37, %v3964_v58 }
 0x165   : >> { %3061 = vpow2.f32 %v2752_v15 }
 0x16a   : >> { %v3058_v41 = vpop.eup %3057 }
 0x16b   : >> { %v747_v39 = vadd.f32 1.0, %v3058_v41  ;;  %v820_v41 = vcombine.high %v819_v47, %v819_v47 }
 0x16d   : >> { %3063 = vrcp.f32 %v747_v39  ;;  %v823_v39 = vrot.slane %v773_v50, 4 }
 0x16e   : >> { %v3060_v32 = vpop.eup %3059 }
 0x16f   : >> { %v788_v51 = vadd.f32 1.0, %v3060_v32  ;;  %v3062_v46 = vpop.eup %3061 }
 0x170   : >> { %v757_v15 = vadd.f32 1.0, %v3062_v46 }
 0x171   : >> { %3065 = vrcp.f32 %v788_v51 }
 0x172   : >> { %3067 = vpow2.f32 %v2755_v48 }
 0x177   : >> { %v3064_v43 = vpop.eup %3063 }
 0x178   : >> { %v761_v3 = vmul.f32 %v3064_v43, %v760_v54 }
 0x17a   : >> { %v764_v56 = vadd.f32 %v762_v49, %v761_v3 }
 0x17b   : >> { %v3066_v31 = vpop.eup %3065 }
 0x17c   : >> { %3069 = vtanh.f32 %v764_v56  ;;  %v822_v32 = vmul.f32 %v3066_v31, %v820_v41  ;;  %v3068_v33 = vpop.eup %3067 }
 0x17d   : >> { %3071 = vrcp.f32 %v757_v15  ;;  %v808_v35 = vadd.f32 1.0, %v3068_v33 }
 0x17e   : >> { %v825_v51 = vadd.f32 %v823_v39, %v822_v32 }
 0x180   : >> { %3073 = vtanh.f32 %v825_v51 }
 0x181   : >> { %3075 = vrcp.f32 %v808_v35 }
 0x186   : >> { %v3070_v45 = vpop.eup %3069 }
 0x187   : >> { %v766_v37 = vsub.f32 %v3944_v29, %v3070_v45  ;;  %v3072_v52 = vpop.eup %3071 }
 0x189   : >> { %v767_v60 = vmul.f32 %v3072_v52, %v766_v37  ;;  %v4668_v52 = vld [vmem:[#allocation71_spill] sm:$0xff] }
 0x18a   : >> { %v3074_v54 = vpop.eup %3073 }
 0x18b   : >> { %v768_v47 = vadd.f32 %v3070_v45, %v767_v60  ;;  %v828_v50 = vcombine.low %v3074_v54, %v3074_v54  ;;  %v3076_v49 = vpop.eup %3075  ;;  %v4669_v60 = vld [vmem:[#allocation72_spill] sm:$0xff] }
 0x18d   : >> { %769 = vst [vmem:[#allocation2] sm:$0x3] %v768_v47  ;;  %v835_v3 = vrot.slane %v828_v50, %v3964_v58  ;;  %v4671_v47 = vld [vmem:[#allocation74_spill] sm:$0xff]  ;;  %v4672_v50 = vld [vmem:[#allocation75_spill] sm:$0xff] }
 0x18f   : >> { %v837_v31 = vsub.f32 %v3711_v13, %v835_v3  ;;  %v4673_v3 = vld [vmem:[#allocation76_spill] sm:$0xff] }
 0x191   : >> { %v845_v48 = vrot.slane %v837_v31, %v3964_v58  ;;  %v4674_v31 = vld [vmem:[#allocation77_spill] sm:$0xff] }
 0x193   : >> { %v846_v46 = vcombine.high %v845_v48, %v845_v48  ;;  %v4675_v48 = vld [vmem:[#allocation78_spill] sm:$0xff] }
 0x194   : >> { %v3977_v29 = vld [vmem:[#allocation2] sm:$0x3] }
 0x195   : >> { %v848_v43 = vmul.f32 %v3076_v49, %v846_v46  ;;  %v865_v41 = vpack.c.bf16 %v3977_v29, %v3977_v29  ;;  %v4676_v46 = vld [vmem:[#allocation79_spill] sm:$0xff]  ;;  %v4677_v49 = vld [vmem:[#allocation80_spill] sm:$0xff] }
 0x197   : >> { %v849_v39 = vadd.f32 %v3074_v54, %v848_v43  ;;  %2758 = vst [vmem:[%s3954_s17 + $0x1] sm:$0x1] %v865_v41  ;;  %v4670_v54 = vld [vmem:[#allocation73_spill] sm:$0xff]  ;;  %v2762_v41 = vld [vmem:[%s3959_s21 + $0x6] sm:$0x3f] }
 0x198   : >> { %v4678_v43 = vld [vmem:[#allocation69_spill] sm:$0xff] }
 0x199   : >> { %v851_v15 = vcombine.low %v849_v39, %v849_v39 }
 0x19b   : >> { %2756 = vst.sshfl [vmem:[#allocation2 + $0x4] sm:$0x30 pattern:$0x76325410] %v851_v15 }
 0x1a2   : >> { %v888_v56 = vld [vmem:[#allocation2] sm:$0xff] }
 0x1a3   : >> { %v3982_v32 = vld [vmem:[#allocation2 + $0x4] sm:$0xc]  ;;  %v890_v13 = vcombine.high %v888_v56, %v888_v56  ;;  %v892_v35 = vpack.c.bf16 %v888_v56, %v888_v56 }
 0x1a4   : >> { %v868_v51 = vpack.c.bf16 %v3982_v32, %v3982_v32 }
 0x1a5   : >> { %v893_v33 = vpack.c.bf16 %v890_v13, %v890_v13 }
 0x1a6   : >> { %v876_v45 = vrot.slane %v868_v51, %v3736_v40 }
 0x1a7   : >> { %926 = vmatprep.mubr.bf16.mxu1 %v893_v33  ;;  %967 = vmatprep.mubr.bf16.mxu0 %v893_v33 }
 0x1a8   : >> { %v877_v37 = vcombine.high %v876_v45, %v876_v45  ;;  %927 = vmatmul.mubr.bf16.vlgmr.msra.gmra.mrb[4].mxu1 %v892_v35  ;;  %968 = vmatmul.mubr.bf16.vlgmr.msra.gmra.mrb[4].mxu0 %v892_v35  ;;  %v1009_v45 = vld [vmem:[%s1008_s28] sm:$0x3f] }
 0x1a9   : >> { %1131 = vmatpush1.bf16.msra.mxu0 %v3637_v59  ;;  %2897 = vmatpush3.bf16.msra.mxu1 %v3667_v5 }
 0x1aa   : >> { %2759 = vst.sshfl [vmem:[%s886_s25] sm:$0x1 pattern:$0x73625140] %v877_v37  ;;  %1132 = vmatprep.subr.bf16.mxu0 %v3641_v57  ;;  %2898 = vmatprep.subr.bf16.mxu1 %v3671_v7  ;;  %s1806_s25 = ssub.s32 82, %s3728_s12 }
 0x1ab   : >> { %s1830_s27 = scalar_lea.vmem %s3284_s30, %s1806_s25  ;;  %s2849_s28 = smul.u32 6, %s1806_s25 }
 0x1ad   : >> { %1133 = vmatpush1.bf16.msra.mxu0 %v3647_v61  ;;  %2899 = vmatpush3.bf16.msra.mxu1 %v3682_v9  ;;  %s1952_s29 = scalar_lea.vmem %s3294_s11, %s2849_s28 }
 0x1ae   : >> { %1134 = vmatprep.subr.bf16.mxu0 %v3652_v53  ;;  %2900 = vmatprep.subr.bf16.mxu1 %v3689_v4 }
 0x1b1   : >> { %1135 = vmatpush1.bf16.msra.mxu0 %v3663_v55  ;;  %2901 = vmatpush3.bf16.msra.mxu1 %v3704_v8 }
 0x1b2   : >> { %1136 = vmatprep.subr.bf16.mxu0 %v3676_v34  ;;  %2902 = vmatprep.subr.bf16.mxu1 %v3709_v2 }
 0x1b5   : >> { %1137 = vmatpush1.bf16.msra.mxu0 %v3694_v11  ;;  %2903 = vmatpush3.bf16.msra.mxu1 %v3733_v17 }
 0x1b6   : >> { %1138 = vmatprep.subr.bf16.mxu0 %v3699_v6  ;;  %2904 = vmatprep.subr.bf16.mxu1 %v3741_v42 }
 0x1b9   : >> { %1139 = vmatpush1.bf16.msra.mxu0 %v3716_v10  ;;  %2905 = vmatpush3.bf16.msra.mxu1 %v3761_v14 }
 0x1ba   : >> { %1140 = vmatprep.subr.bf16.mxu0 %v3725_v36  ;;  %2906 = vmatprep.subr.bf16.mxu1 %v3766_v12 }
 0x1bd   : >> { %1141 = vmatpush1.bf16.msra.mxu0 %v3746_v19  ;;  %2907 = vmatpush3.bf16.msra.mxu1 %v3781_v44 }
 0x1be   : >> { %1142 = vmatprep.subr.bf16.mxu0 %v3753_v38  ;;  %2908 = vmatprep.subr.bf16.mxu1 %v3786_v20 }
 0x1c1   : >> { %1143 = vmatpush1.bf16.msra.mxu0 %v3771_v21  ;;  %2909 = vmatpush3.bf16.msra.mxu1 %v3801_v22 }
 0x1c2   : >> { %1144 = vmatprep.subr.bf16.mxu0 %v3776_v18  ;;  %2910 = vmatprep.subr.bf16.mxu1 %v3806_v24 }
 0x1c5   : >> { %1145 = vmatpush1.bf16.msra.mxu0 %v3791_v16  ;;  %2911 = vmatpush3.bf16.msra.mxu1 %v3821_v26 }
 0x1c6   : >> { %1146 = vmatprep.subr.bf16.mxu0 %v3796_v23  ;;  %1366 = vmatprep.subr.bf16.mxu1 %v3633_v63 }
 0x1c9   : >> { %1147 = vmatpush1.bf16.msra.mxu0 %v3811_v25 }
 0x1ca   : >> { %1148 = vmatprep.subr.bf16.mxu0 %v3816_v27 }
 0x1cd   : >> { %1149 = vmatpush1.bf16.msra.mxu0 %v3827_v0 }
 0x1ce   : >> { %1150 = vmatprep.subr.bf16.mxu0 %v3832_v28 }
 0x1d1   : >> { %1151 = vmatpush1.bf16.msra.mxu0 %v3841_v30 }
 0x1d2   : >> { %1152 = vmatprep.subr.bf16.mxu0 %v4668_v52 }
 0x1d5   : >> { %1153 = vmatpush1.bf16.msra.mxu0 %v4669_v60 }
 0x1d6   : >> { %1154 = vmatprep.subr.bf16.mxu0 %v4670_v54 }
 0x1d9   : >> { %1155 = vmatpush1.bf16.msra.mxu0 %v4671_v47 }
 0x1da   : >> { %1156 = vmatprep.subr.bf16.mxu0 %v4672_v50  ;;  %v987_v50 = vrot.slane %v2762_v41, 2 }
 0x1dd   : >> { %1157 = vmatpush1.bf16.msra.mxu0 %v4673_v3 }
 0x1de   : >> { %1158 = vmatprep.subr.bf16.mxu0 %v4674_v31 }
 0x1e1   : >> { %1159 = vmatpush1.bf16.msra.mxu0 %v4675_v48 }
 0x1e2   : >> { %1160 = vmatprep.subr.bf16.mxu0 %v4676_v46 }
 0x1e5   : >> { %1161 = vmatpush1.bf16.msra.mxu0 %v4677_v49 }
 0x1e6   : >> { %2918 = vmatprep.subr.bf16.mxu0 %v4678_v43 }
 0x27b   : >> { %v928_v39 = vpop.f32.mrb[4].mxu1  ;;  %v2890_v15 = vpop.f32.mrb[4].mxu0 }
 0x27c   : >> { %v979_v56 = vadd.f32 %v2762_v41, %v928_v39  ;;  %v1017_v13 = vrot.slane %v928_v39, %v3964_v58  ;;  %v930_v51 = vpop.f32.mrb[5].mxu1  ;;  %v2891_v33 = vpop.f32.mrb[5].mxu0 }
 0x27d   : >> { %v2892_v35 = vadd.f32 %v2891_v33, %v2890_v15  ;;  %v932_v37 = vpop.f32.mrb[6].mxu1  ;;  %v2893_v48 = vpop.f32.mrb[6].mxu0  ;;  %v989_v54 = vadd.f32 %v987_v50, %v930_v51  ;;  %v1037_v52 = vrot.slane %v930_v51, %v3964_v58  ;;  %v1028_v15 = vrot.slane %v1009_v45, 2 }
 0x27e   : >> { %v2763_v46 = vmul.f32 -1.442695, %v979_v56  ;;  %v1018_v31 = vcombine.high %v1017_v13, %v1017_v13  ;;  %v933_v49 = vpop.f32.mrb[7].mxu1  ;;  %v2894_v3 = vpop.f32.mrb[7].mxu0 }
 0x27f   : >> { %v2764_v60 = vmul.f32 -1.442695, %v989_v54  ;;  %v1038_v33 = vcombine.high %v1037_v52, %v1037_v52  ;;  %v1047_v3 = vadd.f32 %v2892_v35, %v4666_v62 }
 0x280   : >> { %3077 = vpow2.f32 %v2763_v46  ;;  %v1020_v43 = vadd.f32 %v1018_v31, %v1009_v45 }
 0x281   : >> { %v1040_v49 = vadd.f32 %v1038_v33, %v1028_v15  ;;  %v1055_v54 = vrot.slane %v1047_v3, %v3964_v58 }
 0x282   : >> { %v2766_v47 = vmul.f32 -1.442695, %v1020_v43  ;;  %v998_v43 = vrot.slane %v2762_v41, 4 }
 0x283   : >> { %v2767_v31 = vmul.f32 -1.442695, %v1040_v49  ;;  %v1056_v52 = vcombine.high %v1055_v54, %v1055_v54 }
 0x284   : >> { %3079 = vpow2.f32 %v2766_v47  ;;  %v996_v47 = vadd.f32 %v2892_v35, %v4667_v1 }
 0x285   : >> { %3081 = vpow2.f32 %v2764_v60  ;;  %v1059_v60 = vrot.slane %v1009_v45, 4 }
 0x28a   : >> { %v3078_v39 = vpop.eup %3077 }
 0x28b   : >> { %v983_v30 = vadd.f32 1.0, %v3078_v39 }
 0x28d   : >> { %3083 = vrcp.f32 %v983_v30 }
 0x28e   : >> { %v3080_v48 = vpop.eup %3079 }
 0x28f   : >> { %v1024_v56 = vadd.f32 1.0, %v3080_v48  ;;  %v3082_v46 = vpop.eup %3081 }
 0x290   : >> { %v993_v30 = vadd.f32 1.0, %v3082_v46 }
 0x291   : >> { %3085 = vrcp.f32 %v1024_v56 }
 0x292   : >> { %3087 = vpow2.f32 %v2767_v31 }
 0x297   : >> { %v3084_v50 = vpop.eup %3083 }
 0x298   : >> { %v997_v13 = vmul.f32 %v3084_v50, %v996_v47 }
 0x29a   : >> { %v1000_v51 = vadd.f32 %v998_v43, %v997_v13 }
 0x29b   : >> { %v3086_v37 = vpop.eup %3085 }
 0x29c   : >> { %3089 = vtanh.f32 %v1000_v51  ;;  %v1058_v39 = vmul.f32 %v3086_v37, %v1056_v52  ;;  %v3088_v33 = vpop.eup %3087 }
 0x29d   : >> { %3091 = vrcp.f32 %v993_v30  ;;  %v1044_v41 = vadd.f32 1.0, %v3088_v33 }
 0x29e   : >> { %v1061_v15 = vadd.f32 %v1059_v60, %v1058_v39 }
 0x2a0   : >> { %3093 = vtanh.f32 %v1061_v15 }
 0x2a1   : >> { %3095 = vrcp.f32 %v1044_v41 }
 0x2a6   : >> { %v3090_v48 = vpop.eup %3089 }
 0x2a7   : >> { %v1002_v35 = vsub.f32 %v3977_v29, %v3090_v48  ;;  %v3092_v56 = vpop.eup %3091 }
 0x2a9   : >> { %v1003_v49 = vmul.f32 %v3092_v56, %v1002_v35  ;;  %v4679_v35 = vld [vmem:[#allocation70_spill] sm:$0xff]  ;;  %v4680_v56 = vld [vmem:[#allocation71_spill] sm:$0xff] }
 0x2aa   : >> { %v3094_v3 = vpop.eup %3093 }
 0x2ab   : >> { %v1004_v45 = vadd.f32 %v3090_v48, %v1003_v49  ;;  %v1064_v31 = vcombine.low %v3094_v3, %v3094_v3  ;;  %v3096_v50 = vpop.eup %3095  ;;  %v4681_v49 = vld [vmem:[#allocation72_spill] sm:$0xff] }
 0x2ad   : >> { %1005 = vst [vmem:[#allocation2] sm:$0x3] %v1004_v45  ;;  %v1071_v46 = vrot.slane %v1064_v31, %v3964_v58  ;;  %v4683_v45 = vld [vmem:[#allocation74_spill] sm:$0xff]  ;;  %v4684_v31 = vld [vmem:[#allocation75_spill] sm:$0xff] }
 0x2af   : >> { %v1073_v43 = vsub.f32 %v3982_v32, %v1071_v46  ;;  %v4685_v46 = vld [vmem:[#allocation76_spill] sm:$0xff] }
 0x2b1   : >> { %v1081_v47 = vrot.slane %v1073_v43, %v3964_v58  ;;  %v4686_v43 = vld [vmem:[#allocation77_spill] sm:$0xff] }
 0x2b3   : >> { %v1082_v54 = vcombine.high %v1081_v47, %v1081_v47  ;;  %v4687_v47 = vld [vmem:[#allocation78_spill] sm:$0xff] }
 0x2b4   : >> { %v4052_v29 = vld [vmem:[#allocation2] sm:$0x3] }
 0x2b5   : >> { %v1084_v13 = vmul.f32 %v3096_v50, %v1082_v54  ;;  %v1101_v60 = vpack.c.bf16 %v4052_v29, %v4052_v29  ;;  %v4688_v54 = vld [vmem:[#allocation79_spill] sm:$0xff]  ;;  %v4689_v50 = vld [vmem:[#allocation80_spill] sm:$0xff] }
 0x2b7   : >> { %v1085_v30 = vadd.f32 %v3094_v3, %v1084_v13  ;;  %2770 = vst [vmem:[%s3954_s17 + $0x2] sm:$0x1] %v1101_v60  ;;  %v4682_v3 = vld [vmem:[#allocation73_spill] sm:$0xff]  ;;  %v2774_v60 = vld [vmem:[%s3959_s21 + $0xc] sm:$0x3f] }
 0x2b8   : >> { %v4690_v13 = vld [vmem:[#allocation69_spill] sm:$0xff] }
 0x2b9   : >> { %v1087_v51 = vcombine.low %v1085_v30, %v1085_v30 }
 0x2bb   : >> { %2768 = vst.sshfl [vmem:[#allocation2 + $0x4] sm:$0x30 pattern:$0x76325410] %v1087_v51 }
 0x2c2   : >> { %v1124_v52 = vld [vmem:[#allocation2] sm:$0xff] }
 0x2c3   : >> { %v4057_v37 = vld [vmem:[#allocation2 + $0x4] sm:$0xc]  ;;  %v1126_v32 = vcombine.high %v1124_v52, %v1124_v52  ;;  %v1128_v48 = vpack.c.bf16 %v1124_v52, %v1124_v52 }
 0x2c4   : >> { %v1104_v39 = vpack.c.bf16 %v4057_v37, %v4057_v37 }
 0x2c5   : >> { %v1129_v15 = vpack.c.bf16 %v1126_v32, %v1126_v32 }
 0x2c6   : >> { %v1112_v33 = vrot.slane %v1104_v39, %v3736_v40 }
 0x2c7   : >> { %1162 = vmatprep.mubr.bf16.mxu0 %v1129_v15  ;;  %1203 = vmatprep.mubr.bf16.mxu1 %v1129_v15 }
 0x2c8   : >> { %v1113_v41 = vcombine.high %v1112_v33, %v1112_v33  ;;  %1163 = vmatmul.mubr.bf16.vlgmr.msra.gmra.mrb[8].mxu0 %v1128_v48  ;;  %1204 = vmatmul.mubr.bf16.vlgmr.msra.gmra.mrb[8].mxu1 %v1128_v48  ;;  %v1245_v33 = vld [vmem:[%s1244_s9] sm:$0x3f] }
 0x2c9   : >> { %1367 = vmatpush1.bf16.msra.mxu1 %v3637_v59  ;;  %2919 = vmatpush3.bf16.msra.mxu0 %v3667_v5 }
 0x2ca   : >> { %2771 = vst.sshfl [vmem:[%s1122_s6] sm:$0x1 pattern:$0x73625140] %v1113_v41  ;;  %1368 = vmatprep.subr.bf16.mxu1 %v3641_v57  ;;  %2920 = vmatprep.subr.bf16.mxu0 %v3671_v7  ;;  %s2042_s6 = ssub.s32 81, %s3728_s12 }
 0x2cb   : >> { %s2066_s7 = scalar_lea.vmem %s3284_s30, %s2042_s6  ;;  %s2850_s9 = smul.u32 6, %s2042_s6 }
 0x2cd   : >> { %1369 = vmatpush1.bf16.msra.mxu1 %v3647_v61  ;;  %2921 = vmatpush3.bf16.msra.mxu0 %v3682_v9  ;;  %s2188_s13 = scalar_lea.vmem %s3294_s11, %s2850_s9 }
 0x2ce   : >> { %1370 = vmatprep.subr.bf16.mxu1 %v3652_v53  ;;  %2922 = vmatprep.subr.bf16.mxu0 %v3689_v4 }
 0x2d1   : >> { %1371 = vmatpush1.bf16.msra.mxu1 %v3663_v55  ;;  %2923 = vmatpush3.bf16.msra.mxu0 %v3704_v8 }
 0x2d2   : >> { %1372 = vmatprep.subr.bf16.mxu1 %v3676_v34  ;;  %2924 = vmatprep.subr.bf16.mxu0 %v3709_v2 }
 0x2d5   : >> { %1373 = vmatpush1.bf16.msra.mxu1 %v3694_v11  ;;  %2925 = vmatpush3.bf16.msra.mxu0 %v3733_v17 }
 0x2d6   : >> { %1374 = vmatprep.subr.bf16.mxu1 %v3699_v6  ;;  %2926 = vmatprep.subr.bf16.mxu0 %v3741_v42 }
 0x2d9   : >> { %1375 = vmatpush1.bf16.msra.mxu1 %v3716_v10  ;;  %2927 = vmatpush3.bf16.msra.mxu0 %v3761_v14 }
 0x2da   : >> { %1376 = vmatprep.subr.bf16.mxu1 %v3725_v36  ;;  %2928 = vmatprep.subr.bf16.mxu0 %v3766_v12 }
 0x2dd   : >> { %1377 = vmatpush1.bf16.msra.mxu1 %v3746_v19  ;;  %2929 = vmatpush3.bf16.msra.mxu0 %v3781_v44 }
 0x2de   : >> { %1378 = vmatprep.subr.bf16.mxu1 %v3753_v38  ;;  %2930 = vmatprep.subr.bf16.mxu0 %v3786_v20 }
 0x2e1   : >> { %1379 = vmatpush1.bf16.msra.mxu1 %v3771_v21  ;;  %2931 = vmatpush3.bf16.msra.mxu0 %v3801_v22 }
 0x2e2   : >> { %1380 = vmatprep.subr.bf16.mxu1 %v3776_v18  ;;  %2932 = vmatprep.subr.bf16.mxu0 %v3806_v24 }
 0x2e5   : >> { %1381 = vmatpush1.bf16.msra.mxu1 %v3791_v16  ;;  %2933 = vmatpush3.bf16.msra.mxu0 %v3821_v26 }
 0x2e6   : >> { %1382 = vmatprep.subr.bf16.mxu1 %v3796_v23  ;;  %1602 = vmatprep.subr.bf16.mxu0 %v3633_v63 }
 0x2e9   : >> { %1383 = vmatpush1.bf16.msra.mxu1 %v3811_v25 }
 0x2ea   : >> { %1384 = vmatprep.subr.bf16.mxu1 %v3816_v27 }
 0x2ed   : >> { %1385 = vmatpush1.bf16.msra.mxu1 %v3827_v0 }
 0x2ee   : >> { %1386 = vmatprep.subr.bf16.mxu1 %v3832_v28 }
 0x2f1   : >> { %1387 = vmatpush1.bf16.msra.mxu1 %v4679_v35 }
 0x2f2   : >> { %1388 = vmatprep.subr.bf16.mxu1 %v4680_v56 }
 0x2f5   : >> { %1389 = vmatpush1.bf16.msra.mxu1 %v4681_v49 }
 0x2f6   : >> { %1390 = vmatprep.subr.bf16.mxu1 %v4682_v3 }
 0x2f9   : >> { %1391 = vmatpush1.bf16.msra.mxu1 %v4683_v45 }
 0x2fa   : >> { %1392 = vmatprep.subr.bf16.mxu1 %v4684_v31  ;;  %v1223_v31 = vrot.slane %v2774_v60, 2 }
 0x2fd   : >> { %1393 = vmatpush1.bf16.msra.mxu1 %v4685_v46 }
 0x2fe   : >> { %1394 = vmatprep.subr.bf16.mxu1 %v4686_v43 }
 0x301   : >> { %1395 = vmatpush1.bf16.msra.mxu1 %v4687_v47 }
 0x302   : >> { %1396 = vmatprep.subr.bf16.mxu1 %v4688_v54 }
 0x305   : >> { %1397 = vmatpush1.bf16.msra.mxu1 %v4689_v50 }
 0x306   : >> { %2940 = vmatprep.subr.bf16.mxu1 %v4690_v13 }
 0x39b   : >> { %v1164_v30 = vpop.f32.mrb[8].mxu0  ;;  %v2912_v51 = vpop.f32.mrb[8].mxu1 }
 0x39c   : >> { %v1215_v52 = vadd.f32 %v2774_v60, %v1164_v30  ;;  %v1253_v32 = vrot.slane %v1164_v30, %v3964_v58  ;;  %v1166_v39 = vpop.f32.mrb[9].mxu0  ;;  %v2913_v15 = vpop.f32.mrb[9].mxu1 }
 0x39d   : >> { %v2914_v48 = vadd.f32 %v2913_v15, %v2912_v51  ;;  %v1168_v41 = vpop.f32.mrb[10].mxu0  ;;  %v2915_v47 = vpop.f32.mrb[10].mxu1  ;;  %v1225_v3 = vadd.f32 %v1223_v31, %v1166_v39  ;;  %v1273_v56 = vrot.slane %v1166_v39, %v3964_v58  ;;  %v1264_v51 = vrot.slane %v1245_v33, 2 }
 0x39e   : >> { %v2775_v54 = vmul.f32 -1.442695, %v1215_v52  ;;  %v1254_v43 = vcombine.high %v1253_v32, %v1253_v32  ;;  %v1169_v50 = vpop.f32.mrb[11].mxu0  ;;  %v2916_v46 = vpop.f32.mrb[11].mxu1 }
 0x39f   : >> { %v2776_v49 = vmul.f32 -1.442695, %v1225_v3  ;;  %v1274_v15 = vcombine.high %v1273_v56, %v1273_v56  ;;  %v1283_v46 = vadd.f32 %v2914_v48, %v4666_v62 }
 0x3a0   : >> { %3097 = vpow2.f32 %v2775_v54  ;;  %v1256_v13 = vadd.f32 %v1254_v43, %v1245_v33 }
 0x3a1   : >> { %v1276_v50 = vadd.f32 %v1274_v15, %v1264_v51  ;;  %v1291_v3 = vrot.slane %v1283_v46, %v3964_v58 }
 0x3a2   : >> { %v2778_v45 = vmul.f32 -1.442695, %v1256_v13  ;;  %v1234_v13 = vrot.slane %v2774_v60, 4 }
 0x3a3   : >> { %v2779_v43 = vmul.f32 -1.442695, %v1276_v50  ;;  %v1292_v56 = vcombine.high %v1291_v3, %v1291_v3 }
 0x3a4   : >> { %3099 = vpow2.f32 %v2778_v45  ;;  %v1232_v45 = vadd.f32 %v2914_v48, %v4667_v1 }
 0x3a5   : >> { %3101 = vpow2.f32 %v2776_v49  ;;  %v1295_v49 = vrot.slane %v1245_v33, 4 }
 0x3aa   : >> { %v3098_v30 = vpop.eup %3097 }
 0x3ab   : >> { %v1219_v35 = vadd.f32 1.0, %v3098_v30 }
 0x3ad   : >> { %3103 = vrcp.f32 %v1219_v35 }
 0x3ae   : >> { %v3100_v47 = vpop.eup %3099 }
 0x3af   : >> { %v1260_v52 = vadd.f32 1.0, %v3100_v47  ;;  %v3102_v54 = vpop.eup %3101 }
 0x3b0   : >> { %v1229_v35 = vadd.f32 1.0, %v3102_v54 }
 0x3b1   : >> { %3105 = vrcp.f32 %v1260_v52 }
 0x3b2   : >> { %3107 = vpow2.f32 %v2779_v43 }
 0x3b7   : >> { %v3104_v31 = vpop.eup %3103 }
 0x3b8   : >> { %v1233_v32 = vmul.f32 %v3104_v31, %v1232_v45 }
 0x3ba   : >> { %v1236_v39 = vadd.f32 %v1234_v13, %v1233_v32 }
 0x3bb   : >> { %v3106_v41 = vpop.eup %3105 }
 0x3bc   : >> { %3109 = vtanh.f32 %v1236_v39  ;;  %v1294_v30 = vmul.f32 %v3106_v41, %v1292_v56  ;;  %v3108_v15 = vpop.eup %3107 }
 0x3bd   : >> { %3111 = vrcp.f32 %v1229_v35  ;;  %v1280_v60 = vadd.f32 1.0, %v3108_v15 }
 0x3be   : >> { %v1297_v51 = vadd.f32 %v1295_v49, %v1294_v30 }
 0x3c0   : >> { %3113 = vtanh.f32 %v1297_v51 }
 0x3c1   : >> { %3115 = vrcp.f32 %v1280_v60 }
 0x3c6   : >> { %v3110_v47 = vpop.eup %3109 }
 0x3c7   : >> { %v1238_v48 = vsub.f32 %v4052_v29, %v3110_v47  ;;  %v3112_v52 = vpop.eup %3111 }
 0x3c9   : >> { %v1239_v50 = vmul.f32 %v3112_v52, %v1238_v48  ;;  %v4691_v48 = vld [vmem:[#allocation70_spill] sm:$0xff]  ;;  %v4692_v52 = vld [vmem:[#allocation71_spill] sm:$0xff] }
 0x3ca   : >> { %v3114_v46 = vpop.eup %3113 }
 0x3cb   : >> { %v1240_v33 = vadd.f32 %v3110_v47, %v1239_v50  ;;  %v1300_v43 = vcombine.low %v3114_v46, %v3114_v46  ;;  %v3116_v31 = vpop.eup %3115  ;;  %v4693_v50 = vld [vmem:[#allocation72_spill] sm:$0xff] }
 0x3cd   : >> { %1241 = vst [vmem:[#allocation2] sm:$0x3] %v1240_v33  ;;  %v1307_v54 = vrot.slane %v1300_v43, %v3964_v58  ;;  %v4695_v33 = vld [vmem:[#allocation74_spill] sm:$0xff]  ;;  %v4696_v43 = vld [vmem:[#allocation75_spill] sm:$0xff] }
 0x3cf   : >> { %v1309_v13 = vsub.f32 %v4057_v37, %v1307_v54  ;;  %v4697_v54 = vld [vmem:[#allocation76_spill] sm:$0xff] }
 0x3d1   : >> { %v1317_v45 = vrot.slane %v1309_v13, %v3964_v58  ;;  %v4698_v13 = vld [vmem:[#allocation77_spill] sm:$0xff] }
 0x3d3   : >> { %v1318_v3 = vcombine.high %v1317_v45, %v1317_v45  ;;  %v4699_v45 = vld [vmem:[#allocation78_spill] sm:$0xff] }
 0x3d4   : >> { %v4127_v29 = vld [vmem:[#allocation2] sm:$0x3] }
 0x3d5   : >> { %v1320_v32 = vmul.f32 %v3116_v31, %v1318_v3  ;;  %v1337_v49 = vpack.c.bf16 %v4127_v29, %v4127_v29  ;;  %v4700_v3 = vld [vmem:[#allocation79_spill] sm:$0xff]  ;;  %v4701_v31 = vld [vmem:[#allocation80_spill] sm:$0xff] }
 0x3d7   : >> { %v1321_v35 = vadd.f32 %v3114_v46, %v1320_v32  ;;  %2782 = vst [vmem:[%s3954_s17 + $0x3] sm:$0x1] %v1337_v49  ;;  %v4694_v46 = vld [vmem:[#allocation73_spill] sm:$0xff]  ;;  %v2786_v49 = vld [vmem:[%s3959_s21 + $0x12] sm:$0x3f] }
 0x3d8   : >> { %v4702_v32 = vld [vmem:[#allocation69_spill] sm:$0xff] }
 0x3d9   : >> { %v1323_v39 = vcombine.low %v1321_v35, %v1321_v35 }
 0x3db   : >> { %2780 = vst.sshfl [vmem:[#allocation2 + $0x4] sm:$0x30 pattern:$0x76325410] %v1323_v39 }
 0x3e2   : >> { %v1360_v56 = vld [vmem:[#allocation2] sm:$0xff] }
 0x3e3   : >> { %v4132_v41 = vld [vmem:[#allocation2 + $0x4] sm:$0xc]  ;;  %v1362_v37 = vcombine.high %v1360_v56, %v1360_v56  ;;  %v1364_v47 = vpack.c.bf16 %v1360_v56, %v1360_v56 }
 0x3e4   : >> { %v1340_v30 = vpack.c.bf16 %v4132_v41, %v4132_v41 }
 0x3e5   : >> { %v1365_v51 = vpack.c.bf16 %v1362_v37, %v1362_v37 }
 0x3e6   : >> { %v1348_v15 = vrot.slane %v1340_v30, %v3736_v40 }
 0x3e7   : >> { %1398 = vmatprep.mubr.bf16.mxu1 %v1365_v51  ;;  %1439 = vmatprep.mubr.bf16.mxu0 %v1365_v51 }
 0x3e8   : >> { %v1349_v60 = vcombine.high %v1348_v15, %v1348_v15  ;;  %1399 = vmatmul.mubr.bf16.vlgmr.msra.gmra.mrb[12].mxu1 %v1364_v47  ;;  %1440 = vmatmul.mubr.bf16.vlgmr.msra.gmra.mrb[12].mxu0 %v1364_v47  ;;  %v1481_v15 = vld [vmem:[%s1480_s16] sm:$0x3f] }
 0x3e9   : >> { %1603 = vmatpush1.bf16.msra.mxu0 %v3637_v59  ;;  %2941 = vmatpush3.bf16.msra.mxu1 %v3667_v5 }
 0x3ea   : >> { %2783 = vst.sshfl [vmem:[%s1358_s14] sm:$0x1 pattern:$0x73625140] %v1349_v60  ;;  %1604 = vmatprep.subr.bf16.mxu0 %v3641_v57  ;;  %2942 = vmatprep.subr.bf16.mxu1 %v3671_v7  ;;  %s2278_s14 = ssub.s32 80, %s3728_s12 }
 0x3eb   : >> { %s2302_s15 = scalar_lea.vmem %s3284_s30, %s2278_s14 }
 0x3ed   : >> { %1605 = vmatpush1.bf16.msra.mxu0 %v3647_v61  ;;  %2943 = vmatpush3.bf16.msra.mxu1 %v3682_v9 }
 0x3ee   : >> { %1606 = vmatprep.subr.bf16.mxu0 %v3652_v53  ;;  %2944 = vmatprep.subr.bf16.mxu1 %v3689_v4 }
 0x3f1   : >> { %1607 = vmatpush1.bf16.msra.mxu0 %v3663_v55  ;;  %2945 = vmatpush3.bf16.msra.mxu1 %v3704_v8 }
 0x3f2   : >> { %1608 = vmatprep.subr.bf16.mxu0 %v3676_v34  ;;  %2946 = vmatprep.subr.bf16.mxu1 %v3709_v2 }
 0x3f5   : >> { %1609 = vmatpush1.bf16.msra.mxu0 %v3694_v11  ;;  %2947 = vmatpush3.bf16.msra.mxu1 %v3733_v17 }
 0x3f6   : >> { %1610 = vmatprep.subr.bf16.mxu0 %v3699_v6  ;;  %2948 = vmatprep.subr.bf16.mxu1 %v3741_v42 }
 0x3f9   : >> { %1611 = vmatpush1.bf16.msra.mxu0 %v3716_v10  ;;  %2949 = vmatpush3.bf16.msra.mxu1 %v3761_v14 }
 0x3fa   : >> { %1612 = vmatprep.subr.bf16.mxu0 %v3725_v36  ;;  %2950 = vmatprep.subr.bf16.mxu1 %v3766_v12 }
 0x3fd   : >> { %1613 = vmatpush1.bf16.msra.mxu0 %v3746_v19  ;;  %2951 = vmatpush3.bf16.msra.mxu1 %v3781_v44 }
 0x3fe   : >> { %1614 = vmatprep.subr.bf16.mxu0 %v3753_v38  ;;  %2952 = vmatprep.subr.bf16.mxu1 %v3786_v20 }
 0x401   : >> { %1615 = vmatpush1.bf16.msra.mxu0 %v3771_v21  ;;  %2953 = vmatpush3.bf16.msra.mxu1 %v3801_v22 }
 0x402   : >> { %1616 = vmatprep.subr.bf16.mxu0 %v3776_v18  ;;  %2954 = vmatprep.subr.bf16.mxu1 %v3806_v24 }
 0x405   : >> { %1617 = vmatpush1.bf16.msra.mxu0 %v3791_v16  ;;  %2955 = vmatpush3.bf16.msra.mxu1 %v3821_v26 }
 0x406   : >> { %1618 = vmatprep.subr.bf16.mxu0 %v3796_v23  ;;  %1838 = vmatprep.subr.bf16.mxu1 %v3633_v63 }
 0x409   : >> { %1619 = vmatpush1.bf16.msra.mxu0 %v3811_v25 }
 0x40a   : >> { %1620 = vmatprep.subr.bf16.mxu0 %v3816_v27 }
 0x40d   : >> { %1621 = vmatpush1.bf16.msra.mxu0 %v3827_v0 }
 0x40e   : >> { %1622 = vmatprep.subr.bf16.mxu0 %v3832_v28 }
 0x411   : >> { %1623 = vmatpush1.bf16.msra.mxu0 %v4691_v48 }
 0x412   : >> { %1624 = vmatprep.subr.bf16.mxu0 %v4692_v52 }
 0x415   : >> { %1625 = vmatpush1.bf16.msra.mxu0 %v4693_v50 }
 0x416   : >> { %1626 = vmatprep.subr.bf16.mxu0 %v4694_v46 }
 0x419   : >> { %1627 = vmatpush1.bf16.msra.mxu0 %v4695_v33 }
 0x41a   : >> { %1628 = vmatprep.subr.bf16.mxu0 %v4696_v43  ;;  %v1459_v43 = vrot.slane %v2786_v49, 2 }
 0x41d   : >> { %1629 = vmatpush1.bf16.msra.mxu0 %v4697_v54 }
 0x41e   : >> { %1630 = vmatprep.subr.bf16.mxu0 %v4698_v13 }
 0x421   : >> { %1631 = vmatpush1.bf16.msra.mxu0 %v4699_v45 }
 0x422   : >> { %1632 = vmatprep.subr.bf16.mxu0 %v4700_v3 }
 0x425   : >> { %1633 = vmatpush1.bf16.msra.mxu0 %v4701_v31 }
 0x426   : >> { %2962 = vmatprep.subr.bf16.mxu0 %v4702_v32 }
 0x4bb   : >> { %v1400_v35 = vpop.f32.mrb[12].mxu1  ;;  %v2934_v39 = vpop.f32.mrb[12].mxu0 }
 0x4bc   : >> { %v1451_v56 = vadd.f32 %v2786_v49, %v1400_v35  ;;  %v1489_v37 = vrot.slane %v1400_v35, %v3964_v58  ;;  %v1402_v30 = vpop.f32.mrb[13].mxu1  ;;  %v2935_v51 = vpop.f32.mrb[13].mxu0 }
 0x4bd   : >> { %v2936_v47 = vadd.f32 %v2935_v51, %v2934_v39  ;;  %v1404_v60 = vpop.f32.mrb[14].mxu1  ;;  %v2937_v45 = vpop.f32.mrb[14].mxu0  ;;  %v1461_v46 = vadd.f32 %v1459_v43, %v1402_v30  ;;  %v1509_v52 = vrot.slane %v1402_v30, %v3964_v58  ;;  %v1500_v39 = vrot.slane %v1481_v15, 2 }
 0x4be   : >> { %v2787_v3 = vmul.f32 -1.442695, %v1451_v56  ;;  %v1490_v13 = vcombine.high %v1489_v37, %v1489_v37  ;;  %v1405_v31 = vpop.f32.mrb[15].mxu1  ;;  %v2938_v54 = vpop.f32.mrb[15].mxu0 }
 0x4bf   : >> { %v2788_v50 = vmul.f32 -1.442695, %v1461_v46  ;;  %v1510_v51 = vcombine.high %v1509_v52, %v1509_v52  ;;  %v1519_v54 = vadd.f32 %v2936_v47, %v4666_v62 }
 0x4c0   : >> { %3117 = vpow2.f32 %v2787_v3  ;;  %v1492_v32 = vadd.f32 %v1490_v13, %v1481_v15 }
 0x4c1   : >> { %v1512_v31 = vadd.f32 %v1510_v51, %v1500_v39  ;;  %v1527_v46 = vrot.slane %v1519_v54, %v3964_v58 }
 0x4c2   : >> { %v2790_v33 = vmul.f32 -1.442695, %v1492_v32  ;;  %v1470_v32 = vrot.slane %v2786_v49, 4 }
 0x4c3   : >> { %v2791_v13 = vmul.f32 -1.442695, %v1512_v31  ;;  %v1528_v52 = vcombine.high %v1527_v46, %v1527_v46 }
 0x4c4   : >> { %3119 = vpow2.f32 %v2790_v33  ;;  %v1468_v33 = vadd.f32 %v2936_v47, %v4667_v1 }
 0x4c5   : >> { %3121 = vpow2.f32 %v2788_v50  ;;  %v1531_v50 = vrot.slane %v1481_v15, 4 }
 0x4ca   : >> { %v3118_v35 = vpop.eup %3117 }
 0x4cb   : >> { %v1455_v48 = vadd.f32 1.0, %v3118_v35 }
 0x4cd   : >> { %3123 = vrcp.f32 %v1455_v48 }
 0x4ce   : >> { %v3120_v45 = vpop.eup %3119 }
 0x4cf   : >> { %v1496_v56 = vadd.f32 1.0, %v3120_v45  ;;  %v3122_v3 = vpop.eup %3121 }
 0x4d0   : >> { %v1465_v48 = vadd.f32 1.0, %v3122_v3 }
 0x4d1   : >> { %3125 = vrcp.f32 %v1496_v56 }
 0x4d2   : >> { %3127 = vpow2.f32 %v2791_v13 }
 0x4d7   : >> { %v3124_v43 = vpop.eup %3123 }
 0x4d8   : >> { %v1469_v37 = vmul.f32 %v3124_v43, %v1468_v33 }
 0x4da   : >> { %v1472_v30 = vadd.f32 %v1470_v32, %v1469_v37 }
 0x4db   : >> { %v3126_v60 = vpop.eup %3125 }
 0x4dc   : >> { %3129 = vtanh.f32 %v1472_v30  ;;  %v1530_v35 = vmul.f32 %v3126_v60, %v1528_v52  ;;  %v3128_v51 = vpop.eup %3127 }
 0x4dd   : >> { %3131 = vrcp.f32 %v1465_v48  ;;  %v1516_v49 = vadd.f32 1.0, %v3128_v51 }
 0x4de   : >> { %v1533_v39 = vadd.f32 %v1531_v50, %v1530_v35 }
 0x4e0   : >> { %3133 = vtanh.f32 %v1533_v39 }
 0x4e1   : >> { %3135 = vrcp.f32 %v1516_v49 }
 0x4e6   : >> { %v3130_v45 = vpop.eup %3129 }
 0x4e7   : >> { %v1474_v47 = vsub.f32 %v4127_v29, %v3130_v45  ;;  %v3132_v56 = vpop.eup %3131 }
 0x4e9   : >> { %v1475_v31 = vmul.f32 %v3132_v56, %v1474_v47  ;;  %v4703_v47 = vld [vmem:[#allocation70_spill] sm:$0xff]  ;;  %v4704_v56 = vld [vmem:[#allocation71_spill] sm:$0xff] }
 0x4ea   : >> { %v3134_v54 = vpop.eup %3133 }
 0x4eb   : >> { %v1476_v15 = vadd.f32 %v3130_v45, %v1475_v31  ;;  %v1536_v13 = vcombine.low %v3134_v54, %v3134_v54  ;;  %v3136_v43 = vpop.eup %3135  ;;  %v4705_v31 = vld [vmem:[#allocation72_spill] sm:$0xff] }
 0x4ed   : >> { %1477 = vst [vmem:[#allocation2] sm:$0x3] %v1476_v15  ;;  %v1543_v3 = vrot.slane %v1536_v13, %v3964_v58  ;;  %v4707_v15 = vld [vmem:[#allocation74_spill] sm:$0xff]  ;;  %v4708_v13 = vld [vmem:[#allocation75_spill] sm:$0xff] }
 0x4ef   : >> { %v1545_v32 = vsub.f32 %v4132_v41, %v1543_v3  ;;  %v4709_v3 = vld [vmem:[#allocation76_spill] sm:$0xff] }
 0x4f1   : >> { %v1553_v33 = vrot.slane %v1545_v32, %v3964_v58  ;;  %v4710_v32 = vld [vmem:[#allocation77_spill] sm:$0xff] }
 0x4f3   : >> { %v1554_v46 = vcombine.high %v1553_v33, %v1553_v33  ;;  %v4711_v33 = vld [vmem:[#allocation78_spill] sm:$0xff] }
 0x4f4   : >> { %v4202_v29 = vld [vmem:[#allocation2] sm:$0x3] }
 0x4f5   : >> { %v1556_v37 = vmul.f32 %v3136_v43, %v1554_v46  ;;  %v1573_v50 = vpack.c.bf16 %v4202_v29, %v4202_v29  ;;  %v4712_v46 = vld [vmem:[#allocation79_spill] sm:$0xff]  ;;  %v4713_v43 = vld [vmem:[#allocation80_spill] sm:$0xff] }
 0x4f7   : >> { %v1557_v48 = vadd.f32 %v3134_v54, %v1556_v37  ;;  %2794 = vst [vmem:[%s3954_s17 + $0x4] sm:$0x1] %v1573_v50  ;;  %v4706_v54 = vld [vmem:[#allocation73_spill] sm:$0xff] }
 0x4f8   : >> { %v4714_v37 = vld [vmem:[#allocation69_spill] sm:$0xff] }
 0x4f9   : >> { %v1559_v30 = vcombine.low %v1557_v48, %v1557_v48  ;;  %v2798_v50 = vld [vmem:[%s3959_s21 + $0x18] sm:$0x3f] }
 0x4fb   : >> { %2792 = vst.sshfl [vmem:[#allocation2 + $0x4] sm:$0x30 pattern:$0x76325410] %v1559_v30 }
 0x502   : >> { %v1596_v52 = vld [vmem:[#allocation2] sm:$0xff] }
 0x503   : >> { %v4207_v60 = vld [vmem:[#allocation2 + $0x4] sm:$0xc]  ;;  %v1598_v41 = vcombine.high %v1596_v52, %v1596_v52  ;;  %v1600_v45 = vpack.c.bf16 %v1596_v52, %v1596_v52 }
 0x504   : >> { %v1576_v35 = vpack.c.bf16 %v4207_v60, %v4207_v60 }
 0x505   : >> { %v1601_v39 = vpack.c.bf16 %v1598_v41, %v1598_v41 }
 0x506   : >> { %v1584_v51 = vrot.slane %v1576_v35, %v3736_v40 }
 0x507   : >> { %1634 = vmatprep.mubr.bf16.mxu0 %v1601_v39  ;;  %1675 = vmatprep.mubr.bf16.mxu1 %v1601_v39 }
 0x508   : >> { %v1585_v49 = vcombine.high %v1584_v51, %v1584_v51  ;;  %1635 = vmatmul.mubr.bf16.vlgmr.msra.gmra.mrb[16].mxu0 %v1600_v45  ;;  %1676 = vmatmul.mubr.bf16.vlgmr.msra.gmra.mrb[16].mxu1 %v1600_v45  ;;  %v1717_v51 = vld [vmem:[%s1716_s24] sm:$0x3f] }
 0x509   : >> { %1839 = vmatpush1.bf16.msra.mxu1 %v3637_v59  ;;  %2963 = vmatpush3.bf16.msra.mxu0 %v3667_v5 }
 0x50a   : >> { %2795 = vst.sshfl [vmem:[%s1594_s22] sm:$0x1 pattern:$0x73625140] %v1585_v49  ;;  %1840 = vmatprep.subr.bf16.mxu1 %v3641_v57  ;;  %2964 = vmatprep.subr.bf16.mxu0 %v3671_v7 }
 0x50d   : >> { %1841 = vmatpush1.bf16.msra.mxu1 %v3647_v61  ;;  %2965 = vmatpush3.bf16.msra.mxu0 %v3682_v9 }
 0x50e   : >> { %1842 = vmatprep.subr.bf16.mxu1 %v3652_v53  ;;  %2966 = vmatprep.subr.bf16.mxu0 %v3689_v4 }
 0x511   : >> { %1843 = vmatpush1.bf16.msra.mxu1 %v3663_v55  ;;  %2967 = vmatpush3.bf16.msra.mxu0 %v3704_v8 }
 0x512   : >> { %1844 = vmatprep.subr.bf16.mxu1 %v3676_v34  ;;  %2968 = vmatprep.subr.bf16.mxu0 %v3709_v2 }
 0x515   : >> { %1845 = vmatpush1.bf16.msra.mxu1 %v3694_v11  ;;  %2969 = vmatpush3.bf16.msra.mxu0 %v3733_v17 }
 0x516   : >> { %1846 = vmatprep.subr.bf16.mxu1 %v3699_v6  ;;  %2970 = vmatprep.subr.bf16.mxu0 %v3741_v42 }
 0x519   : >> { %1847 = vmatpush1.bf16.msra.mxu1 %v3716_v10  ;;  %2971 = vmatpush3.bf16.msra.mxu0 %v3761_v14 }
 0x51a   : >> { %1848 = vmatprep.subr.bf16.mxu1 %v3725_v36  ;;  %2972 = vmatprep.subr.bf16.mxu0 %v3766_v12 }
 0x51d   : >> { %1849 = vmatpush1.bf16.msra.mxu1 %v3746_v19  ;;  %2973 = vmatpush3.bf16.msra.mxu0 %v3781_v44 }
 0x51e   : >> { %1850 = vmatprep.subr.bf16.mxu1 %v3753_v38  ;;  %2974 = vmatprep.subr.bf16.mxu0 %v3786_v20 }
 0x521   : >> { %1851 = vmatpush1.bf16.msra.mxu1 %v3771_v21  ;;  %2975 = vmatpush3.bf16.msra.mxu0 %v3801_v22 }
 0x522   : >> { %1852 = vmatprep.subr.bf16.mxu1 %v3776_v18  ;;  %2976 = vmatprep.subr.bf16.mxu0 %v3806_v24 }
 0x525   : >> { %1853 = vmatpush1.bf16.msra.mxu1 %v3791_v16  ;;  %2977 = vmatpush3.bf16.msra.mxu0 %v3821_v26 }
 0x526   : >> { %1854 = vmatprep.subr.bf16.mxu1 %v3796_v23  ;;  %2074 = vmatprep.subr.bf16.mxu0 %v3633_v63 }
 0x529   : >> { %1855 = vmatpush1.bf16.msra.mxu1 %v3811_v25 }
 0x52a   : >> { %1856 = vmatprep.subr.bf16.mxu1 %v3816_v27 }
 0x52d   : >> { %1857 = vmatpush1.bf16.msra.mxu1 %v3827_v0 }
 0x52e   : >> { %1858 = vmatprep.subr.bf16.mxu1 %v3832_v28 }
 0x531   : >> { %1859 = vmatpush1.bf16.msra.mxu1 %v4703_v47 }
 0x532   : >> { %1860 = vmatprep.subr.bf16.mxu1 %v4704_v56 }
 0x535   : >> { %1861 = vmatpush1.bf16.msra.mxu1 %v4705_v31 }
 0x536   : >> { %1862 = vmatprep.subr.bf16.mxu1 %v4706_v54 }
 0x539   : >> { %1863 = vmatpush1.bf16.msra.mxu1 %v4707_v15 }
 0x53a   : >> { %1864 = vmatprep.subr.bf16.mxu1 %v4708_v13  ;;  %v1695_v13 = vrot.slane %v2798_v50, 2 }
 0x53d   : >> { %1865 = vmatpush1.bf16.msra.mxu1 %v4709_v3 }
 0x53e   : >> { %1866 = vmatprep.subr.bf16.mxu1 %v4710_v32 }
 0x541   : >> { %1867 = vmatpush1.bf16.msra.mxu1 %v4711_v33 }
 0x542   : >> { %1868 = vmatprep.subr.bf16.mxu1 %v4712_v46 }
 0x545   : >> { %1869 = vmatpush1.bf16.msra.mxu1 %v4713_v43 }
 0x546   : >> { %2984 = vmatprep.subr.bf16.mxu1 %v4714_v37 }
 0x5db   : >> { %v1636_v48 = vpop.f32.mrb[16].mxu0  ;;  %v2956_v30 = vpop.f32.mrb[16].mxu1 }
 0x5dc   : >> { %v1687_v52 = vadd.f32 %v2798_v50, %v1636_v48  ;;  %v1725_v41 = vrot.slane %v1636_v48, %v3964_v58  ;;  %v1638_v35 = vpop.f32.mrb[17].mxu0  ;;  %v2957_v39 = vpop.f32.mrb[17].mxu1 }
 0x5dd   : >> { %v2958_v45 = vadd.f32 %v2957_v39, %v2956_v30  ;;  %v1640_v49 = vpop.f32.mrb[18].mxu0  ;;  %v2959_v33 = vpop.f32.mrb[18].mxu1  ;;  %v1697_v54 = vadd.f32 %v1695_v13, %v1638_v35  ;;  %v1745_v56 = vrot.slane %v1638_v35, %v3964_v58  ;;  %v1736_v30 = vrot.slane %v1717_v51, 2 }
 0x5de   : >> { %v2799_v46 = vmul.f32 -1.442695, %v1687_v52  ;;  %v1726_v32 = vcombine.high %v1725_v41, %v1725_v41  ;;  %v1641_v43 = vpop.f32.mrb[19].mxu0  ;;  %v2960_v3 = vpop.f32.mrb[19].mxu1 }
 0x5df   : >> { %v2800_v31 = vmul.f32 -1.442695, %v1697_v54  ;;  %v1746_v39 = vcombine.high %v1745_v56, %v1745_v56  ;;  %v1755_v3 = vadd.f32 %v2958_v45, %v4666_v62 }
 0x5e0   : >> { %3137 = vpow2.f32 %v2799_v46  ;;  %v1728_v37 = vadd.f32 %v1726_v32, %v1717_v51 }
 0x5e1   : >> { %v1748_v43 = vadd.f32 %v1746_v39, %v1736_v30  ;;  %v1763_v54 = vrot.slane %v1755_v3, %v3964_v58 }
 0x5e2   : >> { %v2802_v15 = vmul.f32 -1.442695, %v1728_v37  ;;  %v1706_v37 = vrot.slane %v2798_v50, 4 }
 0x5e3   : >> { %v2803_v32 = vmul.f32 -1.442695, %v1748_v43  ;;  %v1764_v56 = vcombine.high %v1763_v54, %v1763_v54 }
 0x5e4   : >> { %3139 = vpow2.f32 %v2802_v15  ;;  %v1704_v15 = vadd.f32 %v2958_v45, %v4667_v1 }
 0x5e5   : >> { %3141 = vpow2.f32 %v2800_v31  ;;  %v1767_v31 = vrot.slane %v1717_v51, 4 }
 0x5ea   : >> { %v3138_v48 = vpop.eup %3137 }
 0x5eb   : >> { %v1691_v47 = vadd.f32 1.0, %v3138_v48 }
 0x5ed   : >> { %3143 = vrcp.f32 %v1691_v47 }
 0x5ee   : >> { %v3140_v33 = vpop.eup %3139 }
 0x5ef   : >> { %v1732_v52 = vadd.f32 1.0, %v3140_v33  ;;  %v3142_v46 = vpop.eup %3141 }
 0x5f0   : >> { %v1701_v47 = vadd.f32 1.0, %v3142_v46 }
 0x5f1   : >> { %3145 = vrcp.f32 %v1732_v52 }
 0x5f2   : >> { %3147 = vpow2.f32 %v2803_v32 }
 0x5f7   : >> { %v3144_v13 = vpop.eup %3143 }
 0x5f8   : >> { %v1705_v41 = vmul.f32 %v3144_v13, %v1704_v15 }
 0x5fa   : >> { %v1708_v35 = vadd.f32 %v1706_v37, %v1705_v41 }
 0x5fb   : >> { %v3146_v49 = vpop.eup %3145 }
 0x5fc   : >> { %3149 = vtanh.f32 %v1708_v35  ;;  %v1766_v48 = vmul.f32 %v3146_v49, %v1764_v56  ;;  %v3148_v39 = vpop.eup %3147 }
 0x5fd   : >> { %3151 = vrcp.f32 %v1701_v47  ;;  %v1752_v50 = vadd.f32 1.0, %v3148_v39 }
 0x5fe   : >> { %v1769_v30 = vadd.f32 %v1767_v31, %v1766_v48 }
 0x600   : >> { %3153 = vtanh.f32 %v1769_v30 }
 0x601   : >> { %3155 = vrcp.f32 %v1752_v50 }
 0x606   : >> { %v3150_v33 = vpop.eup %3149 }
 0x607   : >> { %v1710_v45 = vsub.f32 %v4202_v29, %v3150_v33  ;;  %v3152_v52 = vpop.eup %3151 }
 0x609   : >> { %v1711_v43 = vmul.f32 %v3152_v52, %v1710_v45  ;;  %v4715_v45 = vld [vmem:[#allocation70_spill] sm:$0xff]  ;;  %v4716_v52 = vld [vmem:[#allocation71_spill] sm:$0xff] }
 0x60a   : >> { %v3154_v3 = vpop.eup %3153 }
 0x60b   : >> { %v1712_v51 = vadd.f32 %v3150_v33, %v1711_v43  ;;  %v1772_v32 = vcombine.low %v3154_v3, %v3154_v3  ;;  %v3156_v13 = vpop.eup %3155  ;;  %v4717_v43 = vld [vmem:[#allocation72_spill] sm:$0xff] }
 0x60d   : >> { %v1779_v46 = vrot.slane %v1772_v32, %v3964_v58  ;;  %1713 = vst [vmem:[#allocation2] sm:$0x3] %v1712_v51  ;;  %v4720_v51 = vld [vmem:[#allocation75_spill] sm:$0xff]  ;;  %v4721_v32 = vld [vmem:[#allocation76_spill] sm:$0xff] }
 0x60f   : >> { %v1781_v37 = vsub.f32 %v4207_v60, %v1779_v46  ;;  %v4722_v46 = vld [vmem:[#allocation77_spill] sm:$0xff] }
 0x611   : >> { %v1789_v15 = vrot.slane %v1781_v37, %v3964_v58  ;;  %v4723_v37 = vld [vmem:[#allocation78_spill] sm:$0xff] }
 0x613   : >> { %v1790_v54 = vcombine.high %v1789_v15, %v1789_v15  ;;  %v4724_v15 = vld [vmem:[#allocation79_spill] sm:$0xff] }
 0x614   : >> { %v4277_v29 = vld [vmem:[#allocation2] sm:$0x3] }
 0x615   : >> { %v1792_v41 = vmul.f32 %v3156_v13, %v1790_v54  ;;  %v1809_v31 = vpack.c.bf16 %v4277_v29, %v4277_v29  ;;  %v4725_v54 = vld [vmem:[#allocation80_spill] sm:$0xff]  ;;  %v4726_v13 = vld [vmem:[#allocation69_spill] sm:$0xff] }
 0x617   : >> { %v1793_v47 = vadd.f32 %v3154_v3, %v1792_v41  ;;  %2806 = vst [vmem:[%s3954_s17 + $0x5] sm:$0x1] %v1809_v31  ;;  %v4718_v3 = vld [vmem:[#allocation73_spill] sm:$0xff] }
 0x618   : >> { %v2810_v41 = vld [vmem:[%s3959_s21 + $0x1e] sm:$0x3f] }
 0x619   : >> { %v1795_v35 = vcombine.low %v1793_v47, %v1793_v47 }
 0x61b   : >> { %2804 = vst.sshfl [vmem:[#allocation2 + $0x4] sm:$0x30 pattern:$0x76325410] %v1795_v35 }
 0x622   : >> { %v1832_v56 = vld [vmem:[#allocation2] sm:$0xff] }
 0x623   : >> { %v4282_v49 = vld [vmem:[#allocation2 + $0x4] sm:$0xc]  ;;  %v1834_v60 = vcombine.high %v1832_v56, %v1832_v56  ;;  %v1836_v33 = vpack.c.bf16 %v1832_v56, %v1832_v56 }
 0x624   : >> { %v1812_v48 = vpack.c.bf16 %v4282_v49, %v4282_v49 }
 0x625   : >> { %v1837_v30 = vpack.c.bf16 %v1834_v60, %v1834_v60 }
 0x626   : >> { %v1820_v39 = vrot.slane %v1812_v48, %v3736_v40 }
 0x627   : >> { %1870 = vmatprep.mubr.bf16.mxu1 %v1837_v30  ;;  %1911 = vmatprep.mubr.bf16.mxu0 %v1837_v30  ;;  %v1953_v30 = vld [vmem:[%s1952_s29] sm:$0x3f] }
 0x628   : >> { %v1821_v50 = vcombine.high %v1820_v39, %v1820_v39  ;;  %1871 = vmatmul.mubr.bf16.vlgmr.msra.gmra.mrb[20].mxu1 %v1836_v33  ;;  %1912 = vmatmul.mubr.bf16.vlgmr.msra.gmra.mrb[20].mxu0 %v1836_v33 }
 0x629   : >> { %2075 = vmatpush1.bf16.msra.mxu0 %v3637_v59  ;;  %2985 = vmatpush3.bf16.msra.mxu1 %v3667_v5 }
 0x62a   : >> { %2807 = vst.sshfl [vmem:[%s1830_s27] sm:$0x1 pattern:$0x73625140] %v1821_v50  ;;  %2076 = vmatprep.subr.bf16.mxu0 %v3641_v57  ;;  %2986 = vmatprep.subr.bf16.mxu1 %v3671_v7 }
 0x62d   : >> { %2077 = vmatpush1.bf16.msra.mxu0 %v3647_v61  ;;  %2987 = vmatpush3.bf16.msra.mxu1 %v3682_v9 }
 0x62e   : >> { %2078 = vmatprep.subr.bf16.mxu0 %v3652_v53  ;;  %2988 = vmatprep.subr.bf16.mxu1 %v3689_v4 }
 0x631   : >> { %2079 = vmatpush1.bf16.msra.mxu0 %v3663_v55  ;;  %2989 = vmatpush3.bf16.msra.mxu1 %v3704_v8 }
 0x632   : >> { %2080 = vmatprep.subr.bf16.mxu0 %v3676_v34  ;;  %2990 = vmatprep.subr.bf16.mxu1 %v3709_v2 }
 0x635   : >> { %2081 = vmatpush1.bf16.msra.mxu0 %v3694_v11  ;;  %2991 = vmatpush3.bf16.msra.mxu1 %v3733_v17 }
 0x636   : >> { %2082 = vmatprep.subr.bf16.mxu0 %v3699_v6  ;;  %2992 = vmatprep.subr.bf16.mxu1 %v3741_v42 }
 0x639   : >> { %2083 = vmatpush1.bf16.msra.mxu0 %v3716_v10  ;;  %2993 = vmatpush3.bf16.msra.mxu1 %v3761_v14 }
 0x63a   : >> { %2084 = vmatprep.subr.bf16.mxu0 %v3725_v36  ;;  %2994 = vmatprep.subr.bf16.mxu1 %v3766_v12 }
 0x63d   : >> { %2085 = vmatpush1.bf16.msra.mxu0 %v3746_v19  ;;  %2995 = vmatpush3.bf16.msra.mxu1 %v3781_v44 }
 0x63e   : >> { %2086 = vmatprep.subr.bf16.mxu0 %v3753_v38  ;;  %2996 = vmatprep.subr.bf16.mxu1 %v3786_v20 }
 0x641   : >> { %2087 = vmatpush1.bf16.msra.mxu0 %v3771_v21  ;;  %2997 = vmatpush3.bf16.msra.mxu1 %v3801_v22 }
 0x642   : >> { %2088 = vmatprep.subr.bf16.mxu0 %v3776_v18  ;;  %2998 = vmatprep.subr.bf16.mxu1 %v3806_v24 }
 0x645   : >> { %2089 = vmatpush1.bf16.msra.mxu0 %v3791_v16  ;;  %2999 = vmatpush3.bf16.msra.mxu1 %v3821_v26 }
 0x646   : >> { %2090 = vmatprep.subr.bf16.mxu0 %v3796_v23  ;;  %2310 = vmatprep.subr.bf16.mxu1 %v3633_v63  ;;  %v4719_v63 = vld [vmem:[#allocation74_spill] sm:$0xff] }
 0x649   : >> { %2091 = vmatpush1.bf16.msra.mxu0 %v3811_v25 }
 0x64a   : >> { %2092 = vmatprep.subr.bf16.mxu0 %v3816_v27 }
 0x64d   : >> { %2093 = vmatpush1.bf16.msra.mxu0 %v3827_v0 }
 0x64e   : >> { %2094 = vmatprep.subr.bf16.mxu0 %v3832_v28 }
 0x651   : >> { %2095 = vmatpush1.bf16.msra.mxu0 %v4715_v45 }
 0x652   : >> { %2096 = vmatprep.subr.bf16.mxu0 %v4716_v52 }
 0x655   : >> { %2097 = vmatpush1.bf16.msra.mxu0 %v4717_v43 }
 0x656   : >> { %2098 = vmatprep.subr.bf16.mxu0 %v4718_v3 }
 0x659   : >> { %2099 = vmatpush1.bf16.msra.mxu0 %v4719_v63 }
 0x65a   : >> { %2100 = vmatprep.subr.bf16.mxu0 %v4720_v51 }
 0x65d   : >> { %2101 = vmatpush1.bf16.msra.mxu0 %v4721_v32  ;;  %v1931_v32 = vrot.slane %v2810_v41, 2 }
 0x65e   : >> { %2102 = vmatprep.subr.bf16.mxu0 %v4722_v46 }
 0x661   : >> { %2103 = vmatpush1.bf16.msra.mxu0 %v4723_v37 }
 0x662   : >> { %2104 = vmatprep.subr.bf16.mxu0 %v4724_v15 }
 0x665   : >> { %2105 = vmatpush1.bf16.msra.mxu0 %v4725_v54 }
 0x666   : >> { %3006 = vmatprep.subr.bf16.mxu0 %v4726_v13 }
 0x6fb   : >> { %v1872_v31 = vpop.f32.mrb[20].mxu1  ;;  %v2978_v47 = vpop.f32.mrb[20].mxu0 }
 0x6fc   : >> { %v1923_v35 = vadd.f32 %v2810_v41, %v1872_v31  ;;  %v1961_v56 = vrot.slane %v1872_v31, %v3964_v58  ;;  %v1874_v60 = vpop.f32.mrb[21].mxu1  ;;  %v2979_v48 = vpop.f32.mrb[21].mxu0 }
 0x6fd   : >> { %v2980_v39 = vadd.f32 %v2979_v48, %v2978_v47  ;;  %v1876_v33 = vpop.f32.mrb[22].mxu1  ;;  %v2981_v50 = vpop.f32.mrb[22].mxu0  ;;  %v1933_v63 = vadd.f32 %v1931_v32, %v1874_v60  ;;  %v1981_v43 = vrot.slane %v1874_v60, %v3964_v58  ;;  %v1972_v47 = vrot.slane %v1953_v30, 2 }
 0x6fe   : >> { %v2811_v15 = vmul.f32 -1.442695, %v1923_v35  ;;  %v1962_v37 = vcombine.high %v1961_v56, %v1961_v56  ;;  %v1877_v54 = vpop.f32.mrb[23].mxu1  ;;  %v2982_v46 = vpop.f32.mrb[23].mxu0  ;;  %v1942_v56 = vrot.slane %v2810_v41, 4 }
 0x6ff   : >> { %v2812_v3 = vmul.f32 -1.442695, %v1933_v63  ;;  %v1982_v48 = vcombine.high %v1981_v43, %v1981_v43  ;;  %v1991_v46 = vadd.f32 %v2980_v39, %v4666_v62 }
 0x700   : >> { %3157 = vpow2.f32 %v2811_v15  ;;  %v1964_v13 = vadd.f32 %v1962_v37, %v1953_v30 }
 0x701   : >> { %v1984_v54 = vadd.f32 %v1982_v48, %v1972_v47  ;;  %v1999_v63 = vrot.slane %v1991_v46, %v3964_v58 }
 0x702   : >> { %v2814_v51 = vmul.f32 -1.442695, %v1964_v13 }
 0x703   : >> { %v2815_v37 = vmul.f32 -1.442695, %v1984_v54  ;;  %v2000_v43 = vcombine.high %v1999_v63, %v1999_v63 }
 0x704   : >> { %3159 = vpow2.f32 %v2814_v51  ;;  %v1940_v51 = vadd.f32 %v2980_v39, %v4667_v1 }
 0x705   : >> { %3161 = vpow2.f32 %v2812_v3  ;;  %v2003_v3 = vrot.slane %v1953_v30, 4 }
 0x70a   : >> { %v3158_v31 = vpop.eup %3157 }
 0x70b   : >> { %v1927_v52 = vadd.f32 1.0, %v3158_v31 }
 0x70d   : >> { %3163 = vrcp.f32 %v1927_v52 }
 0x70e   : >> { %v3160_v33 = vpop.eup %3159 }
 0x70f   : >> { %v1968_v35 = vadd.f32 1.0, %v3160_v33  ;;  %v3162_v15 = vpop.eup %3161 }
 0x710   : >> { %v1937_v52 = vadd.f32 1.0, %v3162_v15 }
 0x711   : >> { %3165 = vrcp.f32 %v1968_v35 }
 0x712   : >> { %3167 = vpow2.f32 %v2815_v37 }
 0x717   : >> { %v3164_v32 = vpop.eup %3163 }
 0x718   : >> { %v1941_v60 = vmul.f32 %v3164_v32, %v1940_v51 }
 0x71a   : >> { %v1944_v50 = vadd.f32 %v1942_v56, %v1941_v60 }
 0x71b   : >> { %v3166_v13 = vpop.eup %3165 }
 0x71c   : >> { %3169 = vtanh.f32 %v1944_v50  ;;  %v2002_v31 = vmul.f32 %v3166_v13, %v2000_v43  ;;  %v3168_v48 = vpop.eup %3167 }
 0x71d   : >> { %3171 = vrcp.f32 %v1937_v52  ;;  %v1988_v41 = vadd.f32 1.0, %v3168_v48 }
 0x71e   : >> { %v2005_v47 = vadd.f32 %v2003_v3, %v2002_v31 }
 0x720   : >> { %3173 = vtanh.f32 %v2005_v47 }
 0x721   : >> { %3175 = vrcp.f32 %v1988_v41 }
 0x726   : >> { %v3170_v33 = vpop.eup %3169 }
 0x727   : >> { %v1946_v39 = vsub.f32 %v4277_v29, %v3170_v33  ;;  %v3172_v35 = vpop.eup %3171 }
 0x729   : >> { %v1947_v54 = vmul.f32 %v3172_v35, %v1946_v39 }
 0x72a   : >> { %v3174_v46 = vpop.eup %3173 }
 0x72b   : >> { %v1948_v30 = vadd.f32 %v3170_v33, %v1947_v54  ;;  %v2008_v37 = vcombine.low %v3174_v46, %v3174_v46  ;;  %v3176_v32 = vpop.eup %3175 }
 0x72d   : >> { %v2015_v15 = vrot.slane %v2008_v37, %v3964_v58  ;;  %1949 = vst [vmem:[#allocation2] sm:$0x3] %v1948_v30 }
 0x72f   : >> { %v2017_v56 = vsub.f32 %v4282_v49, %v2015_v15 }
 0x731   : >> { %v2025_v51 = vrot.slane %v2017_v56, %v3964_v58 }
 0x733   : >> { %v2026_v63 = vcombine.high %v2025_v51, %v2025_v51 }
 0x734   : >> { %v4352_v29 = vld [vmem:[#allocation2] sm:$0x3] }
 0x735   : >> { %v2028_v60 = vmul.f32 %v3176_v32, %v2026_v63  ;;  %v2045_v3 = vpack.c.bf16 %v4352_v29, %v4352_v29 }
 0x737   : >> { %v2029_v52 = vadd.f32 %v3174_v46, %v2028_v60  ;;  %2818 = vst [vmem:[%s3954_s17 + $0x6] sm:$0x1] %v2045_v3 }
 0x739   : >> { %v2031_v50 = vcombine.low %v2029_v52, %v2029_v52 }
 0x73b   : >> { %2816 = vst.sshfl [vmem:[#allocation2 + $0x4] sm:$0x30 pattern:$0x76325410] %v2031_v50 }
 0x742   : >> { %v2068_v43 = vld [vmem:[#allocation2] sm:$0xff] }
 0x743   : >> { %v4357_v13 = vld [vmem:[#allocation2 + $0x4] sm:$0xc]  ;;  %v2070_v49 = vcombine.high %v2068_v43, %v2068_v43  ;;  %v2072_v33 = vpack.c.bf16 %v2068_v43, %v2068_v43 }
 0x744   : >> { %v2048_v31 = vpack.c.bf16 %v4357_v13, %v4357_v13 }
 0x745   : >> { %v2073_v47 = vpack.c.bf16 %v2070_v49, %v2070_v49 }
 0x746   : >> { %v2056_v48 = vrot.slane %v2048_v31, %v3736_v40 }
 0x747   : >> { %2106 = vmatprep.mubr.bf16.mxu0 %v2073_v47  ;;  %2147 = vmatprep.mubr.bf16.mxu1 %v2073_v47 }
 0x748   : >> { %v2057_v41 = vcombine.high %v2056_v48, %v2056_v48  ;;  %2107 = vmatmul.mubr.bf16.vlgmr.msra.gmra.mrb[24].mxu0 %v2072_v33  ;;  %2148 = vmatmul.mubr.bf16.vlgmr.msra.gmra.mrb[24].mxu1 %v2072_v33 }
 0x749   : >> { %2311 = vmatpush1.bf16.msra.mxu1 %v3637_v59  ;;  %3007 = vmatpush3.bf16.msra.mxu0 %v3667_v5  ;;  %v4728_v5 = vld [vmem:[#allocation72_spill] sm:$0xff] }
 0x74a   : >> { %2819 = vst.sshfl [vmem:[%s2066_s7] sm:$0x1 pattern:$0x73625140] %v2057_v41  ;;  %2312 = vmatprep.subr.bf16.mxu1 %v3641_v57  ;;  %3008 = vmatprep.subr.bf16.mxu0 %v3671_v7  ;;  %v4730_v7 = vld [vmem:[#allocation74_spill] sm:$0xff] }
 0x74d   : >> { %2313 = vmatpush1.bf16.msra.mxu1 %v3647_v61  ;;  %3009 = vmatpush3.bf16.msra.mxu0 %v3682_v9  ;;  %v4732_v9 = vld [vmem:[#allocation76_spill] sm:$0xff] }
 0x74e   : >> { %2314 = vmatprep.subr.bf16.mxu1 %v3652_v53  ;;  %3010 = vmatprep.subr.bf16.mxu0 %v3689_v4  ;;  %v4727_v4 = vld [vmem:[#allocation71_spill] sm:$0xff] }
 0x751   : >> { %2315 = vmatpush1.bf16.msra.mxu1 %v3663_v55  ;;  %3011 = vmatpush3.bf16.msra.mxu0 %v3704_v8  ;;  %v4731_v8 = vld [vmem:[#allocation75_spill] sm:$0xff] }
 0x752   : >> { %2316 = vmatprep.subr.bf16.mxu1 %v3676_v34  ;;  %3012 = vmatprep.subr.bf16.mxu0 %v3709_v2 }
 0x755   : >> { %2317 = vmatpush1.bf16.msra.mxu1 %v3694_v11  ;;  %3013 = vmatpush3.bf16.msra.mxu0 %v3733_v17  ;;  %v4734_v11 = vld [vmem:[#allocation78_spill] sm:$0xff]  ;;  %v4736_v17 = vld [vmem:[#allocation80_spill] sm:$0xff] }
 0x756   : >> { %2318 = vmatprep.subr.bf16.mxu1 %v3699_v6  ;;  %3014 = vmatprep.subr.bf16.mxu0 %v3741_v42  ;;  %v4729_v6 = vld [vmem:[#allocation73_spill] sm:$0xff] }
 0x759   : >> { %2319 = vmatpush1.bf16.msra.mxu1 %v3716_v10  ;;  %3015 = vmatpush3.bf16.msra.mxu0 %v3761_v14  ;;  %v4733_v10 = vld [vmem:[#allocation77_spill] sm:$0xff]  ;;  %v4735_v14 = vld [vmem:[#allocation79_spill] sm:$0xff] }
 0x75a   : >> { %2320 = vmatprep.subr.bf16.mxu1 %v3725_v36  ;;  %3016 = vmatprep.subr.bf16.mxu0 %v3766_v12 }
 0x75d   : >> { %2321 = vmatpush1.bf16.msra.mxu1 %v3746_v19  ;;  %3017 = vmatpush3.bf16.msra.mxu0 %v3781_v44 }
 0x75e   : >> { %2322 = vmatprep.subr.bf16.mxu1 %v3753_v38  ;;  %3018 = vmatprep.subr.bf16.mxu0 %v3786_v20 }
 0x761   : >> { %2323 = vmatpush1.bf16.msra.mxu1 %v3771_v21  ;;  %3019 = vmatpush3.bf16.msra.mxu0 %v3801_v22 }
 0x762   : >> { %2324 = vmatprep.subr.bf16.mxu1 %v3776_v18  ;;  %3020 = vmatprep.subr.bf16.mxu0 %v3806_v24  ;;  %v2822_v18 = vld [vmem:[%s3959_s21 + $0x24] sm:$0x3f] }
 0x763   : >> { %v2167_v61 = vrot.slane %v2822_v18, 2  ;;  %v2178_v37 = vrot.slane %v2822_v18, 4 }
 0x765   : >> { %2325 = vmatpush1.bf16.msra.mxu1 %v3791_v16  ;;  %3021 = vmatpush3.bf16.msra.mxu0 %v3821_v26 }
 0x766   : >> { %2326 = vmatprep.subr.bf16.mxu1 %v3796_v23 }
 0x769   : >> { %2327 = vmatpush1.bf16.msra.mxu1 %v3811_v25  ;;  %v2189_v25 = vld [vmem:[%s2188_s13] sm:$0x3f] }
 0x76a   : >> { %2328 = vmatprep.subr.bf16.mxu1 %v3816_v27  ;;  %v2208_v44 = vrot.slane %v2189_v25, 2  ;;  %v2239_v32 = vrot.slane %v2189_v25, 4 }
 0x76d   : >> { %2329 = vmatpush1.bf16.msra.mxu1 %v3827_v0 }
 0x76e   : >> { %2330 = vmatprep.subr.bf16.mxu1 %v3832_v28 }
 0x771   : >> { %2331 = vmatpush1.bf16.msra.mxu1 %v4715_v45 }
 0x772   : >> { %2332 = vmatprep.subr.bf16.mxu1 %v4727_v4 }
 0x775   : >> { %2333 = vmatpush1.bf16.msra.mxu1 %v4728_v5 }
 0x776   : >> { %2334 = vmatprep.subr.bf16.mxu1 %v4729_v6 }
 0x779   : >> { %2335 = vmatpush1.bf16.msra.mxu1 %v4730_v7 }
 0x77a   : >> { %2336 = vmatprep.subr.bf16.mxu1 %v4731_v8 }
 0x77d   : >> { %2337 = vmatpush1.bf16.msra.mxu1 %v4732_v9 }
 0x77e   : >> { %2338 = vmatprep.subr.bf16.mxu1 %v4733_v10 }
 0x781   : >> { %2339 = vmatpush1.bf16.msra.mxu1 %v4734_v11 }
 0x782   : >> { %2340 = vmatprep.subr.bf16.mxu1 %v4735_v14 }
 0x785   : >> { %2341 = vmatpush1.bf16.msra.mxu1 %v4736_v17 }
 0x81b   : >> { %v2108_v19 = vpop.f32.mrb[24].mxu0  ;;  %v3000_v20 = vpop.f32.mrb[24].mxu1 }
 0x81c   : >> { %v2159_v21 = vadd.f32 %v2822_v18, %v2108_v19  ;;  %v2197_v22 = vrot.slane %v2108_v19, %v3964_v58  ;;  %v2110_v23 = vpop.f32.mrb[25].mxu0  ;;  %v3001_v24 = vpop.f32.mrb[25].mxu1 }
 0x81d   : >> { %v3002_v26 = vadd.f32 %v3001_v24, %v3000_v20  ;;  %v2112_v27 = vpop.f32.mrb[26].mxu0  ;;  %v3003_v28 = vpop.f32.mrb[26].mxu1  ;;  %v2169_v2 = vadd.f32 %v2167_v61, %v2110_v23  ;;  %v2217_v42 = vrot.slane %v2110_v23, %v3964_v58 }
 0x81e   : >> { %v2823_v34 = vmul.f32 -1.442695, %v2159_v21  ;;  %v2198_v53 = vcombine.high %v2197_v22, %v2197_v22  ;;  %v2113_v55 = vpop.f32.mrb[27].mxu0  ;;  %v3004_v57 = vpop.f32.mrb[27].mxu1  ;;  %v2834_v28 = vld [vmem:[%s3959_s21 + $0x2a] sm:$0x3f] }
 0x81f   : >> { %v2824_v36 = vmul.f32 -1.442695, %v2169_v2  ;;  %v2218_v16 = vcombine.high %v2217_v42, %v2217_v42  ;;  %v2227_v54 = vadd.f32 %v3002_v26, %v4666_v62  ;;  %v2176_v15 = vadd.f32 %v3002_v26, %v4667_v1 }
 0x820   : >> { %3177 = vpow2.f32 %v2823_v34  ;;  %v2200_v59 = vadd.f32 %v2198_v53, %v2189_v25 }
 0x821   : >> { %v2220_v35 = vadd.f32 %v2218_v16, %v2208_v44  ;;  %v2235_v56 = vrot.slane %v2227_v54, %v3964_v58 }
 0x822   : >> { %v2826_v0 = vmul.f32 -1.442695, %v2200_v59 }
 0x823   : >> { %v2827_v46 = vmul.f32 -1.442695, %v2220_v35  ;;  %v2236_v52 = vcombine.high %v2235_v56, %v2235_v56 }
 0x824   : >> { %3179 = vpow2.f32 %v2826_v0 }
 0x825   : >> { %3181 = vpow2.f32 %v2824_v36 }
 0x82a   : >> { %v3178_v38 = vpop.eup %3177 }
 0x82b   : >> { %v2163_v12 = vadd.f32 1.0, %v3178_v38 }
 0x82d   : >> { %3183 = vrcp.f32 %v2163_v12 }
 0x82e   : >> { %v3180_v45 = vpop.eup %3179 }
 0x82f   : >> { %v2204_v39 = vadd.f32 1.0, %v3180_v45  ;;  %v3182_v30 = vpop.eup %3181  ;;  %v2403_v45 = vrot.slane %v2834_v28, 2 }
 0x830   : >> { %v2173_v60 = vadd.f32 1.0, %v3182_v30 }
 0x831   : >> { %3185 = vrcp.f32 %v2204_v39 }
 0x832   : >> { %3187 = vpow2.f32 %v2827_v46 }
 0x837   : >> { %v3184_v51 = vpop.eup %3183 }
 0x838   : >> { %v2177_v63 = vmul.f32 %v3184_v51, %v2176_v15 }
 0x83a   : >> { %v2180_v3 = vadd.f32 %v2178_v37, %v2177_v63 }
 0x83b   : >> { %v3186_v50 = vpop.eup %3185 }
 0x83c   : >> { %3189 = vtanh.f32 %v2180_v3  ;;  %v2238_v43 = vmul.f32 %v3186_v50, %v2236_v52  ;;  %v3188_v31 = vpop.eup %3187  ;;  %v2414_v50 = vrot.slane %v2834_v28, 4 }
 0x83d   : >> { %3191 = vrcp.f32 %v2173_v60  ;;  %v2224_v48 = vadd.f32 1.0, %v3188_v31 }
 0x83e   : >> { %v2241_v49 = vadd.f32 %v2239_v32, %v2238_v43 }
 0x840   : >> { %3193 = vtanh.f32 %v2241_v49 }
 0x841   : >> { %3195 = vrcp.f32 %v2224_v48 }
 0x846   : >> { %v3190_v47 = vpop.eup %3189 }
 0x847   : >> { %v2182_v33 = vsub.f32 %v4352_v29, %v3190_v47  ;;  %v3192_v41 = vpop.eup %3191 }
 0x849   : >> { %v2183_v4 = vmul.f32 %v3192_v41, %v2182_v33 }
 0x84a   : >> { %v3194_v5 = vpop.eup %3193 }
 0x84b   : >> { %v2184_v6 = vadd.f32 %v3190_v47, %v2183_v4  ;;  %v2244_v7 = vcombine.low %v3194_v5, %v3194_v5  ;;  %v3196_v14 = vpop.eup %3195 }
 0x84d   : >> { %v2251_v8 = vrot.slane %v2244_v7, %v3964_v58  ;;  %2185 = vst [vmem:[#allocation2] sm:$0x3] %v2184_v6 }
 0x84f   : >> { %v2253_v9 = vsub.f32 %v4357_v13, %v2251_v8 }
 0x851   : >> { %v2261_v10 = vrot.slane %v2253_v9, %v3964_v58 }
 0x853   : >> { %v2262_v11 = vcombine.high %v2261_v10, %v2261_v10 }
 0x854   : >> { %v4425_v17 = vld [vmem:[#allocation2] sm:$0x3] }
 0x855   : >> { %v2264_v29 = vmul.f32 %v3196_v14, %v2262_v11  ;;  %v2281_v18 = vpack.c.bf16 %v4425_v17, %v4425_v17 }
 0x857   : >> { %v2265_v19 = vadd.f32 %v3194_v5, %v2264_v29  ;;  %2830 = vst [vmem:[%s3954_s17 + $0x7] sm:$0x1] %v2281_v18  ;;  %s2851_s17 = smul.u32 6, %s2278_s14 }
 0x859   : >> { %v2267_v20 = vcombine.low %v2265_v19, %v2265_v19  ;;  %s2424_s16 = scalar_lea.vmem %s3294_s11, %s2851_s17 }
 0x85a   : >> { %v2425_v0 = vld [vmem:[%s2424_s16] sm:$0x3f] }
 0x85b   : >> { %2828 = vst.sshfl [vmem:[#allocation2 + $0x4] sm:$0x30 pattern:$0x76325410] %v2267_v20  ;;  %v2444_v15 = vrot.slane %v2425_v0, 2  ;;  %v2475_v48 = vrot.slane %v2425_v0, 4 }
 0x862   : >> { %v2304_v21 = vld [vmem:[#allocation2] sm:$0xff] }
 0x863   : >> { %v4430_v22 = vld [vmem:[#allocation2 + $0x4] sm:$0xc]  ;;  %v2306_v13 = vcombine.high %v2304_v21, %v2304_v21  ;;  %v2308_v26 = vpack.c.bf16 %v2304_v21, %v2304_v21 }
 0x864   : >> { %v2284_v23 = vpack.c.bf16 %v4430_v22, %v4430_v22 }
 0x865   : >> { %v2309_v24 = vpack.c.bf16 %v2306_v13, %v2306_v13 }
 0x866   : >> { %v2292_v25 = vrot.slane %v2284_v23, %v3736_v40 }
 0x867   : >> { %2342 = vmatprep.mubr.bf16.mxu1 %v2309_v24  ;;  %2383 = vmatprep.mubr.bf16.mxu0 %v2309_v24 }
 0x868   : >> { %v2293_v27 = vcombine.high %v2292_v25, %v2292_v25  ;;  %2343 = vmatmul.mubr.bf16.vlgmr.msra.gmra.mrb[28].mxu1 %v2308_v26  ;;  %2384 = vmatmul.mubr.bf16.vlgmr.msra.gmra.mrb[28].mxu0 %v2308_v26 }
 0x86a   : >> { %2831 = vst.sshfl [vmem:[%s2302_s15] sm:$0x1 pattern:$0x73625140] %v2293_v27 }
 0x93b   : >> { %v2344_v34 = vpop.f32.mrb[28].mxu1  ;;  %v3022_v53 = vpop.f32.mrb[28].mxu0 }
 0x93c   : >> { %v2395_v55 = vadd.f32 %v2834_v28, %v2344_v34  ;;  %v2433_v57 = vrot.slane %v2344_v34, %v3964_v58  ;;  %v2346_v59 = vpop.f32.mrb[29].mxu1  ;;  %v3023_v61 = vpop.f32.mrb[29].mxu0 }
 0x93d   : >> { %v3024_v40 = vadd.f32 %v3023_v61, %v3022_v53  ;;  %v2348_v2 = vpop.f32.mrb[30].mxu1  ;;  %v3025_v36 = vpop.f32.mrb[30].mxu0  ;;  %v2405_v35 = vadd.f32 %v2403_v45, %v2346_v59  ;;  %v2453_v46 = vrot.slane %v2346_v59, %v3964_v58 }
 0x93e   : >> { %v2835_v42 = vmul.f32 -1.442695, %v2395_v55  ;;  %v2434_v38 = vcombine.high %v2433_v57, %v2433_v57  ;;  %v2349_v12 = vpop.f32.mrb[31].mxu1  ;;  %v3026_v44 = vpop.f32.mrb[31].mxu0 }
 0x93f   : >> { %v2836_v54 = vmul.f32 -1.442695, %v2405_v35  ;;  %v2454_v56 = vcombine.high %v2453_v46, %v2453_v46  ;;  %v2463_v60 = vadd.f32 %v3024_v40, %v4666_v62  ;;  %v2412_v43 = vadd.f32 %v3024_v40, %v4667_v1 }
 0x940   : >> { %3197 = vpow2.f32 %v2835_v42  ;;  %v2436_v16 = vadd.f32 %v2434_v38, %v2425_v0 }
 0x941   : >> { %v2456_v32 = vadd.f32 %v2454_v56, %v2444_v15  ;;  %v2471_v49 = vrot.slane %v2463_v60, %v3964_v58 }
 0x942   : >> { %v2838_v39 = vmul.f32 -1.442695, %v2436_v16 }
 0x943   : >> { %v2839_v3 = vmul.f32 -1.442695, %v2456_v32  ;;  %v2472_v4 = vcombine.high %v2471_v49, %v2471_v49 }
 0x944   : >> { %3199 = vpow2.f32 %v2838_v39 }
 0x945   : >> { %3201 = vpow2.f32 %v2836_v54 }
 0x94a   : >> { %v3198_v30 = vpop.eup %3197 }
 0x94b   : >> { %v2399_v37 = vadd.f32 1.0, %v3198_v30 }
 0x94d   : >> { %3203 = vrcp.f32 %v2399_v37 }
 0x94e   : >> { %v3200_v51 = vpop.eup %3199 }
 0x94f   : >> { %v2440_v63 = vadd.f32 1.0, %v3200_v51  ;;  %v3202_v52 = vpop.eup %3201 }
 0x950   : >> { %v2409_v33 = vadd.f32 1.0, %v3202_v52 }
 0x951   : >> { %3205 = vrcp.f32 %v2440_v63 }
 0x952   : >> { %3207 = vpow2.f32 %v2839_v3 }
 0x957   : >> { %v3204_v31 = vpop.eup %3203 }
 0x958   : >> { %v2413_v47 = vmul.f32 %v3204_v31, %v2412_v43 }
 0x95a   : >> { %v2416_v41 = vadd.f32 %v2414_v50, %v2413_v47 }
 0x95b   : >> { %v3206_v5 = vpop.eup %3205 }
 0x95c   : >> { %3209 = vtanh.f32 %v2416_v41  ;;  %v2474_v6 = vmul.f32 %v3206_v5, %v2472_v4  ;;  %v3208_v8 = vpop.eup %3207 }
 0x95d   : >> { %3211 = vrcp.f32 %v2409_v33  ;;  %v2460_v10 = vadd.f32 1.0, %v3208_v8 }
 0x95e   : >> { %v2477_v7 = vadd.f32 %v2475_v48, %v2474_v6 }
 0x960   : >> { %3213 = vtanh.f32 %v2477_v7 }
 0x961   : >> { %3215 = vrcp.f32 %v2460_v10 }
 0x966   : >> { %v3210_v9 = vpop.eup %3209 }
 0x967   : >> { %v2418_v11 = vsub.f32 %v4425_v17, %v3210_v9  ;;  %v3212_v14 = vpop.eup %3211 }
 0x969   : >> { %v2419_v29 = vmul.f32 %v3212_v14, %v2418_v11 }
 0x96a   : >> { %v3214_v18 = vpop.eup %3213 }
 0x96b   : >> { %v2420_v19 = vadd.f32 %v3210_v9, %v2419_v29  ;;  %v2480_v20 = vcombine.low %v3214_v18, %v3214_v18  ;;  %v3216_v25 = vpop.eup %3215 }
 0x96d   : >> { %2421 = vst [vmem:[#allocation2] sm:$0x3] %v2420_v19  ;;  %v2487_v21 = vrot.slane %v2480_v20, %v3964_v58 }
 0x96f   : >> { %v2489_v13 = vsub.f32 %v4430_v22, %v2487_v21 }
 0x971   : >> { %v2497_v23 = vrot.slane %v2489_v13, %v3964_v58 }
 0x973   : >> { %v2498_v24 = vcombine.high %v2497_v23, %v2497_v23 }
 0x975   : >> { %v2500_v26 = vmul.f32 %v3216_v25, %v2498_v24  ;;  %367 = sbr.rel (!%p365_p6) target bundleno = 57 (0x39), region = 125 }
 0x977   : >> { %v2501_v27 = vadd.f32 %v3214_v18, %v2500_v26 }
 0x979   : >> { %v2503_v28 = vcombine.low %v2501_v27, %v2501_v27 }
 0x97b   : >> { %2840 = vst.sshfl [vmem:[#allocation2 + $0x4] sm:$0x30 pattern:$0x76325410] %v2503_v28 }
 0x97c PF: > { %s16_s18 = sadd.s32 1, %s3227_s18  }
 0x97d   : > { %p13_p7 = scmp.ge.s32.totalorder %s16_s18, 4  }
 0x97f   :  { %15 = sbr.rel (!%p13_p7) target bundleno = 1 (0x1), region = 136 }

// kernel: bigru_lm_forward.3
= control target key start
LH: loop header
LB: loop body
LE: loop exit
PB: predicated region body
PF: predicated region fallthrough
CT: control target
= control target key end

     0   :  { %v2389_v1 = vmov 0   ;;  %s3551_s1 = inlined_call_operand.vmem [shape: bf16[2,128,256], index: 1, kind: input, shape index: {}]   ;;  %s3552_s0 = inlined_call_operand.vmem [shape: bf16[2,336,128], index: 0, kind: input, shape index: {}]   ;;  %s3553_s2 = inlined_call_operand.vmem [shape: f32[336,256], index: 2, kind: output, shape index: {}]  }
   0x1   :  { %v2047_v0 = vld [vmem:[%s3551_s1 + $0x84] ss:$8 sps:$4 sm:$0xff]   ;;  %368 = vmatprep.mubr.bf16.mxu1 %v2389_v1  ;;  %817 = vmatprep.mubr.bf16.mxu0 %v2389_v1  ;;  %v2051_v3 = vld [vmem:[%s3551_s1 + $0x80] ss:$8 sps:$4 sm:$0xff]   ;;  %v2053_v5 = vld [vmem:[%s3551_s1 + $0x94] ss:$8 sps:$4 sm:$0xff]  }
   0x2   :  { %v2049_v2 = vld [vmem:[%s3551_s1 + $0x4] ss:$8 sps:$4 sm:$0xff]   ;;  %336 = vmatprep.subr.bf16.mxu1 %v2047_v0  ;;  %v2052_v4 = vld [vmem:[%s3551_s1] ss:$8 sps:$4 sm:$0xff]   ;;  %v2055_v6 = vld [vmem:[%s3551_s1 + $0x14] ss:$8 sps:$4 sm:$0xff]  }
   0x3   :  { %785 = vmatprep.subr.bf16.mxu0 %v2049_v2  ;;  %337 = vmatpush1.bf16.msra.mxu1 %v2051_v3  ;;  %v2057_v7 = vld [vmem:[%s3551_s1 + $0x90] ss:$8 sps:$4 sm:$0xff]   ;;  %v2059_v9 = vld [vmem:[%s3551_s1 + $0xa4] ss:$8 sps:$4 sm:$0xff]   ;;  %v2063_v11 = vld [vmem:[%s3551_s1 + $0xa0] ss:$8 sps:$4 sm:$0xff]  }
   0x4   :  { %786 = vmatpush1.bf16.msra.mxu0 %v2052_v4  ;;  %338 = vmatprep.subr.bf16.mxu1 %v2053_v5  ;;  %v2058_v8 = vld [vmem:[%s3551_s1 + $0x10] ss:$8 sps:$4 sm:$0xff]   ;;  %v2061_v10 = vld [vmem:[%s3551_s1 + $0x24] ss:$8 sps:$4 sm:$0xff]   ;;  %v2064_v12 = vld [vmem:[%s3551_s1 + $0x20] ss:$8 sps:$4 sm:$0xff]  }
   0x5   :  { %787 = vmatprep.subr.bf16.mxu0 %v2055_v6  ;;  %v2065_v13 = vld [vmem:[%s3551_s1 + $0xb4] ss:$8 sps:$4 sm:$0xff]   ;;  %v2069_v15 = vld [vmem:[%s3551_s1 + $0xb0] ss:$8 sps:$4 sm:$0xff]   ;;  %v2071_v17 = vld [vmem:[%s3551_s1 + $0xc4] ss:$8 sps:$4 sm:$0xff]  }
   0x6   :  { %v2067_v14 = vld [vmem:[%s3551_s1 + $0x34] ss:$8 sps:$4 sm:$0xff]   ;;  %v2070_v16 = vld [vmem:[%s3551_s1 + $0x30] ss:$8 sps:$4 sm:$0xff]   ;;  %v2073_v18 = vld [vmem:[%s3551_s1 + $0x44] ss:$8 sps:$4 sm:$0xff]  }
   0x7   :  { %339 = vmatpush1.bf16.msra.mxu1 %v2057_v7  ;;  %v2075_v19 = vld [vmem:[%s3551_s1 + $0xc0] ss:$8 sps:$4 sm:$0xff]   ;;  %v2077_v21 = vld [vmem:[%s3551_s1 + $0xd4] ss:$8 sps:$4 sm:$0xff]   ;;  %v2081_v23 = vld [vmem:[%s3551_s1 + $0xd0] ss:$8 sps:$4 sm:$0xff]  }
   0x8   :  { %788 = vmatpush1.bf16.msra.mxu0 %v2058_v8  ;;  %340 = vmatprep.subr.bf16.mxu1 %v2059_v9  ;;  %v2076_v20 = vld [vmem:[%s3551_s1 + $0x40] ss:$8 sps:$4 sm:$0xff]   ;;  %v2079_v22 = vld [vmem:[%s3551_s1 + $0x54] ss:$8 sps:$4 sm:$0xff]   ;;  %v2082_v24 = vld [vmem:[%s3551_s1 + $0x50] ss:$8 sps:$4 sm:$0xff]  }
   0x9   :  { %789 = vmatprep.subr.bf16.mxu0 %v2061_v10  ;;  %v2083_v25 = vld [vmem:[%s3551_s1 + $0xe4] ss:$8 sps:$4 sm:$0xff]   ;;  %v2087_v27 = vld [vmem:[%s3551_s1 + $0xe0] ss:$8 sps:$4 sm:$0xff]   ;;  %v2089_v29 = vld [vmem:[%s3551_s1 + $0xf4] ss:$8 sps:$4 sm:$0xff]  }
   0xa   :  { %v2085_v26 = vld [vmem:[%s3551_s1 + $0x64] ss:$8 sps:$4 sm:$0xff]   ;;  %v2088_v28 = vld [vmem:[%s3551_s1 + $0x60] ss:$8 sps:$4 sm:$0xff]   ;;  %v2091_v30 = vld [vmem:[%s3551_s1 + $0x74] ss:$8 sps:$4 sm:$0xff]  }
   0xb   :  { %341 = vmatpush1.bf16.msra.mxu1 %v2063_v11  ;;  %v2093_v31 = vld [vmem:[%s3551_s1 + $0xf0] ss:$8 sps:$4 sm:$0xff]   ;;  %v2095_v33 = vld [vmem:[%s3552_s0 + $0xa8] sm:$0xff]   ;;  %v2096_v34 = vld [vmem:[%s3552_s0] sm:$0xff]  }
   0xc   :  { %790 = vmatpush1.bf16.msra.mxu0 %v2064_v12  ;;  %342 = vmatprep.subr.bf16.mxu1 %v2065_v13  ;;  %v2094_v32 = vld [vmem:[%s3551_s1 + $0x70] ss:$8 sps:$4 sm:$0xff]   ;;  %v2098_v36 = vld [vmem:[%s3552_s0 + $0x8] sm:$0xff]   ;;  %v2101_v39 = vld [vmem:[%s3552_s0 + $0xc0] sm:$0xff]  }
   0xd   :  { %791 = vmatprep.subr.bf16.mxu0 %v2067_v14  ;;  %v2097_v35 = vld [vmem:[%s3552_s0 + $0xb0] sm:$0xff]   ;;  %v2099_v37 = vld [vmem:[%s3552_s0 + $0xb8] sm:$0xff]   ;;  %v2103_v41 = vld [vmem:[%s3552_s0 + $0xc8] sm:$0xff]  }
   0xe   :  { %v2100_v38 = vld [vmem:[%s3552_s0 + $0x10] sm:$0xff]   ;;  %v2102_v40 = vld [vmem:[%s3552_s0 + $0x18] sm:$0xff]   ;;  %v2104_v42 = vld [vmem:[%s3552_s0 + $0x20] sm:$0xff]  }
   0xf   :  { %343 = vmatpush1.bf16.msra.mxu1 %v2069_v15  ;;  %v2105_v43 = vld [vmem:[%s3552_s0 + $0xd0] sm:$0xff]   ;;  %v2106_v44 = vld [vmem:[%s3552_s0 + $0x28] sm:$0xff]   ;;  %v2107_v45 = vld [vmem:[%s3552_s0 + $0xd8] sm:$0xff]  }
  0x10   :  { %792 = vmatpush1.bf16.msra.mxu0 %v2070_v16  ;;  %344 = vmatprep.subr.bf16.mxu1 %v2071_v17  ;;  %v2108_v46 = vld [vmem:[%s3552_s0 + $0x30] sm:$0xff]   ;;  %v2109_v47 = vld [vmem:[%s3552_s0 + $0xe0] sm:$0xff]   ;;  %v2110_v48 = vld [vmem:[%s3552_s0 + $0x38] sm:$0xff]  }
  0x11   :  { %793 = vmatprep.subr.bf16.mxu0 %v2073_v18  ;;  %v2111_v49 = vld [vmem:[%s3552_s0 + $0xe8] sm:$0xff]   ;;  %v2112_v50 = vld [vmem:[%s3552_s0 + $0x40] sm:$0xff]   ;;  %v2113_v51 = vld [vmem:[%s3552_s0 + $0xf0] sm:$0xff]  }
  0x12   :  { %v2114_v52 = vld [vmem:[%s3552_s0 + $0x48] sm:$0xff]   ;;  %v2115_v53 = vld [vmem:[%s3552_s0 + $0xf8] sm:$0xff]   ;;  %v2116_v54 = vld [vmem:[%s3552_s0 + $0x50] sm:$0xff]  }
  0x13   :  { %345 = vmatpush1.bf16.msra.mxu1 %v2075_v19  ;;  %v2117_v55 = vld [vmem:[%s3552_s0 + $0x100] sm:$0xff]   ;;  %v2118_v56 = vld [vmem:[%s3552_s0 + $0x58] sm:$0xff]   ;;  %v2119_v57 = vld [vmem:[%s3552_s0 + $0x108] sm:$0xff]  }
  0x14   :  { %794 = vmatpush1.bf16.msra.mxu0 %v2076_v20  ;;  %346 = vmatprep.subr.bf16.mxu1 %v2077_v21  ;;  %v2120_v58 = vld [vmem:[%s3552_s0 + $0x60] sm:$0xff]   ;;  %v2121_v59 = vld [vmem:[%s3552_s0 + $0x110] sm:$0xff]   ;;  %v2122_v60 = vld [vmem:[%s3552_s0 + $0x68] sm:$0xff]  }
  0x15   :  { %795 = vmatprep.subr.bf16.mxu0 %v2079_v22  ;;  %v2123_v61 = vld [vmem:[%s3552_s0 + $0x118] sm:$0xff]   ;;  %v2124_v62 = vld [vmem:[%s3552_s0 + $0x70] sm:$0xff]   ;;  %v2125_v63 = vld [vmem:[%s3552_s0 + $0x120] sm:$0xff]  }
  0x16   :  { %v2126_v0 = vld [vmem:[%s3552_s0 + $0x78] sm:$0xff]   ;;  %v2127_v2 = vld [vmem:[%s3552_s0 + $0x128] sm:$0xff]   ;;  %v2128_v3 = vld [vmem:[%s3552_s0 + $0x80] sm:$0xff]  }
  0x17   :  { %347 = vmatpush1.bf16.msra.mxu1 %v2081_v23  ;;  %v2129_v4 = vld [vmem:[%s3552_s0 + $0x130] sm:$0xff]   ;;  %v2130_v5 = vld [vmem:[%s3552_s0 + $0x88] sm:$0xff]   ;;  %v2131_v6 = vld [vmem:[%s3552_s0 + $0x138] sm:$0xff]  }
  0x18   :  { %796 = vmatpush1.bf16.msra.mxu0 %v2082_v24  ;;  %348 = vmatprep.subr.bf16.mxu1 %v2083_v25  ;;  %v2132_v7 = vld [vmem:[%s3552_s0 + $0x90] sm:$0xff]   ;;  %v2133_v8 = vld [vmem:[%s3552_s0 + $0x140] sm:$0xff]   ;;  %v2134_v9 = vld [vmem:[%s3552_s0 + $0x98] sm:$0xff]  }
  0x19   :  { %797 = vmatprep.subr.bf16.mxu0 %v2085_v26  ;;  %v2135_v10 = vld [vmem:[%s3552_s0 + $0x148] sm:$0xff]   ;;  %v2136_v11 = vld [vmem:[%s3552_s0 + $0xa0] sm:$0xff]  }
  0x1b   :  { %349 = vmatpush1.bf16.msra.mxu1 %v2087_v27 }
  0x1c   :  { %798 = vmatpush1.bf16.msra.mxu0 %v2088_v28  ;;  %350 = vmatprep.subr.bf16.mxu1 %v2089_v29 }
  0x1d   :  { %799 = vmatprep.subr.bf16.mxu0 %v2091_v30 }
  0x1f   :  { %351 = vmatpush1.bf16.msra.mxu1 %v2093_v31 }
  0x20   :  { %800 = vmatpush1.bf16.msra.mxu0 %v2094_v32 }
  0x22   :  { %369 = vmatmul.mubr.bf16.vlgmr.msra.gmra.mrb[0].mxu1 %v2095_v33 }
  0x23   :  { %818 = vmatmul.mubr.bf16.vlgmr.msra.gmra.mrb[0].mxu0 %v2096_v34  ;;  %378 = vmatprep.mubr.bf16.mxu1 %v2389_v1 }
  0x24   :  { %827 = vmatprep.mubr.bf16.mxu0 %v2389_v1 }
  0x2a   :  { %379 = vmatmul.mubr.bf16.gmra.mrb[4].mxu1 %v2097_v35 }
  0x2b   :  { %828 = vmatmul.mubr.bf16.gmra.mrb[4].mxu0 %v2098_v36  ;;  %388 = vmatprep.mubr.bf16.mxu1 %v2389_v1 }
  0x2c   :  { %837 = vmatprep.mubr.bf16.mxu0 %v2389_v1 }
  0x32   :  { %389 = vmatmul.mubr.bf16.gmra.mrb[8].mxu1 %v2099_v37 }
  0x33   :  { %838 = vmatmul.mubr.bf16.gmra.mrb[8].mxu0 %v2100_v38  ;;  %398 = vmatprep.mubr.bf16.mxu1 %v2389_v1 }
  0x34   :  { %847 = vmatprep.mubr.bf16.mxu0 %v2389_v1 }
  0x3a   :  { %399 = vmatmul.mubr.bf16.gmra.mrb[12].mxu1 %v2101_v39 }
  0x3b   :  { %848 = vmatmul.mubr.bf16.gmra.mrb[12].mxu0 %v2102_v40  ;;  %408 = vmatprep.mubr.bf16.mxu1 %v2389_v1 }
  0x3c   :  { %857 = vmatprep.mubr.bf16.mxu0 %v2389_v1 }
  0x42   :  { %409 = vmatmul.mubr.bf16.gmra.mrb[16].mxu1 %v2103_v41 }
  0x43   :  { %858 = vmatmul.mubr.bf16.gmra.mrb[16].mxu0 %v2104_v42  ;;  %418 = vmatprep.mubr.bf16.mxu1 %v2389_v1 }
  0x44   :  { %867 = vmatprep.mubr.bf16.mxu0 %v2389_v1 }
  0x4a   :  { %419 = vmatmul.mubr.bf16.gmra.mrb[20].mxu1 %v2105_v43 }
  0x4b   :  { %868 = vmatmul.mubr.bf16.gmra.mrb[20].mxu0 %v2106_v44  ;;  %428 = vmatprep.mubr.bf16.mxu1 %v2389_v1 }
  0x4c   :  { %877 = vmatprep.mubr.bf16.mxu0 %v2389_v1 }
  0x52   :  { %429 = vmatmul.mubr.bf16.gmra.mrb[24].mxu1 %v2107_v45 }
  0x53   :  { %878 = vmatmul.mubr.bf16.gmra.mrb[24].mxu0 %v2108_v46  ;;  %438 = vmatprep.mubr.bf16.mxu1 %v2389_v1 }
  0x54   :  { %887 = vmatprep.mubr.bf16.mxu0 %v2389_v1 }
  0x5a   :  { %439 = vmatmul.mubr.bf16.gmra.mrb[28].mxu1 %v2109_v47 }
  0x5b   :  { %888 = vmatmul.mubr.bf16.gmra.mrb[28].mxu0 %v2110_v48  ;;  %448 = vmatprep.mubr.bf16.mxu1 %v2389_v1 }
  0x5c   :  { %897 = vmatprep.mubr.bf16.mxu0 %v2389_v1 }
  0x62   :  { %449 = vmatmul.mubr.bf16.gmra.mrb[32].mxu1 %v2111_v49 }
  0x63   :  { %898 = vmatmul.mubr.bf16.gmra.mrb[32].mxu0 %v2112_v50  ;;  %458 = vmatprep.mubr.bf16.mxu1 %v2389_v1 }
  0x64   :  { %907 = vmatprep.mubr.bf16.mxu0 %v2389_v1 }
  0x6a   :  { %459 = vmatmul.mubr.bf16.gmra.mrb[36].mxu1 %v2113_v51 }
  0x6b   :  { %908 = vmatmul.mubr.bf16.gmra.mrb[36].mxu0 %v2114_v52  ;;  %468 = vmatprep.mubr.bf16.mxu1 %v2389_v1 }
  0x6c   :  { %917 = vmatprep.mubr.bf16.mxu0 %v2389_v1 }
  0x72   :  { %469 = vmatmul.mubr.bf16.gmra.mrb[40].mxu1 %v2115_v53 }
  0x73   :  { %918 = vmatmul.mubr.bf16.gmra.mrb[40].mxu0 %v2116_v54  ;;  %478 = vmatprep.mubr.bf16.mxu1 %v2389_v1 }
  0x74   :  { %927 = vmatprep.mubr.bf16.mxu0 %v2389_v1 }
  0x7a   :  { %479 = vmatmul.mubr.bf16.gmra.mrb[44].mxu1 %v2117_v55 }
  0x7b   :  { %928 = vmatmul.mubr.bf16.gmra.mrb[44].mxu0 %v2118_v56  ;;  %488 = vmatprep.mubr.bf16.mxu1 %v2389_v1 }
  0x7c   :  { %937 = vmatprep.mubr.bf16.mxu0 %v2389_v1 }
  0x82   :  { %489 = vmatmul.mubr.bf16.gmra.mrb[48].mxu1 %v2119_v57 }
  0x83   :  { %938 = vmatmul.mubr.bf16.gmra.mrb[48].mxu0 %v2120_v58  ;;  %498 = vmatprep.mubr.bf16.mxu1 %v2389_v1 }
  0x84   :  { %947 = vmatprep.mubr.bf16.mxu0 %v2389_v1 }
  0x8a   :  { %499 = vmatmul.mubr.bf16.gmra.mrb[52].mxu1 %v2121_v59 }
  0x8b   :  { %948 = vmatmul.mubr.bf16.gmra.mrb[52].mxu0 %v2122_v60  ;;  %508 = vmatprep.mubr.bf16.mxu1 %v2389_v1 }
  0x8c   :  { %957 = vmatprep.mubr.bf16.mxu0 %v2389_v1 }
  0x92   :  { %509 = vmatmul.mubr.bf16.gmra.mrb[56].mxu1 %v2123_v61 }
  0x93   :  { %958 = vmatmul.mubr.bf16.gmra.mrb[56].mxu0 %v2124_v62  ;;  %518 = vmatprep.mubr.bf16.mxu1 %v2389_v1 }
  0x94   :  { %967 = vmatprep.mubr.bf16.mxu0 %v2389_v1 }
  0x9a   :  { %519 = vmatmul.mubr.bf16.gmra.mrb[60].mxu1 %v2125_v63 }
  0x9b   :  { %968 = vmatmul.mubr.bf16.gmra.mrb[60].mxu0 %v2126_v0  ;;  %528 = vmatprep.mubr.bf16.mxu1 %v2389_v1 }
  0x9c   :  { %977 = vmatprep.mubr.bf16.mxu0 %v2389_v1 }
  0xa2   :  { %529 = vmatmul.mubr.bf16.gmra.mrb[64].mxu1 %v2127_v2 }
  0xa3   :  { %978 = vmatmul.mubr.bf16.gmra.mrb[64].mxu0 %v2128_v3  ;;  %538 = vmatprep.mubr.bf16.mxu1 %v2389_v1 }
  0xa4   :  { %987 = vmatprep.mubr.bf16.mxu0 %v2389_v1 }
  0xaa   :  { %539 = vmatmul.mubr.bf16.gmra.mrb[68].mxu1 %v2129_v4 }
  0xab   :  { %988 = vmatmul.mubr.bf16.gmra.mrb[68].mxu0 %v2130_v5  ;;  %548 = vmatprep.mubr.bf16.mxu1 %v2389_v1 }
  0xac   :  { %997 = vmatprep.mubr.bf16.mxu0 %v2389_v1 }
  0xb2   :  { %549 = vmatmul.mubr.bf16.gmra.mrb[72].mxu1 %v2131_v6 }
  0xb3   :  { %998 = vmatmul.mubr.bf16.gmra.mrb[72].mxu0 %v2132_v7  ;;  %558 = vmatprep.mubr.bf16.mxu1 %v2389_v1 }
  0xb4   :  { %1007 = vmatprep.mubr.bf16.mxu0 %v2389_v1 }
  0xba   :  { %559 = vmatmul.mubr.bf16.gmra.mrb[76].mxu1 %v2133_v8 }
  0xbb   :  { %1008 = vmatmul.mubr.bf16.gmra.mrb[76].mxu0 %v2134_v9  ;;  %568 = vmatprep.mubr.bf16.mxu1 %v2389_v1 }
  0xbc   :  { %1017 = vmatprep.mubr.bf16.mxu0 %v2389_v1 }
  0xc2   :  { %569 = vmatmul.mubr.bf16.gmra.mrb[80].mxu1 %v2135_v10 }
  0xc3   :  { %1018 = vmatmul.mubr.bf16.gmra.mrb[80].mxu0 %v2136_v11 }
  0xf5   :  { %v370_v12 = vpop.f32.mrb[0].mxu1 }
  0xf6   :  { %v819_v13 = vpop.f32.mrb[0].mxu0  ;;  %v372_v15 = vpop.f32.mrb[1].mxu1 }
  0xf7   :  { %v2669_v14 = vadd.f32 %v819_v13, %v370_v12  ;;  %v821_v16 = vpop.f32.mrb[1].mxu0  ;;  %v374_v18 = vpop.f32.mrb[2].mxu1 }
  0xf8   :  { %v2671_v17 = vadd.f32 %v821_v16, %v372_v15  ;;  %v823_v1 = vpop.f32.mrb[2].mxu0  ;;  %v376_v20 = vpop.f32.mrb[3].mxu1 }
  0xf9   :  { %3668 = vst [vmem:[#allocation2_spill] sm:$0xff] %v2669_v14  ;;  %v2673_v19 = vadd.f32 %v823_v1, %v374_v18  ;;  %v825_v21 = vpop.f32.mrb[3].mxu0 }
  0xfa   :  { %3669 = vst [vmem:[#allocation3_spill] sm:$0xff] %v2671_v17  ;;  %v2675_v22 = vadd.f32 %v825_v21, %v376_v20  ;;  %v1028_v23 = vmax.f32 %v2669_v14, %v2671_v17 }
  0xfb   :  { %3670 = vst [vmem:[#allocation4_spill] sm:$0xff] %v2673_v19 }
  0xfc   :  { %3671 = vst [vmem:[#allocation5_spill] sm:$0xff] %v2675_v22  ;;  %1029 = vmax.xlane.f32.xlu0 %v1028_v23  ;;  %v1031_v26 = vmax.f32 %v2673_v19, %v2675_v22 }
  0xfd   :  { %v380_v24 = vpop.f32.mrb[4].mxu1 }
  0xfe   :  { %v829_v25 = vpop.f32.mrb[4].mxu0  ;;  %v382_v28 = vpop.f32.mrb[5].mxu1 }
  0xff   :  { %v2681_v27 = vadd.f32 %v829_v25, %v380_v24  ;;  %v831_v29 = vpop.f32.mrb[5].mxu0  ;;  %v384_v31 = vpop.f32.mrb[6].mxu1 }
 0x100   :  { %v2683_v30 = vadd.f32 %v831_v29, %v382_v28  ;;  %v833_v32 = vpop.f32.mrb[6].mxu0  ;;  %1032 = vmax.xlane.f32.xlu0 %v1031_v26  ;;  %v386_v34 = vpop.f32.mrb[7].mxu1 }
 0x101   :  { %3672 = vst [vmem:[#allocation6_spill] sm:$0xff] %v2681_v27  ;;  %v2685_v33 = vadd.f32 %v833_v32, %v384_v31  ;;  %v835_v35 = vpop.f32.mrb[7].mxu0 }
 0x102   :  { %3673 = vst [vmem:[#allocation7_spill] sm:$0xff] %v2683_v30  ;;  %v2687_v36 = vadd.f32 %v835_v35, %v386_v34  ;;  %v1034_v37 = vmax.f32 %v2681_v27, %v2683_v30 }
 0x103   :  { %3674 = vst [vmem:[#allocation8_spill] sm:$0xff] %v2685_v33 }
 0x104   :  { %3675 = vst [vmem:[#allocation9_spill] sm:$0xff] %v2687_v36  ;;  %1035 = vmax.xlane.f32.xlu1 %v1034_v37  ;;  %v1037_v40 = vmax.f32 %v2685_v33, %v2687_v36 }
 0x105   :  { %v390_v38 = vpop.f32.mrb[8].mxu1 }
 0x106   :  { %v839_v39 = vpop.f32.mrb[8].mxu0  ;;  %v392_v42 = vpop.f32.mrb[9].mxu1 }
 0x107   :  { %v2693_v41 = vadd.f32 %v839_v39, %v390_v38  ;;  %v841_v43 = vpop.f32.mrb[9].mxu0  ;;  %v394_v45 = vpop.f32.mrb[10].mxu1 }
 0x108   :  { %v2695_v44 = vadd.f32 %v841_v43, %v392_v42  ;;  %v843_v46 = vpop.f32.mrb[10].mxu0  ;;  %1038 = vmax.xlane.f32.xlu1 %v1037_v40  ;;  %v396_v48 = vpop.f32.mrb[11].mxu1 }
 0x109   :  { %3676 = vst [vmem:[#allocation10_spill] sm:$0xff] %v2693_v41  ;;  %v2697_v47 = vadd.f32 %v843_v46, %v394_v45  ;;  %v845_v49 = vpop.f32.mrb[11].mxu0 }
 0x10a   :  { %3677 = vst [vmem:[#allocation11_spill] sm:$0xff] %v2695_v44  ;;  %v2699_v50 = vadd.f32 %v845_v49, %v396_v48  ;;  %v1040_v51 = vmax.f32 %v2693_v41, %v2695_v44 }
 0x10b   :  { %3678 = vst [vmem:[#allocation12_spill] sm:$0xff] %v2697_v47 }
 0x10c   :  { %3679 = vst [vmem:[#allocation13_spill] sm:$0xff] %v2699_v50  ;;  %1041 = vmax.xlane.f32.xlu0 %v1040_v51  ;;  %v1043_v52 = vmax.f32 %v2697_v47, %v2699_v50 }
 0x10d   :  { %v400_v53 = vpop.f32.mrb[12].mxu1 }
 0x10e   :  { %v849_v54 = vpop.f32.mrb[12].mxu0  ;;  %1044 = vmax.xlane.f32.xlu1 %v1043_v52  ;;  %v402_v56 = vpop.f32.mrb[13].mxu1 }
 0x10f   :  { %v2705_v55 = vadd.f32 %v849_v54, %v400_v53  ;;  %v851_v57 = vpop.f32.mrb[13].mxu0  ;;  %v404_v59 = vpop.f32.mrb[14].mxu1 }
 0x110   :  { %v2707_v58 = vadd.f32 %v851_v57, %v402_v56  ;;  %v853_v60 = vpop.f32.mrb[14].mxu0  ;;  %v406_v62 = vpop.f32.mrb[15].mxu1 }
 0x111   :  { %v2709_v61 = vadd.f32 %v853_v60, %v404_v59  ;;  %v855_v63 = vpop.f32.mrb[15].mxu0 }
 0x112   :  { %v2711_v0 = vadd.f32 %v855_v63, %v406_v62  ;;  %v1046_v2 = vmax.f32 %v2705_v55, %v2707_v58 }
 0x114   :  { %1047 = vmax.xlane.f32.xlu0 %v1046_v2  ;;  %v1049_v3 = vmax.f32 %v2709_v61, %v2711_v0 }
 0x115   :  { %v410_v4 = vpop.f32.mrb[16].mxu1 }
 0x116   :  { %v859_v5 = vpop.f32.mrb[16].mxu0  ;;  %1050 = vmax.xlane.f32.xlu1 %v1049_v3  ;;  %v412_v7 = vpop.f32.mrb[17].mxu1 }
 0x117   :  { %v2717_v6 = vadd.f32 %v859_v5, %v410_v4  ;;  %v861_v8 = vpop.f32.mrb[17].mxu0  ;;  %v414_v10 = vpop.f32.mrb[18].mxu1 }
 0x118   :  { %v2719_v9 = vadd.f32 %v861_v8, %v412_v7  ;;  %v863_v11 = vpop.f32.mrb[18].mxu0  ;;  %v416_v13 = vpop.f32.mrb[19].mxu1 }
 0x119   :  { %v2721_v12 = vadd.f32 %v863_v11, %v414_v10  ;;  %v865_v15 = vpop.f32.mrb[19].mxu0 }
 0x11a   :  { %3680 = vst [vmem:[#allocation14_spill] sm:$0xff] %v2719_v9  ;;  %v2723_v16 = vadd.f32 %v865_v15, %v416_v13  ;;  %v1052_v18 = vmax.f32 %v2717_v6, %v2719_v9 }
 0x11c   :  { %1053 = vmax.xlane.f32.xlu0 %v1052_v18  ;;  %v1055_v1 = vmax.f32 %v2721_v12, %v2723_v16 }
 0x11d   :  { %v420_v20 = vpop.f32.mrb[20].mxu1 }
 0x11e   :  { %v869_v21 = vpop.f32.mrb[20].mxu0  ;;  %1056 = vmax.xlane.f32.xlu1 %v1055_v1  ;;  %v422_v24 = vpop.f32.mrb[21].mxu1 }
 0x11f   :  { %v2729_v23 = vadd.f32 %v869_v21, %v420_v20  ;;  %v871_v25 = vpop.f32.mrb[21].mxu0  ;;  %v424_v28 = vpop.f32.mrb[22].mxu1 }
 0x120   :  { %v2731_v26 = vadd.f32 %v871_v25, %v422_v24  ;;  %v873_v29 = vpop.f32.mrb[22].mxu0  ;;  %v426_v32 = vpop.f32.mrb[23].mxu1 }
 0x121   :  { %v2733_v31 = vadd.f32 %v873_v29, %v424_v28  ;;  %v875_v34 = vpop.f32.mrb[23].mxu0 }
 0x122   :  { %3681 = vst [vmem:[#allocation15_spill] sm:$0xff] %v2731_v26  ;;  %v2735_v35 = vadd.f32 %v875_v34, %v426_v32  ;;  %v1058_v37 = vmax.f32 %v2729_v23, %v2731_v26 }
 0x124   :  { %3682 = vst [vmem:[#allocation16_spill] sm:$0xff] %v2735_v35  ;;  %1059 = vmax.xlane.f32.xlu0 %v1058_v37  ;;  %v1061_v38 = vmax.f32 %v2733_v31, %v2735_v35 }
 0x125   :  { %v430_v39 = vpop.f32.mrb[24].mxu1 }
 0x126   :  { %v879_v40 = vpop.f32.mrb[24].mxu0  ;;  %1062 = vmax.xlane.f32.xlu1 %v1061_v38  ;;  %v432_v43 = vpop.f32.mrb[25].mxu1 }
 0x127   :  { %v2741_v42 = vadd.f32 %v879_v40, %v430_v39  ;;  %v881_v45 = vpop.f32.mrb[25].mxu0  ;;  %v434_v48 = vpop.f32.mrb[26].mxu1 }
 0x128   :  { %v2743_v46 = vadd.f32 %v881_v45, %v432_v43  ;;  %v883_v49 = vpop.f32.mrb[26].mxu0  ;;  %v436_v52 = vpop.f32.mrb[27].mxu1 }
 0x129   :  { %v2745_v51 = vadd.f32 %v883_v49, %v434_v48  ;;  %v885_v53 = vpop.f32.mrb[27].mxu0 }
 0x12a   :  { %3683 = vst [vmem:[#allocation17_spill] sm:$0xff] %v2743_v46  ;;  %v2747_v54 = vadd.f32 %v885_v53, %v436_v52  ;;  %v1064_v56 = vmax.f32 %v2741_v42, %v2743_v46 }
 0x12c   :  { %3684 = vst [vmem:[#allocation18_spill] sm:$0xff] %v2747_v54  ;;  %1065 = vmax.xlane.f32.xlu0 %v1064_v56  ;;  %v1067_v57 = vmax.f32 %v2745_v51, %v2747_v54 }
 0x12d   :  { %v440_v59 = vpop.f32.mrb[28].mxu1 }
 0x12e   :  { %v889_v60 = vpop.f32.mrb[28].mxu0  ;;  %1068 = vmax.xlane.f32.xlu1 %v1067_v57  ;;  %v442_v63 = vpop.f32.mrb[29].mxu1 }
 0x12f   :  { %v2753_v62 = vadd.f32 %v889_v60, %v440_v59  ;;  %v891_v2 = vpop.f32.mrb[29].mxu0  ;;  %v444_v4 = vpop.f32.mrb[30].mxu1 }
 0x130   :  { %v2755_v3 = vadd.f32 %v891_v2, %v442_v63  ;;  %v893_v5 = vpop.f32.mrb[30].mxu0  ;;  %v446_v8 = vpop.f32.mrb[31].mxu1 }
 0x131   :  { %v2757_v7 = vadd.f32 %v893_v5, %v444_v4  ;;  %v895_v10 = vpop.f32.mrb[31].mxu0 }
 0x132   :  { %3685 = vst [vmem:[#allocation19_spill] sm:$0xff] %v2755_v3  ;;  %v2759_v11 = vadd.f32 %v895_v10, %v446_v8  ;;  %v1070_v13 = vmax.f32 %v2753_v62, %v2755_v3 }
 0x134   :  { %3686 = vst [vmem:[#allocation20_spill] sm:$0xff] %v2759_v11  ;;  %1071 = vmax.xlane.f32.xlu0 %v1070_v13  ;;  %v1073_v15 = vmax.f32 %v2757_v7, %v2759_v11 }
 0x135   :  { %v450_v18 = vpop.f32.mrb[32].mxu1 }
 0x136   :  { %v899_v1 = vpop.f32.mrb[32].mxu0  ;;  %1074 = vmax.xlane.f32.xlu1 %v1073_v15  ;;  %v452_v21 = vpop.f32.mrb[33].mxu1 }
 0x137   :  { %v2765_v20 = vadd.f32 %v899_v1, %v450_v18  ;;  %v901_v24 = vpop.f32.mrb[33].mxu0  ;;  %v454_v28 = vpop.f32.mrb[34].mxu1 }
 0x138   :  { %v2767_v25 = vadd.f32 %v901_v24, %v452_v21  ;;  %v903_v29 = vpop.f32.mrb[34].mxu0  ;;  %v456_v34 = vpop.f32.mrb[35].mxu1 }
 0x139   :  { %v2769_v32 = vadd.f32 %v903_v29, %v454_v28  ;;  %v905_v37 = vpop.f32.mrb[35].mxu0 }
 0x13a   :  { %3687 = vst [vmem:[#allocation21_spill] sm:$0xff] %v2767_v25  ;;  %v2771_v38 = vadd.f32 %v905_v37, %v456_v34  ;;  %v1076_v39 = vmax.f32 %v2765_v20, %v2767_v25 }
 0x13c   :  { %3688 = vst [vmem:[#allocation22_spill] sm:$0xff] %v2771_v38  ;;  %1077 = vmax.xlane.f32.xlu0 %v1076_v39  ;;  %v1079_v40 = vmax.f32 %v2769_v32, %v2771_v38 }
 0x13d   :  { %v460_v43 = vpop.f32.mrb[36].mxu1 }
 0x13e   :  { %v909_v45 = vpop.f32.mrb[36].mxu0  ;;  %1080 = vmax.xlane.f32.xlu1 %v1079_v40  ;;  %v462_v49 = vpop.f32.mrb[37].mxu1 }
 0x13f   :  { %v2777_v48 = vadd.f32 %v909_v45, %v460_v43  ;;  %v911_v52 = vpop.f32.mrb[37].mxu0  ;;  %v464_v56 = vpop.f32.mrb[38].mxu1 }
 0x140   :  { %v2779_v53 = vadd.f32 %v911_v52, %v462_v49  ;;  %v913_v57 = vpop.f32.mrb[38].mxu0  ;;  %v466_v60 = vpop.f32.mrb[39].mxu1 }
 0x141   :  { %v2781_v59 = vadd.f32 %v913_v57, %v464_v56  ;;  %v915_v63 = vpop.f32.mrb[39].mxu0 }
 0x142   :  { %3689 = vst [vmem:[#allocation23_spill] sm:$0xff] %v2779_v53  ;;  %v2783_v2 = vadd.f32 %v915_v63, %v466_v60  ;;  %v1082_v4 = vmax.f32 %v2777_v48, %v2779_v53 }
 0x144   :  { %3690 = vst [vmem:[#allocation24_spill] sm:$0xff] %v2783_v2  ;;  %1083 = vmax.xlane.f32.xlu0 %v1082_v4  ;;  %v1085_v5 = vmax.f32 %v2781_v59, %v2783_v2 }
 0x145   :  { %v470_v8 = vpop.f32.mrb[40].mxu1 }
 0x146   :  { %v919_v10 = vpop.f32.mrb[40].mxu0  ;;  %1086 = vmax.xlane.f32.xlu1 %v1085_v5  ;;  %v472_v15 = vpop.f32.mrb[41].mxu1 }
 0x147   :  { %v2789_v13 = vadd.f32 %v919_v10, %v470_v8  ;;  %v921_v18 = vpop.f32.mrb[41].mxu0  ;;  %v474_v21 = vpop.f32.mrb[42].mxu1 }
 0x148   :  { %v2791_v1 = vadd.f32 %v921_v18, %v472_v15  ;;  %v923_v24 = vpop.f32.mrb[42].mxu0  ;;  %v476_v29 = vpop.f32.mrb[43].mxu1 }
 0x149   :  { %v2793_v28 = vadd.f32 %v923_v24, %v474_v21  ;;  %v925_v34 = vpop.f32.mrb[43].mxu0 }
 0x14a   :  { %3691 = vst [vmem:[#allocation25_spill] sm:$0xff] %v2791_v1  ;;  %v2795_v37 = vadd.f32 %v925_v34, %v476_v29  ;;  %v1088_v39 = vmax.f32 %v2789_v13, %v2791_v1 }
 0x14c   :  { %3692 = vst [vmem:[#allocation26_spill] sm:$0xff] %v2795_v37  ;;  %1089 = vmax.xlane.f32.xlu0 %v1088_v39  ;;  %v1091_v40 = vmax.f32 %v2793_v28, %v2795_v37 }
 0x14d   :  { %v480_v43 = vpop.f32.mrb[44].mxu1 }
 0x14e   :  { %v929_v45 = vpop.f32.mrb[44].mxu0  ;;  %1092 = vmax.xlane.f32.xlu1 %v1091_v40  ;;  %v482_v52 = vpop.f32.mrb[45].mxu1 }
 0x14f   :  { %v2801_v49 = vadd.f32 %v929_v45, %v480_v43  ;;  %v931_v56 = vpop.f32.mrb[45].mxu0  ;;  %v484_v60 = vpop.f32.mrb[46].mxu1 }
 0x150   :  { %v2803_v57 = vadd.f32 %v931_v56, %v482_v52  ;;  %v933_v63 = vpop.f32.mrb[46].mxu0  ;;  %v486_v5 = vpop.f32.mrb[47].mxu1 }
 0x151   :  { %3693 = vst [vmem:[#allocation27_spill] sm:$0xff] %v2801_v49  ;;  %v2805_v4 = vadd.f32 %v933_v63, %v484_v60  ;;  %v935_v8 = vpop.f32.mrb[47].mxu0 }
 0x152   :  { %3694 = vst [vmem:[#allocation28_spill] sm:$0xff] %v2803_v57  ;;  %v2807_v10 = vadd.f32 %v935_v8, %v486_v5  ;;  %v1094_v15 = vmax.f32 %v2801_v49, %v2803_v57 }
 0x153   :  { %3695 = vst [vmem:[#allocation29_spill] sm:$0xff] %v2805_v4 }
 0x154   :  { %3696 = vst [vmem:[#allocation30_spill] sm:$0xff] %v2807_v10  ;;  %1095 = vmax.xlane.f32.xlu0 %v1094_v15  ;;  %v1097_v18 = vmax.f32 %v2805_v4, %v2807_v10 }
 0x155   :  { %v490_v21 = vpop.f32.mrb[48].mxu1 }
 0x156   :  { %v939_v24 = vpop.f32.mrb[48].mxu0  ;;  %1098 = vmax.xlane.f32.xlu1 %v1097_v18  ;;  %v492_v34 = vpop.f32.mrb[49].mxu1 }
 0x157   :  { %v2813_v29 = vadd.f32 %v939_v24, %v490_v21  ;;  %v941_v39 = vpop.f32.mrb[49].mxu0  ;;  %v494_v43 = vpop.f32.mrb[50].mxu1 }
 0x158   :  { %v2815_v40 = vadd.f32 %v941_v39, %v492_v34  ;;  %v943_v45 = vpop.f32.mrb[50].mxu0  ;;  %v496_v56 = vpop.f32.mrb[51].mxu1 }
 0x159   :  { %3697 = vst [vmem:[#allocation31_spill] sm:$0xff] %v2813_v29  ;;  %v2817_v52 = vadd.f32 %v943_v45, %v494_v43  ;;  %v945_v60 = vpop.f32.mrb[51].mxu0 }
 0x15a   :  { %3698 = vst [vmem:[#allocation32_spill] sm:$0xff] %v2815_v40  ;;  %v2819_v63 = vadd.f32 %v945_v60, %v496_v56  ;;  %v1100_v5 = vmax.f32 %v2813_v29, %v2815_v40 }
 0x15b   :  { %3699 = vst [vmem:[#allocation33_spill] sm:$0xff] %v2817_v52 }
 0x15c   :  { %3700 = vst [vmem:[#allocation34_spill] sm:$0xff] %v2819_v63  ;;  %1101 = vmax.xlane.f32.xlu0 %v1100_v5  ;;  %v1103_v8 = vmax.f32 %v2817_v52, %v2819_v63 }
 0x15d   :  { %v500_v15 = vpop.f32.mrb[52].mxu1 }
 0x15e   :  { %v949_v18 = vpop.f32.mrb[52].mxu0  ;;  %1104 = vmax.xlane.f32.xlu1 %v1103_v8  ;;  %v502_v24 = vpop.f32.mrb[53].mxu1 }
 0x15f   :  { %v2825_v21 = vadd.f32 %v949_v18, %v500_v15  ;;  %v951_v34 = vpop.f32.mrb[53].mxu0  ;;  %v504_v43 = vpop.f32.mrb[54].mxu1 }
 0x160   :  { %v2827_v39 = vadd.f32 %v951_v34, %v502_v24  ;;  %v953_v45 = vpop.f32.mrb[54].mxu0  ;;  %v506_v60 = vpop.f32.mrb[55].mxu1 }
 0x161   :  { %3701 = vst [vmem:[#allocation35_spill] sm:$0xff] %v2825_v21  ;;  %v2829_v56 = vadd.f32 %v953_v45, %v504_v43  ;;  %v955_v10 = vpop.f32.mrb[55].mxu0 }
 0x162   :  { %3702 = vst [vmem:[#allocation36_spill] sm:$0xff] %v2827_v39  ;;  %v2831_v40 = vadd.f32 %v955_v10, %v506_v60  ;;  %v1106_v5 = vmax.f32 %v2825_v21, %v2827_v39 }
 0x163   :  { %3703 = vst [vmem:[#allocation37_spill] sm:$0xff] %v2829_v56 }
 0x164   :  { %3704 = vst [vmem:[#allocation38_spill] sm:$0xff] %v2831_v40  ;;  %1107 = vmax.xlane.f32.xlu0 %v1106_v5  ;;  %v1109_v8 = vmax.f32 %v2829_v56, %v2831_v40 }
 0x165   :  { %v510_v15 = vpop.f32.mrb[56].mxu1 }
 0x166   :  { %v959_v18 = vpop.f32.mrb[56].mxu0  ;;  %1110 = vmax.xlane.f32.xlu1 %v1109_v8  ;;  %v512_v34 = vpop.f32.mrb[57].mxu1 }
 0x167   :  { %v2837_v24 = vadd.f32 %v959_v18, %v510_v15  ;;  %v961_v63 = vpop.f32.mrb[57].mxu0  ;;  %v514_v45 = vpop.f32.mrb[58].mxu1 }
 0x168   :  { %v2839_v43 = vadd.f32 %v961_v63, %v512_v34  ;;  %v963_v52 = vpop.f32.mrb[58].mxu0  ;;  %v516_v60 = vpop.f32.mrb[59].mxu1 }
 0x169   :  { %3705 = vst [vmem:[#allocation39_spill] sm:$0xff] %v2837_v24  ;;  %v2841_v10 = vadd.f32 %v963_v52, %v514_v45  ;;  %v965_v29 = vpop.f32.mrb[59].mxu0 }
 0x16a   :  { %3706 = vst [vmem:[#allocation40_spill] sm:$0xff] %v2839_v43  ;;  %v2843_v39 = vadd.f32 %v965_v29, %v516_v60  ;;  %v1112_v5 = vmax.f32 %v2837_v24, %v2839_v43 }
 0x16b   :  { %3707 = vst [vmem:[#allocation41_spill] sm:$0xff] %v2841_v10 }
 0x16c   :  { %3708 = vst [vmem:[#allocation42_spill] sm:$0xff] %v2843_v39  ;;  %1113 = vmax.xlane.f32.xlu0 %v1112_v5  ;;  %v1115_v8 = vmax.f32 %v2841_v10, %v2843_v39 }
 0x16d   :  { %v520_v15 = vpop.f32.mrb[60].mxu1 }
 0x16e   :  { %v969_v18 = vpop.f32.mrb[60].mxu0  ;;  %1116 = vmax.xlane.f32.xlu1 %v1115_v8  ;;  %v522_v34 = vpop.f32.mrb[61].mxu1 }
 0x16f   :  { %v2849_v63 = vadd.f32 %v969_v18, %v520_v15  ;;  %v971_v40 = vpop.f32.mrb[61].mxu0  ;;  %v524_v45 = vpop.f32.mrb[62].mxu1 }
 0x170   :  { %v2851_v52 = vadd.f32 %v971_v40, %v522_v34  ;;  %v973_v56 = vpop.f32.mrb[62].mxu0  ;;  %v526_v60 = vpop.f32.mrb[63].mxu1 }
 0x171   :  { %3709 = vst [vmem:[#allocation43_spill] sm:$0xff] %v2849_v63  ;;  %v2853_v29 = vadd.f32 %v973_v56, %v524_v45  ;;  %v975_v21 = vpop.f32.mrb[63].mxu0 }
 0x172   :  { %3710 = vst [vmem:[#allocation44_spill] sm:$0xff] %v2851_v52  ;;  %v2855_v43 = vadd.f32 %v975_v21, %v526_v60  ;;  %v1118_v5 = vmax.f32 %v2849_v63, %v2851_v52 }
 0x173   :  { %3711 = vst [vmem:[#allocation45_spill] sm:$0xff] %v2853_v29 }
 0x174   :  { %3712 = vst [vmem:[#allocation46_spill] sm:$0xff] %v2855_v43  ;;  %1119 = vmax.xlane.f32.xlu0 %v1118_v5  ;;  %v1121_v8 = vmax.f32 %v2853_v29, %v2855_v43 }
 0x175   :  { %v530_v15 = vpop.f32.mrb[64].mxu1 }
 0x176   :  { %v979_v18 = vpop.f32.mrb[64].mxu0  ;;  %1122 = vmax.xlane.f32.xlu1 %v1121_v8  ;;  %v532_v34 = vpop.f32.mrb[65].mxu1 }
 0x177   :  { %v2861_v40 = vadd.f32 %v979_v18, %v530_v15  ;;  %v981_v39 = vpop.f32.mrb[65].mxu0  ;;  %v534_v45 = vpop.f32.mrb[66].mxu1 }
 0x178   :  { %v2863_v56 = vadd.f32 %v981_v39, %v532_v34  ;;  %v983_v10 = vpop.f32.mrb[66].mxu0  ;;  %v536_v60 = vpop.f32.mrb[67].mxu1 }
 0x179   :  { %3713 = vst [vmem:[#allocation47_spill] sm:$0xff] %v2861_v40  ;;  %v2865_v21 = vadd.f32 %v983_v10, %v534_v45  ;;  %v985_v24 = vpop.f32.mrb[67].mxu0 }
 0x17a   :  { %3714 = vst [vmem:[#allocation48_spill] sm:$0xff] %v2863_v56  ;;  %v2867_v52 = vadd.f32 %v985_v24, %v536_v60  ;;  %v1124_v5 = vmax.f32 %v2861_v40, %v2863_v56 }
 0x17b   :  { %3715 = vst [vmem:[#allocation49_spill] sm:$0xff] %v2865_v21 }
 0x17c   :  { %3716 = vst [vmem:[#allocation50_spill] sm:$0xff] %v2867_v52  ;;  %1125 = vmax.xlane.f32.xlu0 %v1124_v5  ;;  %v1127_v8 = vmax.f32 %v2865_v21, %v2867_v52 }
 0x17d   :  { %v540_v15 = vpop.f32.mrb[68].mxu1 }
 0x17e   :  { %v989_v18 = vpop.f32.mrb[68].mxu0  ;;  %1128 = vmax.xlane.f32.xlu1 %v1127_v8  ;;  %v542_v34 = vpop.f32.mrb[69].mxu1 }
 0x17f   :  { %v2873_v39 = vadd.f32 %v989_v18, %v540_v15  ;;  %v991_v43 = vpop.f32.mrb[69].mxu0  ;;  %v544_v45 = vpop.f32.mrb[70].mxu1 }
 0x180   :  { %v2875_v10 = vadd.f32 %v991_v43, %v542_v34  ;;  %v993_v29 = vpop.f32.mrb[70].mxu0  ;;  %v546_v60 = vpop.f32.mrb[71].mxu1 }
 0x181   :  { %3717 = vst [vmem:[#allocation51_spill] sm:$0xff] %v2873_v39  ;;  %v2877_v24 = vadd.f32 %v993_v29, %v544_v45  ;;  %v995_v63 = vpop.f32.mrb[71].mxu0 }
 0x182   :  { %3718 = vst [vmem:[#allocation52_spill] sm:$0xff] %v2875_v10  ;;  %v2879_v56 = vadd.f32 %v995_v63, %v546_v60  ;;  %v1130_v5 = vmax.f32 %v2873_v39, %v2875_v10 }
 0x183   :  { %3719 = vst [vmem:[#allocation53_spill] sm:$0xff] %v2877_v24 }
 0x184   :  { %3720 = vst [vmem:[#allocation54_spill] sm:$0xff] %v2879_v56  ;;  %1131 = vmax.xlane.f32.xlu0 %v1130_v5  ;;  %v1133_v8 = vmax.f32 %v2877_v24, %v2879_v56 }
 0x185   :  { %v550_v15 = vpop.f32.mrb[72].mxu1 }
 0x186   :  { %v999_v18 = vpop.f32.mrb[72].mxu0  ;;  %1134 = vmax.xlane.f32.xlu1 %v1133_v8  ;;  %v552_v34 = vpop.f32.mrb[73].mxu1 }
 0x187   :  { %v2885_v43 = vadd.f32 %v999_v18, %v550_v15  ;;  %v1001_v52 = vpop.f32.mrb[73].mxu0  ;;  %v554_v45 = vpop.f32.mrb[74].mxu1 }
 0x188   :  { %v2887_v29 = vadd.f32 %v1001_v52, %v552_v34  ;;  %v1003_v21 = vpop.f32.mrb[74].mxu0  ;;  %v556_v60 = vpop.f32.mrb[75].mxu1 }
 0x189   :  { %3721 = vst [vmem:[#allocation55_spill] sm:$0xff] %v2885_v43  ;;  %v2889_v63 = vadd.f32 %v1003_v21, %v554_v45  ;;  %v1005_v40 = vpop.f32.mrb[75].mxu0  ;;  %v2893_v5 = vpop.xlane.xlu0 %1029 }
 0x18a   :  { %3722 = vst [vmem:[#allocation56_spill] sm:$0xff] %v2887_v29  ;;  %v2891_v10 = vadd.f32 %v1005_v40, %v556_v60  ;;  %3725 = vst [vmem:[#allocation59_spill] sm:$0xff] %v2893_v5  ;;  %v1136_v56 = vmax.f32 %v2885_v43, %v2887_v29  ;;  %v1154_v8 = vsub.f32 %v2669_v14, %v2893_v5 }
 0x18b   :  { %3723 = vst [vmem:[#allocation57_spill] sm:$0xff] %v2889_v63  ;;  %v1155_v52 = vsub.f32 %v2671_v17, %v2893_v5 }
 0x18c   :  { %3724 = vst [vmem:[#allocation58_spill] sm:$0xff] %v2891_v10  ;;  %1137 = vmax.xlane.f32.xlu0 %v1136_v56  ;;  %v1139_v21 = vmax.f32 %v2889_v63, %v2891_v10  ;;  %v1238_v15 = vmul.f32 1.442695, %v1154_v8 }
 0x18d   :  { %v1240_v18 = vmul.f32 1.442695, %v1155_v52  ;;  %v2903_v34 = vpop.xlane.xlu0 %1032  ;;  %v560_v40 = vpop.f32.mrb[76].mxu1 }
 0x18e   :  { %3726 = vst [vmem:[#allocation60_spill] sm:$0xff] %v2903_v34  ;;  %1140 = vmax.xlane.f32.xlu1 %v1139_v21  ;;  %v1156_v45 = vsub.f32 %v2673_v19, %v2903_v34  ;;  %v1157_v60 = vsub.f32 %v2675_v22, %v2903_v34  ;;  %v1009_v14 = vpop.f32.mrb[76].mxu0  ;;  %v562_v29 = vpop.f32.mrb[77].mxu1  ;;  %2137 = vpow2.f32 %v1238_v15 }
 0x18f   :  { %v2909_v43 = vadd.f32 %v1009_v14, %v560_v40  ;;  %v1011_v56 = vpop.f32.mrb[77].mxu0  ;;  %v564_v17 = vpop.f32.mrb[78].mxu1  ;;  %2139 = vpow2.f32 %v1240_v18 }
 0x190   :  { %v1242_v5 = vmul.f32 1.442695, %v1156_v45  ;;  %v1244_v8 = vmul.f32 1.442695, %v1157_v60  ;;  %v2911_v52 = vadd.f32 %v1011_v56, %v562_v29  ;;  %v1013_v10 = vpop.f32.mrb[78].mxu0  ;;  %v566_v63 = vpop.f32.mrb[79].mxu1 }
 0x191   :  { %v2913_v21 = vadd.f32 %v1013_v10, %v564_v17  ;;  %v1015_v19 = vpop.f32.mrb[79].mxu0  ;;  %v2915_v24 = vpop.xlane.xlu1 %1035 }
 0x192   :  { %3727 = vst [vmem:[#allocation61_spill] sm:$0xff] %v2911_v52  ;;  %3729 = vst [vmem:[#allocation63_spill] sm:$0xff] %v2915_v24  ;;  %2141 = vpow2.f32 %v1242_v5  ;;  %v2917_v22 = vadd.f32 %v1015_v19, %v566_v63  ;;  %v1158_v14 = vsub.f32 %v2681_v27, %v2915_v24  ;;  %v1159_v15 = vsub.f32 %v2683_v30, %v2915_v24 }
 0x193   :  { %3728 = vst [vmem:[#allocation62_spill] sm:$0xff] %v2913_v21  ;;  %2143 = vpow2.f32 %v1244_v8  ;;  %v1142_v29 = vmax.f32 %v2909_v43, %v2911_v52 }
 0x194   :  { %3730 = vst [vmem:[#allocation64_spill] sm:$0xff] %v2917_v22  ;;  %v1246_v40 = vmul.f32 1.442695, %v1158_v14  ;;  %v1248_v18 = vmul.f32 1.442695, %v1159_v15  ;;  %v1145_v17 = vmax.f32 %v2913_v21, %v2917_v22 }
 0x195   :  { %1143 = vmax.xlane.f32.xlu0 %v1142_v29  ;;  %v2927_v10 = vpop.xlane.xlu1 %1038  ;;  %v570_v19 = vpop.f32.mrb[80].mxu1 }
 0x196   :  { %2145 = vpow2.f32 %v1246_v40  ;;  %v1160_v63 = vsub.f32 %v2685_v33, %v2927_v10  ;;  %v1161_v5 = vsub.f32 %v2687_v36, %v2927_v10  ;;  %v1019_v45 = vpop.f32.mrb[80].mxu0  ;;  %1146 = vmax.xlane.f32.xlu1 %v1145_v17  ;;  %v572_v60 = vpop.f32.mrb[81].mxu1 }
 0x197   :  { %2147 = vpow2.f32 %v1248_v18  ;;  %v2933_v56 = vadd.f32 %v1019_v45, %v570_v19  ;;  %v1021_v8 = vpop.f32.mrb[81].mxu0  ;;  %v574_v14 = vpop.f32.mrb[82].mxu1 }
 0x198   :  { %v1250_v15 = vmul.f32 1.442695, %v1160_v63  ;;  %v1252_v29 = vmul.f32 1.442695, %v1161_v5  ;;  %v2935_v30 = vadd.f32 %v1021_v8, %v572_v60  ;;  %v1023_v27 = vpop.f32.mrb[82].mxu0  ;;  %v576_v40 = vpop.f32.mrb[83].mxu1 }
 0x199   :  { %3731 = vst [vmem:[#allocation65_spill] sm:$0xff] %v2933_v56  ;;  %v2937_v24 = vadd.f32 %v1023_v27, %v574_v14  ;;  %v1025_v33 = vpop.f32.mrb[83].mxu0  ;;  %v2939_v34 = vpop.xlane.xlu0 %1041 }
 0x19a   :  { %3732 = vst [vmem:[#allocation66_spill] sm:$0xff] %v2935_v30  ;;  %3734 = vst [vmem:[#allocation68_spill] sm:$0xff] %v2939_v34  ;;  %v2138_v36 = vpop.eup %2137  ;;  %2149 = vpow2.f32 %v1250_v15  ;;  %v2941_v17 = vadd.f32 %v1025_v33, %v576_v40  ;;  %v1162_v18 = vsub.f32 %v2693_v41, %v2939_v34  ;;  %v1163_v19 = vsub.f32 %v2695_v44, %v2939_v34 }
 0x19b   :  { %3733 = vst [vmem:[#allocation67_spill] sm:$0xff] %v2937_v24  ;;  %v2947_v63 = vpop.xlane.xlu1 %1044  ;;  %v2140_v5 = vpop.eup %2139  ;;  %2151 = vpow2.f32 %v1252_v29  ;;  %v1148_v33 = vmax.f32 %v2933_v56, %v2935_v30 }
 0x19c   :  { %3735 = vst [vmem:[#allocation69_spill] sm:$0xff] %v2941_v17  ;;  %3736 = vst [vmem:[#allocation70_spill] sm:$0xff] %v2947_v63  ;;  %v1164_v27 = vsub.f32 %v2697_v47, %v2947_v63  ;;  %v1165_v45 = vsub.f32 %v2699_v50, %v2947_v63  ;;  %v2142_v60 = vpop.eup %2141  ;;  %v1254_v8 = vmul.f32 1.442695, %v1162_v18  ;;  %v1256_v14 = vmul.f32 1.442695, %v1163_v19 }
 0x19d   :  { %v1151_v15 = vmax.f32 %v2937_v24, %v2941_v17  ;;  %v2144_v40 = vpop.eup %2143  ;;  %1149 = vmax.xlane.f32.xlu0 %v1148_v33  ;;  %v1406_v29 = vadd.f32 %v2140_v5, %v2138_v36 }
 0x19e   :  { %v1258_v44 = vmul.f32 1.442695, %v1164_v27  ;;  %v1260_v41 = vmul.f32 1.442695, %v1165_v45  ;;  %2153 = vpow2.f32 %v1254_v8  ;;  %v1409_v63 = vadd.f32 %v2144_v40, %v2142_v60 }
 0x19f   :  { %1152 = vmax.xlane.f32.xlu1 %v1151_v15  ;;  %2155 = vpow2.f32 %v1256_v14 }
 0x1a0   :  { %v2146_v47 = vpop.eup %2145  ;;  %2157 = vpow2.f32 %v1258_v44 }
 0x1a1   :  { %v2957_v50 = vpop.xlane.xlu0 %1047  ;;  %v2148_v34 = vpop.eup %2147  ;;  %2159 = vpow2.f32 %v1260_v41  ;;  %1407 = vadd.xlane.f32.xlu0 %v1406_v29 }
 0x1a2   :  { %v1166_v18 = vsub.f32 %v2705_v55, %v2957_v50  ;;  %v1167_v19 = vsub.f32 %v2707_v58, %v2957_v50  ;;  %v1412_v45 = vadd.f32 %v2148_v34, %v2146_v47 }
 0x1a3   :  { %1410 = vadd.xlane.f32.xlu1 %v1409_v63  ;;  %v2963_v27 = vpop.xlane.xlu1 %1050 }
 0x1a4   :  { %v1262_v33 = vmul.f32 1.442695, %v1166_v18  ;;  %v1264_v36 = vmul.f32 1.442695, %v1167_v19  ;;  %v1168_v44 = vsub.f32 %v2709_v61, %v2963_v27  ;;  %v1169_v5 = vsub.f32 %v2711_v0, %v2963_v27  ;;  %v2150_v41 = vpop.eup %2149 }
 0x1a5   :  { %v2152_v60 = vpop.eup %2151  ;;  %1413 = vadd.xlane.f32.xlu0 %v1412_v45 }
 0x1a6   :  { %2161 = vpow2.f32 %v1262_v33  ;;  %v1266_v8 = vmul.f32 1.442695, %v1168_v44  ;;  %v1268_v14 = vmul.f32 1.442695, %v1169_v5  ;;  %v1415_v15 = vadd.f32 %v2152_v60, %v2150_v41 }
 0x1a7   :  { %2163 = vpow2.f32 %v1264_v36 }
 0x1a8   :  { %2165 = vpow2.f32 %v1266_v8  ;;  %v2154_v63 = vpop.eup %2153  ;;  %1416 = vadd.xlane.f32.xlu1 %v1415_v15 }
 0x1a9   :  { %2167 = vpow2.f32 %v1268_v14  ;;  %v2969_v47 = vpop.xlane.xlu0 %1053  ;;  %v2156_v34 = vpop.eup %2155 }
 0x1aa   :  { %v1170_v40 = vsub.f32 %v2717_v6, %v2969_v47  ;;  %v1171_v29 = vsub.f32 %v2719_v9, %v2969_v47  ;;  %v2158_v18 = vpop.eup %2157  ;;  %v1418_v33 = vadd.f32 %v2156_v34, %v2154_v63 }
 0x1ab   :  { %v2975_v19 = vpop.xlane.xlu1 %1056  ;;  %v2160_v45 = vpop.eup %2159 }
 0x1ac   :  { %v1270_v36 = vmul.f32 1.442695, %v1170_v40  ;;  %v1272_v44 = vmul.f32 1.442695, %v1171_v29  ;;  %v1172_v5 = vsub.f32 %v2721_v12, %v2975_v19  ;;  %v1173_v41 = vsub.f32 %v2723_v16, %v2975_v19  ;;  %1419 = vadd.xlane.f32.xlu0 %v1418_v33 }
 0x1ad   :  { %v1421_v60 = vadd.f32 %v2160_v45, %v2158_v18 }
 0x1ae   :  { %2169 = vpow2.f32 %v1270_v36  ;;  %v1274_v8 = vmul.f32 1.442695, %v1172_v5  ;;  %v1276_v14 = vmul.f32 1.442695, %v1173_v41 }
 0x1af   :  { %2171 = vpow2.f32 %v1272_v44  ;;  %1422 = vadd.xlane.f32.xlu1 %v1421_v60 }
 0x1b0   :  { %v2162_v15 = vpop.eup %2161  ;;  %2173 = vpow2.f32 %v1274_v8 }
 0x1b1   :  { %v2164_v9 = vpop.eup %2163  ;;  %2175 = vpow2.f32 %v1276_v14  ;;  %v2981_v63 = vpop.xlane.xlu0 %1059 }
 0x1b2   :  { %v2166_v34 = vpop.eup %2165  ;;  %v1174_v40 = vsub.f32 %v2729_v23, %v2981_v63  ;;  %v1175_v29 = vsub.f32 %v2731_v26, %v2981_v63  ;;  %v1424_v33 = vadd.f32 %v2164_v9, %v2162_v15 }
 0x1b3   :  { %v2168_v18 = vpop.eup %2167  ;;  %v2987_v45 = vpop.xlane.xlu1 %1062 }
 0x1b4   :  { %v1278_v36 = vmul.f32 1.442695, %v1174_v40  ;;  %v1280_v44 = vmul.f32 1.442695, %v1175_v29  ;;  %v1176_v5 = vsub.f32 %v2733_v31, %v2987_v45  ;;  %v1177_v41 = vsub.f32 %v2735_v35, %v2987_v45  ;;  %1425 = vadd.xlane.f32.xlu0 %v1424_v33 }
 0x1b5   :  { %v1427_v60 = vadd.f32 %v2168_v18, %v2166_v34 }
 0x1b6   :  { %2177 = vpow2.f32 %v1278_v36  ;;  %v1282_v8 = vmul.f32 1.442695, %v1176_v5  ;;  %v1284_v14 = vmul.f32 1.442695, %v1177_v41 }
 0x1b7   :  { %2179 = vpow2.f32 %v1280_v44  ;;  %1428 = vadd.xlane.f32.xlu1 %v1427_v60 }
 0x1b8   :  { %v2170_v26 = vpop.eup %2169  ;;  %2181 = vpow2.f32 %v1282_v8 }
 0x1b9   :  { %v2172_v9 = vpop.eup %2171  ;;  %2183 = vpow2.f32 %v1284_v14  ;;  %v2993_v15 = vpop.xlane.xlu0 %1065 }
 0x1ba   :  { %v2174_v40 = vpop.eup %2173  ;;  %v1178_v29 = vsub.f32 %v2741_v42, %v2993_v15  ;;  %v1179_v35 = vsub.f32 %v2743_v46, %v2993_v15  ;;  %v1430_v33 = vadd.f32 %v2172_v9, %v2170_v26 }
 0x1bb   :  { %v2176_v34 = vpop.eup %2175  ;;  %v2999_v18 = vpop.xlane.xlu1 %1068 }
 0x1bc   :  { %v1286_v36 = vmul.f32 1.442695, %v1178_v29  ;;  %v1288_v44 = vmul.f32 1.442695, %v1179_v35  ;;  %v1180_v5 = vsub.f32 %v2745_v51, %v2999_v18  ;;  %v1181_v41 = vsub.f32 %v2747_v54, %v2999_v18  ;;  %1431 = vadd.xlane.f32.xlu0 %v1430_v33 }
 0x1bd   :  { %v1433_v60 = vadd.f32 %v2176_v34, %v2174_v40 }
 0x1be   :  { %2185 = vpow2.f32 %v1286_v36  ;;  %v1290_v8 = vmul.f32 1.442695, %v1180_v5  ;;  %v1292_v14 = vmul.f32 1.442695, %v1181_v41 }
 0x1bf   :  { %2187 = vpow2.f32 %v1288_v44  ;;  %1434 = vadd.xlane.f32.xlu1 %v1433_v60 }
 0x1c0   :  { %v2178_v46 = vpop.eup %2177  ;;  %2189 = vpow2.f32 %v1290_v8 }
 0x1c1   :  { %v2180_v26 = vpop.eup %2179  ;;  %2191 = vpow2.f32 %v1292_v14  ;;  %v3005_v9 = vpop.xlane.xlu0 %1071 }
 0x1c2   :  { %v2182_v35 = vpop.eup %2181  ;;  %v1182_v29 = vsub.f32 %v2753_v62, %v3005_v9  ;;  %v1183_v54 = vsub.f32 %v2755_v3, %v3005_v9  ;;  %v1436_v33 = vadd.f32 %v2180_v26, %v2178_v46 }
 0x1c3   :  { %v2184_v40 = vpop.eup %2183  ;;  %v3011_v34 = vpop.xlane.xlu1 %1074 }
 0x1c4   :  { %v1294_v36 = vmul.f32 1.442695, %v1182_v29  ;;  %v1296_v44 = vmul.f32 1.442695, %v1183_v54  ;;  %v1184_v5 = vsub.f32 %v2757_v7, %v3011_v34  ;;  %v1185_v41 = vsub.f32 %v2759_v11, %v3011_v34  ;;  %1437 = vadd.xlane.f32.xlu0 %v1436_v33 }
 0x1c5   :  { %v1439_v60 = vadd.f32 %v2184_v40, %v2182_v35 }
 0x1c6   :  { %2193 = vpow2.f32 %v1294_v36  ;;  %v1298_v8 = vmul.f32 1.442695, %v1184_v5  ;;  %v1300_v14 = vmul.f32 1.442695, %v1185_v41 }
 0x1c7   :  { %2195 = vpow2.f32 %v1296_v44  ;;  %1440 = vadd.xlane.f32.xlu1 %v1439_v60 }
 0x1c8   :  { %v2186_v3 = vpop.eup %2185  ;;  %2197 = vpow2.f32 %v1298_v8 }
 0x1c9   :  { %v2188_v46 = vpop.eup %2187  ;;  %2199 = vpow2.f32 %v1300_v14  ;;  %v3017_v26 = vpop.xlane.xlu0 %1077 }
 0x1ca   :  { %v2190_v54 = vpop.eup %2189  ;;  %v1186_v29 = vsub.f32 %v2765_v20, %v3017_v26  ;;  %v1187_v11 = vsub.f32 %v2767_v25, %v3017_v26  ;;  %v1442_v33 = vadd.f32 %v2188_v46, %v2186_v3 }
 0x1cb   :  { %v2192_v35 = vpop.eup %2191  ;;  %v3023_v40 = vpop.xlane.xlu1 %1080 }
 0x1cc   :  { %v1302_v36 = vmul.f32 1.442695, %v1186_v29  ;;  %v1304_v44 = vmul.f32 1.442695, %v1187_v11  ;;  %v1188_v5 = vsub.f32 %v2769_v32, %v3023_v40  ;;  %v1189_v41 = vsub.f32 %v2771_v38, %v3023_v40  ;;  %1443 = vadd.xlane.f32.xlu0 %v1442_v33 }
 0x1cd   :  { %v1445_v60 = vadd.f32 %v2192_v35, %v2190_v54 }
 0x1ce   :  { %2201 = vpow2.f32 %v1302_v36  ;;  %v1306_v8 = vmul.f32 1.442695, %v1188_v5  ;;  %v1308_v14 = vmul.f32 1.442695, %v1189_v41 }
 0x1cf   :  { %2203 = vpow2.f32 %v1304_v44  ;;  %1446 = vadd.xlane.f32.xlu1 %v1445_v60 }
 0x1d0   :  { %v2194_v25 = vpop.eup %2193  ;;  %2205 = vpow2.f32 %v1306_v8 }
 0x1d1   :  { %v2196_v3 = vpop.eup %2195  ;;  %2207 = vpow2.f32 %v1308_v14  ;;  %v3029_v46 = vpop.xlane.xlu0 %1083 }
 0x1d2   :  { %v2198_v11 = vpop.eup %2197  ;;  %v1190_v29 = vsub.f32 %v2777_v48, %v3029_v46  ;;  %v1191_v38 = vsub.f32 %v2779_v53, %v3029_v46  ;;  %v1448_v33 = vadd.f32 %v2196_v3, %v2194_v25 }
 0x1d3   :  { %v2200_v54 = vpop.eup %2199  ;;  %v3035_v35 = vpop.xlane.xlu1 %1086 }
 0x1d4   :  { %v1310_v36 = vmul.f32 1.442695, %v1190_v29  ;;  %v1312_v44 = vmul.f32 1.442695, %v1191_v38  ;;  %v1192_v5 = vsub.f32 %v2781_v59, %v3035_v35  ;;  %v1193_v41 = vsub.f32 %v2783_v2, %v3035_v35  ;;  %1449 = vadd.xlane.f32.xlu0 %v1448_v33 }
 0x1d5   :  { %v1451_v60 = vadd.f32 %v2200_v54, %v2198_v11 }
 0x1d6   :  { %2209 = vpow2.f32 %v1310_v36  ;;  %v1314_v8 = vmul.f32 1.442695, %v1192_v5  ;;  %v1316_v14 = vmul.f32 1.442695, %v1193_v41 }
 0x1d7   :  { %2211 = vpow2.f32 %v1312_v44  ;;  %1452 = vadd.xlane.f32.xlu1 %v1451_v60 }
 0x1d8   :  { %v2202_v53 = vpop.eup %2201  ;;  %2213 = vpow2.f32 %v1314_v8 }
 0x1d9   :  { %v2204_v25 = vpop.eup %2203  ;;  %2215 = vpow2.f32 %v1316_v14  ;;  %v3041_v3 = vpop.xlane.xlu0 %1089 }
 0x1da   :  { %v2206_v38 = vpop.eup %2205  ;;  %v1194_v29 = vsub.f32 %v2789_v13, %v3041_v3  ;;  %v1195_v2 = vsub.f32 %v2791_v1, %v3041_v3  ;;  %v1454_v33 = vadd.f32 %v2204_v25, %v2202_v53 }
 0x1db   :  { %v2208_v11 = vpop.eup %2207  ;;  %v3047_v54 = vpop.xlane.xlu1 %1092 }
 0x1dc   :  { %v1318_v36 = vmul.f32 1.442695, %v1194_v29  ;;  %v1320_v44 = vmul.f32 1.442695, %v1195_v2  ;;  %v1196_v5 = vsub.f32 %v2793_v28, %v3047_v54  ;;  %v1197_v41 = vsub.f32 %v2795_v37, %v3047_v54  ;;  %1455 = vadd.xlane.f32.xlu0 %v1454_v33 }
 0x1dd   :  { %v1457_v60 = vadd.f32 %v2208_v11, %v2206_v38 }
 0x1de   :  { %2217 = vpow2.f32 %v1318_v36  ;;  %v1322_v8 = vmul.f32 1.442695, %v1196_v5  ;;  %v1324_v14 = vmul.f32 1.442695, %v1197_v41  ;;  %v3739_v41 = vld [vmem:[#allocation30_spill] sm:$0xff] }
 0x1df   :  { %2219 = vpow2.f32 %v1320_v44  ;;  %1458 = vadd.xlane.f32.xlu1 %v1457_v60 }
 0x1e0   :  { %v2210_v1 = vpop.eup %2209  ;;  %2221 = vpow2.f32 %v1322_v8 }
 0x1e1   :  { %v2212_v53 = vpop.eup %2211  ;;  %2223 = vpow2.f32 %v1324_v14  ;;  %v3053_v25 = vpop.xlane.xlu0 %1095 }
 0x1e2   :  { %3737 = vst [vmem:[#allocation71_spill] sm:$0xff] %v3053_v25  ;;  %v2214_v2 = vpop.eup %2213  ;;  %v1198_v29 = vsub.f32 %v2801_v49, %v3053_v25  ;;  %v1199_v37 = vsub.f32 %v2803_v57, %v3053_v25  ;;  %v1460_v33 = vadd.f32 %v2212_v53, %v2210_v1  ;;  %v3742_v25 = vld [vmem:[#allocation32_spill] sm:$0xff] }
 0x1e3   :  { %v2216_v38 = vpop.eup %2215  ;;  %v3059_v11 = vpop.xlane.xlu1 %1098 }
 0x1e4   :  { %3738 = vst [vmem:[#allocation72_spill] sm:$0xff] %v3059_v11  ;;  %v1326_v36 = vmul.f32 1.442695, %v1198_v29  ;;  %v1328_v44 = vmul.f32 1.442695, %v1199_v37  ;;  %v1200_v5 = vsub.f32 %v2805_v4, %v3059_v11  ;;  %v1201_v60 = vsub.f32 %v3739_v41, %v3059_v11  ;;  %1461 = vadd.xlane.f32.xlu0 %v1460_v33  ;;  %v3741_v29 = vld [vmem:[#allocation31_spill] sm:$0xff] }
 0x1e5   :  { %v1463_v8 = vadd.f32 %v2216_v38, %v2214_v2 }
 0x1e6   :  { %2225 = vpow2.f32 %v1326_v36  ;;  %v1330_v14 = vmul.f32 1.442695, %v1200_v5  ;;  %v1332_v49 = vmul.f32 1.442695, %v1201_v60  ;;  %v3744_v5 = vld [vmem:[#allocation33_spill] sm:$0xff] }
 0x1e7   :  { %2227 = vpow2.f32 %v1328_v44  ;;  %1464 = vadd.xlane.f32.xlu1 %v1463_v8 }
 0x1e8   :  { %v2218_v57 = vpop.eup %2217  ;;  %2229 = vpow2.f32 %v1330_v14 }
 0x1e9   :  { %v2220_v1 = vpop.eup %2219  ;;  %2231 = vpow2.f32 %v1332_v49  ;;  %v3065_v53 = vpop.xlane.xlu0 %1101  ;;  %v3745_v49 = vld [vmem:[#allocation34_spill] sm:$0xff] }
 0x1ea   :  { %3740 = vst [vmem:[#allocation73_spill] sm:$0xff] %v3065_v53  ;;  %v2222_v37 = vpop.eup %2221  ;;  %v1202_v4 = vsub.f32 %v3741_v29, %v3065_v53  ;;  %v1203_v41 = vsub.f32 %v3742_v25, %v3065_v53  ;;  %v1466_v33 = vadd.f32 %v2220_v1, %v2218_v57  ;;  %v3748_v53 = vld [vmem:[#allocation36_spill] sm:$0xff] }
 0x1eb   :  { %v2224_v2 = vpop.eup %2223  ;;  %v3071_v38 = vpop.xlane.xlu1 %1104 }
 0x1ec   :  { %3743 = vst [vmem:[#allocation74_spill] sm:$0xff] %v3071_v38  ;;  %v1334_v36 = vmul.f32 1.442695, %v1202_v4  ;;  %v1336_v44 = vmul.f32 1.442695, %v1203_v41  ;;  %v1204_v60 = vsub.f32 %v3744_v5, %v3071_v38  ;;  %v1205_v8 = vsub.f32 %v3745_v49, %v3071_v38  ;;  %1467 = vadd.xlane.f32.xlu0 %v1466_v33  ;;  %v3747_v41 = vld [vmem:[#allocation35_spill] sm:$0xff] }
 0x1ed   :  { %v1469_v14 = vadd.f32 %v2224_v2, %v2222_v37 }
 0x1ee   :  { %2233 = vpow2.f32 %v1334_v36  ;;  %v1338_v11 = vmul.f32 1.442695, %v1204_v60  ;;  %v1340_v29 = vmul.f32 1.442695, %v1205_v8  ;;  %v3750_v60 = vld [vmem:[#allocation37_spill] sm:$0xff] }
 0x1ef   :  { %2235 = vpow2.f32 %v1336_v44  ;;  %1470 = vadd.xlane.f32.xlu1 %v1469_v14 }
 0x1f0   :  { %v2226_v25 = vpop.eup %2225  ;;  %2237 = vpow2.f32 %v1338_v11 }
 0x1f1   :  { %v2228_v57 = vpop.eup %2227  ;;  %2239 = vpow2.f32 %v1340_v29  ;;  %v3077_v1 = vpop.xlane.xlu0 %1107  ;;  %v3751_v29 = vld [vmem:[#allocation38_spill] sm:$0xff] }
 0x1f2   :  { %3746 = vst [vmem:[#allocation75_spill] sm:$0xff] %v3077_v1  ;;  %v2230_v4 = vpop.eup %2229  ;;  %v1206_v5 = vsub.f32 %v3747_v41, %v3077_v1  ;;  %v1207_v49 = vsub.f32 %v3748_v53, %v3077_v1  ;;  %v1472_v33 = vadd.f32 %v2228_v57, %v2226_v25  ;;  %v3754_v1 = vld [vmem:[#allocation40_spill] sm:$0xff] }
 0x1f3   :  { %v2232_v37 = vpop.eup %2231  ;;  %v3083_v2 = vpop.xlane.xlu1 %1110 }
 0x1f4   :  { %3749 = vst [vmem:[#allocation76_spill] sm:$0xff] %v3083_v2  ;;  %v1342_v36 = vmul.f32 1.442695, %v1206_v5  ;;  %v1344_v44 = vmul.f32 1.442695, %v1207_v49  ;;  %v1208_v11 = vsub.f32 %v3750_v60, %v3083_v2  ;;  %v1209_v8 = vsub.f32 %v3751_v29, %v3083_v2  ;;  %1473 = vadd.xlane.f32.xlu0 %v1472_v33  ;;  %v3753_v49 = vld [vmem:[#allocation39_spill] sm:$0xff] }
 0x1f5   :  { %v1475_v14 = vadd.f32 %v2232_v37, %v2230_v4 }
 0x1f6   :  { %2241 = vpow2.f32 %v1342_v36  ;;  %v1346_v38 = vmul.f32 1.442695, %v1208_v11  ;;  %v1348_v41 = vmul.f32 1.442695, %v1209_v8  ;;  %v3756_v11 = vld [vmem:[#allocation41_spill] sm:$0xff] }
 0x1f7   :  { %2243 = vpow2.f32 %v1344_v44  ;;  %1476 = vadd.xlane.f32.xlu1 %v1475_v14 }
 0x1f8   :  { %v2234_v53 = vpop.eup %2233  ;;  %2245 = vpow2.f32 %v1346_v38 }
 0x1f9   :  { %v2236_v25 = vpop.eup %2235  ;;  %2247 = vpow2.f32 %v1348_v41  ;;  %v3089_v57 = vpop.xlane.xlu0 %1113  ;;  %v3757_v41 = vld [vmem:[#allocation42_spill] sm:$0xff] }
 0x1fa   :  { %3752 = vst [vmem:[#allocation77_spill] sm:$0xff] %v3089_v57  ;;  %v2238_v5 = vpop.eup %2237  ;;  %v1210_v60 = vsub.f32 %v3753_v49, %v3089_v57  ;;  %v1211_v29 = vsub.f32 %v3754_v1, %v3089_v57  ;;  %v1478_v33 = vadd.f32 %v2236_v25, %v2234_v53  ;;  %v3760_v57 = vld [vmem:[#allocation44_spill] sm:$0xff] }
 0x1fb   :  { %v2240_v4 = vpop.eup %2239  ;;  %v3095_v37 = vpop.xlane.xlu1 %1116 }
 0x1fc   :  { %3755 = vst [vmem:[#allocation78_spill] sm:$0xff] %v3095_v37  ;;  %v1350_v36 = vmul.f32 1.442695, %v1210_v60  ;;  %v1352_v44 = vmul.f32 1.442695, %v1211_v29  ;;  %v1212_v38 = vsub.f32 %v3756_v11, %v3095_v37  ;;  %v1213_v8 = vsub.f32 %v3757_v41, %v3095_v37  ;;  %1479 = vadd.xlane.f32.xlu0 %v1478_v33  ;;  %v3759_v29 = vld [vmem:[#allocation43_spill] sm:$0xff] }
 0x1fd   :  { %v1481_v14 = vadd.f32 %v2240_v4, %v2238_v5 }
 0x1fe   :  { %2249 = vpow2.f32 %v1350_v36  ;;  %v1354_v2 = vmul.f32 1.442695, %v1212_v38  ;;  %v1356_v49 = vmul.f32 1.442695, %v1213_v8  ;;  %v3762_v38 = vld [vmem:[#allocation45_spill] sm:$0xff] }
 0x1ff   :  { %2251 = vpow2.f32 %v1352_v44  ;;  %1482 = vadd.xlane.f32.xlu1 %v1481_v14 }
 0x200   :  { %v2242_v1 = vpop.eup %2241  ;;  %2253 = vpow2.f32 %v1354_v2 }
 0x201   :  { %v2244_v53 = vpop.eup %2243  ;;  %2255 = vpow2.f32 %v1356_v49  ;;  %v3101_v25 = vpop.xlane.xlu0 %1119  ;;  %v3763_v49 = vld [vmem:[#allocation46_spill] sm:$0xff] }
 0x202   :  { %3758 = vst [vmem:[#allocation79_spill] sm:$0xff] %v3101_v25  ;;  %v2246_v60 = vpop.eup %2245  ;;  %v1214_v11 = vsub.f32 %v3759_v29, %v3101_v25  ;;  %v1215_v41 = vsub.f32 %v3760_v57, %v3101_v25  ;;  %v1484_v33 = vadd.f32 %v2244_v53, %v2242_v1  ;;  %v3765_v25 = vld [vmem:[#allocation48_spill] sm:$0xff] }
 0x203   :  { %v2248_v5 = vpop.eup %2247  ;;  %v3107_v4 = vpop.xlane.xlu1 %1122 }
 0x204   :  { %3761 = vst [vmem:[#allocation80_spill] sm:$0xff] %v3107_v4  ;;  %v1358_v36 = vmul.f32 1.442695, %v1214_v11  ;;  %v1360_v44 = vmul.f32 1.442695, %v1215_v41  ;;  %v1216_v2 = vsub.f32 %v3762_v38, %v3107_v4  ;;  %v1217_v8 = vsub.f32 %v3763_v49, %v3107_v4  ;;  %1485 = vadd.xlane.f32.xlu0 %v1484_v33  ;;  %v3764_v41 = vld [vmem:[#allocation47_spill] sm:$0xff] }
 0x205   :  { %v1487_v14 = vadd.f32 %v2248_v5, %v2246_v60 }
 0x206   :  { %2257 = vpow2.f32 %v1358_v36  ;;  %v1362_v37 = vmul.f32 1.442695, %v1216_v2  ;;  %v1364_v29 = vmul.f32 1.442695, %v1217_v8  ;;  %v3767_v2 = vld [vmem:[#allocation49_spill] sm:$0xff] }
 0x207   :  { %2259 = vpow2.f32 %v1360_v44  ;;  %1488 = vadd.xlane.f32.xlu1 %v1487_v14 }
 0x208   :  { %v2250_v57 = vpop.eup %2249  ;;  %2261 = vpow2.f32 %v1362_v37 }
 0x209   :  { %v2252_v1 = vpop.eup %2251  ;;  %2263 = vpow2.f32 %v1364_v29  ;;  %v3113_v53 = vpop.xlane.xlu0 %1125  ;;  %v3768_v29 = vld [vmem:[#allocation50_spill] sm:$0xff] }
 0x20a   :  { %v2254_v11 = vpop.eup %2253  ;;  %v1218_v38 = vsub.f32 %v3764_v41, %v3113_v53  ;;  %v1219_v49 = vsub.f32 %v3765_v25, %v3113_v53  ;;  %v1490_v33 = vadd.f32 %v2252_v1, %v2250_v57 }
 0x20b   :  { %v2256_v60 = vpop.eup %2255  ;;  %v3119_v5 = vpop.xlane.xlu1 %1128 }
 0x20c   :  { %3766 = vst [vmem:[#allocation81_spill] sm:$0xff] %v3119_v5  ;;  %v1366_v36 = vmul.f32 1.442695, %v1218_v38  ;;  %v1368_v44 = vmul.f32 1.442695, %v1219_v49  ;;  %v1220_v37 = vsub.f32 %v3767_v2, %v3119_v5  ;;  %v1221_v8 = vsub.f32 %v3768_v29, %v3119_v5  ;;  %1491 = vadd.xlane.f32.xlu0 %v1490_v33  ;;  %v3770_v2 = vld [vmem:[#allocation52_spill] sm:$0xff] }
 0x20d   :  { %v1493_v14 = vadd.f32 %v2256_v60, %v2254_v11 }
 0x20e   :  { %2265 = vpow2.f32 %v1366_v36  ;;  %v1370_v4 = vmul.f32 1.442695, %v1220_v37  ;;  %v1372_v41 = vmul.f32 1.442695, %v1221_v8  ;;  %v3772_v37 = vld [vmem:[#allocation53_spill] sm:$0xff] }
 0x20f   :  { %2267 = vpow2.f32 %v1368_v44  ;;  %1494 = vadd.xlane.f32.xlu1 %v1493_v14 }
 0x210   :  { %v2258_v25 = vpop.eup %2257  ;;  %2269 = vpow2.f32 %v1370_v4 }
 0x211   :  { %v2260_v57 = vpop.eup %2259  ;;  %2271 = vpow2.f32 %v1372_v41  ;;  %v3125_v1 = vpop.xlane.xlu0 %1131  ;;  %v3773_v41 = vld [vmem:[#allocation54_spill] sm:$0xff] }
 0x212   :  { %3769 = vst [vmem:[#allocation82_spill] sm:$0xff] %v3125_v1  ;;  %v2262_v38 = vpop.eup %2261  ;;  %v1222_v49 = vsub.f32 %v2873_v39, %v3125_v1  ;;  %v1223_v29 = vsub.f32 %v3770_v2, %v3125_v1  ;;  %v1496_v33 = vadd.f32 %v2260_v57, %v2258_v25  ;;  %v3776_v1 = vld [vmem:[#allocation56_spill] sm:$0xff] }
 0x213   :  { %v2264_v11 = vpop.eup %2263  ;;  %v3131_v60 = vpop.xlane.xlu1 %1134 }
 0x214   :  { %3771 = vst [vmem:[#allocation83_spill] sm:$0xff] %v3131_v60  ;;  %v1374_v36 = vmul.f32 1.442695, %v1222_v49  ;;  %v1376_v44 = vmul.f32 1.442695, %v1223_v29  ;;  %v1224_v4 = vsub.f32 %v3772_v37, %v3131_v60  ;;  %v1225_v8 = vsub.f32 %v3773_v41, %v3131_v60  ;;  %1497 = vadd.xlane.f32.xlu0 %v1496_v33  ;;  %v3775_v49 = vld [vmem:[#allocation55_spill] sm:$0xff] }
 0x215   :  { %v1499_v14 = vadd.f32 %v2264_v11, %v2262_v38 }
 0x216   :  { %2273 = vpow2.f32 %v1374_v36  ;;  %v1378_v5 = vmul.f32 1.442695, %v1224_v4  ;;  %v1380_v39 = vmul.f32 1.442695, %v1225_v8  ;;  %v3777_v4 = vld [vmem:[#allocation57_spill] sm:$0xff] }
 0x217   :  { %2275 = vpow2.f32 %v1376_v44  ;;  %1500 = vadd.xlane.f32.xlu1 %v1499_v14 }
 0x218   :  { %v2266_v2 = vpop.eup %2265  ;;  %2277 = vpow2.f32 %v1378_v5 }
 0x219   :  { %v2268_v25 = vpop.eup %2267  ;;  %2279 = vpow2.f32 %v1380_v39  ;;  %v3137_v57 = vpop.xlane.xlu0 %1137  ;;  %v3778_v39 = vld [vmem:[#allocation58_spill] sm:$0xff] }
 0x21a   :  { %3774 = vst [vmem:[#allocation84_spill] sm:$0xff] %v3137_v57  ;;  %v2270_v29 = vpop.eup %2269  ;;  %v1226_v37 = vsub.f32 %v3775_v49, %v3137_v57  ;;  %v1227_v41 = vsub.f32 %v3776_v1, %v3137_v57  ;;  %v1502_v33 = vadd.f32 %v2268_v25, %v2266_v2 }
 0x21b   :  { %v2272_v38 = vpop.eup %2271  ;;  %v3143_v11 = vpop.xlane.xlu1 %1140 }
 0x21c   :  { %v1382_v36 = vmul.f32 1.442695, %v1226_v37  ;;  %v1384_v44 = vmul.f32 1.442695, %v1227_v41  ;;  %v1228_v5 = vsub.f32 %v3777_v4, %v3143_v11  ;;  %v1229_v8 = vsub.f32 %v3778_v39, %v3143_v11  ;;  %1503 = vadd.xlane.f32.xlu0 %v1502_v33 }
 0x21d   :  { %v1505_v14 = vadd.f32 %v2272_v38, %v2270_v29 }
 0x21e   :  { %2281 = vpow2.f32 %v1382_v36  ;;  %v1386_v60 = vmul.f32 1.442695, %v1228_v5  ;;  %v1388_v49 = vmul.f32 1.442695, %v1229_v8 }
 0x21f   :  { %2283 = vpow2.f32 %v1384_v44  ;;  %1506 = vadd.xlane.f32.xlu1 %v1505_v14 }
 0x220   :  { %v2274_v1 = vpop.eup %2273  ;;  %2285 = vpow2.f32 %v1386_v60 }
 0x221   :  { %v2276_v2 = vpop.eup %2275  ;;  %2287 = vpow2.f32 %v1388_v49 }
 0x222   :  { %v2278_v25 = vpop.eup %2277  ;;  %v1508_v37 = vadd.f32 %v2276_v2, %v2274_v1  ;;  %v3149_v57 = vpop.xlane.xlu0 %1143 }
 0x223   :  { %v2280_v41 = vpop.eup %2279  ;;  %v1230_v4 = vsub.f32 %v2909_v43, %v3149_v57  ;;  %v1231_v29 = vsub.f32 %v2911_v52, %v3149_v57  ;;  %v3155_v33 = vpop.xlane.xlu1 %1146 }
 0x224   :  { %3779 = vst [vmem:[#allocation58_spill] sm:$0xff] %v3155_v33  ;;  %1509 = vadd.xlane.f32.xlu0 %v1508_v37  ;;  %v1511_v38 = vadd.f32 %v2280_v41, %v2278_v25  ;;  %v1232_v60 = vsub.f32 %v2913_v21, %v3155_v33  ;;  %v1233_v49 = vsub.f32 %v2917_v22, %v3155_v33  ;;  %v3788_v21 = vld [vmem:[#allocation5_spill] sm:$0xff] }
 0x225   :  { %v1390_v1 = vmul.f32 1.442695, %v1230_v4  ;;  %v1392_v36 = vmul.f32 1.442695, %v1231_v29 }
 0x226   :  { %1512 = vadd.xlane.f32.xlu1 %v1511_v38  ;;  %v1394_v44 = vmul.f32 1.442695, %v1232_v60  ;;  %v1396_v5 = vmul.f32 1.442695, %v1233_v49 }
 0x227   :  { %2289 = vpow2.f32 %v1390_v1 }
 0x228   :  { %v2282_v8 = vpop.eup %2281  ;;  %2291 = vpow2.f32 %v1392_v36 }
 0x229   :  { %v2284_v14 = vpop.eup %2283  ;;  %2293 = vpow2.f32 %v1394_v44 }
 0x22a   :  { %v2286_v2 = vpop.eup %2285  ;;  %v1514_v52 = vadd.f32 %v2284_v14, %v2282_v8  ;;  %2295 = vpow2.f32 %v1396_v5  ;;  %v3161_v25 = vpop.xlane.xlu0 %1149 }
 0x22b   :  { %v2288_v37 = vpop.eup %2287  ;;  %3780 = vst [vmem:[#allocation85_spill] sm:$0xff] %v3161_v25  ;;  %v1234_v41 = vsub.f32 %v2933_v56, %v3161_v25  ;;  %v1235_v4 = vsub.f32 %v2935_v30, %v3161_v25 }
 0x22c   :  { %v3167_v29 = vpop.xlane.xlu1 %1152  ;;  %1515 = vadd.xlane.f32.xlu0 %v1514_v52  ;;  %v1517_v38 = vadd.f32 %v2288_v37, %v2286_v2 }
 0x22d   :  { %3781 = vst [vmem:[#allocation86_spill] sm:$0xff] %v3167_v29  ;;  %v1236_v60 = vsub.f32 %v2937_v24, %v3167_v29  ;;  %v1237_v49 = vsub.f32 %v2941_v17, %v3167_v29  ;;  %v1398_v1 = vmul.f32 1.442695, %v1234_v41  ;;  %v1400_v36 = vmul.f32 1.442695, %v1235_v4  ;;  %v3783_v29 = vld [vmem:[#allocation60_spill] sm:$0xff] }
 0x22e   :  { %1518 = vadd.xlane.f32.xlu1 %v1517_v38  ;;  %v1408_v8 = vpop.xlane.xlu0 %1407 }
 0x22f   :  { %v1402_v44 = vmul.f32 1.442695, %v1236_v60  ;;  %v1404_v5 = vmul.f32 1.442695, %v1237_v49  ;;  %2297 = vpow2.f32 %v1398_v1 }
 0x230   :  { %v1411_v14 = vpop.xlane.xlu1 %1410  ;;  %2299 = vpow2.f32 %v1400_v36 }
 0x231   :  { %v2290_v30 = vpop.eup %2289  ;;  %2301 = vpow2.f32 %v1402_v44 }
 0x232   :  { %v2292_v56 = vpop.eup %2291  ;;  %2303 = vpow2.f32 %v1404_v5  ;;  %v1414_v52 = vpop.xlane.xlu0 %1413 }
 0x233   :  { %v2294_v2 = vpop.eup %2293  ;;  %2305 = vlog2.f32 %v1408_v8  ;;  %v1520_v37 = vadd.f32 %v2292_v56, %v2290_v30 }
 0x234   :  { %v2296_v24 = vpop.eup %2295  ;;  %2307 = vlog2.f32 %v1411_v14 }
 0x235   :  { %2309 = vlog2.f32 %v1414_v52  ;;  %1521 = vadd.xlane.f32.xlu0 %v1520_v37  ;;  %v1417_v41 = vpop.xlane.xlu1 %1416  ;;  %v1523_v4 = vadd.f32 %v2296_v24, %v2294_v2  ;;  %v3782_v2 = vld [vmem:[#allocation59_spill] sm:$0xff] }
 0x236   :  { %2311 = vlog2.f32 %v1417_v41 }
 0x237   :  { %1524 = vadd.xlane.f32.xlu1 %v1523_v4 }
 0x239   :  { %v2298_v38 = vpop.eup %2297  ;;  %v1420_v60 = vpop.xlane.xlu0 %1419 }
 0x23a   :  { %v2300_v49 = vpop.eup %2299  ;;  %2313 = vlog2.f32 %v1420_v60 }
 0x23b   :  { %v2302_v1 = vpop.eup %2301  ;;  %v1526_v44 = vadd.f32 %v2300_v49, %v2298_v38  ;;  %v3784_v38 = vld [vmem:[#allocation2_spill] sm:$0xff] }
 0x23c   :  { %v1423_v36 = vpop.xlane.xlu1 %1422  ;;  %v2304_v5 = vpop.eup %2303 }
 0x23d   :  { %2315 = vlog2.f32 %v1423_v36  ;;  %v2306_v17 = vpop.eup %2305  ;;  %1527 = vadd.xlane.f32.xlu0 %v1526_v44  ;;  %v1529_v30 = vadd.f32 %v2304_v5, %v2302_v1  ;;  %v3785_v36 = vld [vmem:[#allocation3_spill] sm:$0xff]  ;;  %v3787_v5 = vld [vmem:[#allocation4_spill] sm:$0xff] }
 0x23e   :  { %v2308_v56 = vpop.eup %2307  ;;  %v1533_v8 = vmul.f32 0.6931472, %v2306_v17  ;;  %v3786_v44 = vld [vmem:[#allocation63_spill] sm:$0xff] }
 0x23f   :  { %v2310_v14 = vpop.eup %2309  ;;  %v1535_v52 = vmul.f32 0.6931472, %v2308_v56  ;;  %1530 = vadd.xlane.f32.xlu1 %v1529_v30 }
 0x240   :  { %v2312_v24 = vpop.eup %2311  ;;  %v1616_v37 = vadd.f32 %v1533_v8, %v3782_v2  ;;  %v1537_v41 = vmul.f32 0.6931472, %v2310_v14 }
 0x241   :  { %v1426_v4 = vpop.xlane.xlu0 %1425  ;;  %v1617_v60 = vadd.f32 %v1535_v52, %v3783_v29  ;;  %v1539_v25 = vmul.f32 0.6931472, %v2312_v24  ;;  %v3789_v29 = vld [vmem:[#allocation6_spill] sm:$0xff]  ;;  %v3790_v52 = vld [vmem:[#allocation7_spill] sm:$0xff] }
 0x242   :  { %2317 = vlog2.f32 %v1426_v4  ;;  %v1658_v49 = vsub.f32 %v3784_v38, %v1616_v37  ;;  %v1659_v22 = vsub.f32 %v3785_v36, %v1616_v37  ;;  %v1618_v1 = vadd.f32 %v1537_v41, %v3786_v44  ;;  %v3794_v38 = vld [vmem:[#allocation10_spill] sm:$0xff]  ;;  %v3795_v36 = vld [vmem:[#allocation11_spill] sm:$0xff] }
 0x243   :  { %v1660_v17 = vsub.f32 %v3787_v5, %v1617_v60  ;;  %v1661_v56 = vsub.f32 %v3788_v21, %v1617_v60  ;;  %v1619_v30 = vadd.f32 %v1539_v25, %v2927_v10  ;;  %v3791_v21 = vld [vmem:[#allocation8_spill] sm:$0xff]  ;;  %v3792_v25 = vld [vmem:[#allocation9_spill] sm:$0xff] }
 0x244   :  { %v1429_v33 = vpop.xlane.xlu1 %1428  ;;  %v2314_v8 = vpop.eup %2313  ;;  %1742 = vst [vmem:[%s3553_s2] sm:$0xff] %v1658_v49  ;;  %1743 = vst [vmem:[%s3553_s2 + $0x8] sm:$0xff] %v1659_v22  ;;  %v1662_v14 = vsub.f32 %v3789_v29, %v1618_v1  ;;  %v1663_v24 = vsub.f32 %v3790_v52, %v1618_v1  ;;  %v3793_v22 = vld [vmem:[#allocation68_spill] sm:$0xff]  ;;  %v3796_v1 = vld [vmem:[#allocation70_spill] sm:$0xff] }
 0x245   :  { %2319 = vlog2.f32 %v1429_v33  ;;  %1744 = vst [vmem:[%s3553_s2 + $0x10] sm:$0xff] %v1660_v17  ;;  %1745 = vst [vmem:[%s3553_s2 + $0x18] sm:$0xff] %v1661_v56  ;;  %v1664_v10 = vsub.f32 %v3791_v21, %v1619_v30  ;;  %v1665_v2 = vsub.f32 %v3792_v25, %v1619_v30  ;;  %v1541_v37 = vmul.f32 0.6931472, %v2314_v8  ;;  %v3797_v56 = vld [vmem:[#allocation12_spill] sm:$0xff]  ;;  %v3798_v8 = vld [vmem:[#allocation13_spill] sm:$0xff] }
 0x246   :  { %1746 = vst [vmem:[%s3553_s2 + $0x20] sm:$0xff] %v1662_v14  ;;  %1747 = vst [vmem:[%s3553_s2 + $0x28] sm:$0xff] %v1663_v24 }
 0x247   :  { %v2316_v41 = vpop.eup %2315  ;;  %1748 = vst [vmem:[%s3553_s2 + $0x30] sm:$0xff] %v1664_v10  ;;  %1749 = vst [vmem:[%s3553_s2 + $0x38] sm:$0xff] %v1665_v2  ;;  %v1620_v33 = vadd.f32 %v1541_v37, %v3793_v22 }
 0x248   :  { %v1543_v4 = vmul.f32 0.6931472, %v2316_v41 }
 0x249   :  { %v1432_v60 = vpop.xlane.xlu0 %1431  ;;  %v1666_v49 = vsub.f32 %v3794_v38, %v1620_v33  ;;  %v1667_v44 = vsub.f32 %v3795_v36, %v1620_v33 }
 0x24a   :  { %v1621_v5 = vadd.f32 %v1543_v4, %v3796_v1  ;;  %2321 = vlog2.f32 %v1432_v60 }
 0x24b   :  { %1750 = vst [vmem:[%s3553_s2 + $0x40] sm:$0xff] %v1666_v49  ;;  %1751 = vst [vmem:[%s3553_s2 + $0x48] sm:$0xff] %v1667_v44 }
 0x24c   :  { %v2318_v17 = vpop.eup %2317  ;;  %v1668_v30 = vsub.f32 %v3797_v56, %v1621_v5  ;;  %v1669_v29 = vsub.f32 %v3798_v8, %v1621_v5  ;;  %v1435_v14 = vpop.xlane.xlu1 %1434 }
 0x24d   :  { %v1545_v52 = vmul.f32 0.6931472, %v2318_v17  ;;  %2323 = vlog2.f32 %v1435_v14 }
 0x24e   :  { %1752 = vst [vmem:[%s3553_s2 + $0x50] sm:$0xff] %v1668_v30  ;;  %1753 = vst [vmem:[%s3553_s2 + $0x58] sm:$0xff] %v1669_v29 }
 0x24f   :  { %v2320_v24 = vpop.eup %2319  ;;  %v1622_v21 = vadd.f32 %v1545_v52, %v2957_v50  ;;  %v3801_v52 = vld [vmem:[#allocation16_spill] sm:$0xff] }
 0x250   :  { %v1547_v10 = vmul.f32 0.6931472, %v2320_v24 }
 0x251   :  { %v1670_v25 = vsub.f32 %v2705_v55, %v1622_v21  ;;  %v1671_v2 = vsub.f32 %v2707_v58, %v1622_v21  ;;  %v1438_v37 = vpop.xlane.xlu0 %1437 }
 0x252   :  { %v1623_v41 = vadd.f32 %v1547_v10, %v2963_v27  ;;  %2325 = vlog2.f32 %v1438_v37 }
 0x253   :  { %1754 = vst [vmem:[%s3553_s2 + $0x60] sm:$0xff] %v1670_v25  ;;  %1755 = vst [vmem:[%s3553_s2 + $0x68] sm:$0xff] %v1671_v2 }
 0x254   :  { %v2322_v22 = vpop.eup %2321  ;;  %v1672_v50 = vsub.f32 %v2709_v61, %v1623_v41  ;;  %v1673_v33 = vsub.f32 %v2711_v0, %v1623_v41  ;;  %v1441_v55 = vpop.xlane.xlu1 %1440  ;;  %v3799_v61 = vld [vmem:[#allocation14_spill] sm:$0xff] }
 0x255   :  { %v1549_v4 = vmul.f32 0.6931472, %v2322_v22  ;;  %2327 = vlog2.f32 %v1441_v55 }
 0x256   :  { %1756 = vst [vmem:[%s3553_s2 + $0x70] sm:$0xff] %v1672_v50  ;;  %1757 = vst [vmem:[%s3553_s2 + $0x78] sm:$0xff] %v1673_v33  ;;  %v3803_v33 = vld [vmem:[#allocation18_spill] sm:$0xff] }
 0x257   :  { %v2324_v58 = vpop.eup %2323  ;;  %v1624_v27 = vadd.f32 %v1549_v4, %v2969_v47 }
 0x258   :  { %v1551_v60 = vmul.f32 0.6931472, %v2324_v58 }
 0x259   :  { %v1674_v38 = vsub.f32 %v2717_v6, %v1624_v27  ;;  %v1675_v49 = vsub.f32 %v3799_v61, %v1624_v27  ;;  %v1444_v0 = vpop.xlane.xlu0 %1443 }
 0x25a   :  { %v1625_v36 = vadd.f32 %v1551_v60, %v2975_v19  ;;  %2329 = vlog2.f32 %v1444_v0 }
 0x25b   :  { %1758 = vst [vmem:[%s3553_s2 + $0x80] sm:$0xff] %v1674_v38  ;;  %1759 = vst [vmem:[%s3553_s2 + $0x88] sm:$0xff] %v1675_v49 }
 0x25c   :  { %v2326_v44 = vpop.eup %2325  ;;  %v1676_v47 = vsub.f32 %v2721_v12, %v1625_v36  ;;  %v1677_v1 = vsub.f32 %v2723_v16, %v1625_v36  ;;  %v1447_v6 = vpop.xlane.xlu1 %1446  ;;  %v3800_v12 = vld [vmem:[#allocation15_spill] sm:$0xff]  ;;  %v3805_v36 = vld [vmem:[#allocation20_spill] sm:$0xff] }
 0x25d   :  { %v1553_v5 = vmul.f32 0.6931472, %v2326_v44  ;;  %2331 = vlog2.f32 %v1447_v6 }
 0x25e   :  { %1760 = vst [vmem:[%s3553_s2 + $0x90] sm:$0xff] %v1676_v47  ;;  %1761 = vst [vmem:[%s3553_s2 + $0x98] sm:$0xff] %v1677_v1 }
 0x25f   :  { %v2328_v19 = vpop.eup %2327  ;;  %v1626_v17 = vadd.f32 %v1553_v5, %v2981_v63 }
 0x260   :  { %v1555_v56 = vmul.f32 0.6931472, %v2328_v19 }
 0x261   :  { %v1678_v30 = vsub.f32 %v2729_v23, %v1626_v17  ;;  %v1679_v8 = vsub.f32 %v3800_v12, %v1626_v17  ;;  %v1450_v16 = vpop.xlane.xlu0 %1449  ;;  %v3807_v12 = vld [vmem:[#allocation22_spill] sm:$0xff] }
 0x262   :  { %v1627_v29 = vadd.f32 %v1555_v56, %v2987_v45  ;;  %2333 = vlog2.f32 %v1450_v16 }
 0x263   :  { %1762 = vst [vmem:[%s3553_s2 + $0xa0] sm:$0xff] %v1678_v30  ;;  %1763 = vst [vmem:[%s3553_s2 + $0xa8] sm:$0xff] %v1679_v8 }
 0x264   :  { %v2330_v14 = vpop.eup %2329  ;;  %v1680_v63 = vsub.f32 %v2733_v31, %v1627_v29  ;;  %v1681_v24 = vsub.f32 %v3801_v52, %v1627_v29  ;;  %v1453_v23 = vpop.xlane.xlu1 %1452  ;;  %v3802_v31 = vld [vmem:[#allocation17_spill] sm:$0xff] }
 0x265   :  { %v1557_v21 = vmul.f32 0.6931472, %v2330_v14  ;;  %2335 = vlog2.f32 %v1453_v23 }
 0x266   :  { %1764 = vst [vmem:[%s3553_s2 + $0xb0] sm:$0xff] %v1680_v63  ;;  %1765 = vst [vmem:[%s3553_s2 + $0xb8] sm:$0xff] %v1681_v24 }
 0x267   :  { %v2332_v45 = vpop.eup %2331  ;;  %v1628_v10 = vadd.f32 %v1557_v21, %v2993_v15 }
 0x268   :  { %v1559_v25 = vmul.f32 0.6931472, %v2332_v45  ;;  %v3809_v45 = vld [vmem:[#allocation24_spill] sm:$0xff] }
 0x269   :  { %v1682_v2 = vsub.f32 %v2741_v42, %v1628_v10  ;;  %v1683_v37 = vsub.f32 %v3802_v31, %v1628_v10  ;;  %v1456_v41 = vpop.xlane.xlu0 %1455 }
 0x26a   :  { %v1629_v22 = vadd.f32 %v1559_v25, %v2999_v18  ;;  %2337 = vlog2.f32 %v1456_v41 }
 0x26b   :  { %1766 = vst [vmem:[%s3553_s2 + $0xc0] sm:$0xff] %v1682_v2  ;;  %1767 = vst [vmem:[%s3553_s2 + $0xc8] sm:$0xff] %v1683_v37 }
 0x26c   :  { %v2334_v50 = vpop.eup %2333  ;;  %v1684_v15 = vsub.f32 %v2745_v51, %v1629_v22  ;;  %v1685_v55 = vsub.f32 %v3803_v33, %v1629_v22  ;;  %v1459_v42 = vpop.xlane.xlu1 %1458  ;;  %v3804_v51 = vld [vmem:[#allocation19_spill] sm:$0xff]  ;;  %v3811_v33 = vld [vmem:[#allocation26_spill] sm:$0xff] }
 0x26d   :  { %v1561_v4 = vmul.f32 0.6931472, %v2334_v50  ;;  %2339 = vlog2.f32 %v1459_v42 }
 0x26e   :  { %1768 = vst [vmem:[%s3553_s2 + $0xd0] sm:$0xff] %v1684_v15  ;;  %1769 = vst [vmem:[%s3553_s2 + $0xd8] sm:$0xff] %v1685_v55 }
 0x26f   :  { %v2336_v18 = vpop.eup %2335  ;;  %v1630_v58 = vadd.f32 %v1561_v4, %v3005_v9  ;;  %v3812_v4 = vld [vmem:[#allocation71_spill] sm:$0xff] }
 0x270   :  { %v1563_v27 = vmul.f32 0.6931472, %v2336_v18 }
 0x271   :  { %v1686_v60 = vsub.f32 %v2753_v62, %v1630_v58  ;;  %v1687_v38 = vsub.f32 %v3804_v51, %v1630_v58  ;;  %v1462_v61 = vpop.xlane.xlu0 %1461 }
 0x272   :  { %v1631_v49 = vadd.f32 %v1563_v27, %v3011_v34  ;;  %2341 = vlog2.f32 %v1462_v61  ;;  %v3813_v27 = vld [vmem:[#allocation27_spill] sm:$0xff]  ;;  %v3815_v61 = vld [vmem:[#allocation72_spill] sm:$0xff] }
 0x273   :  { %1770 = vst [vmem:[%s3553_s2 + $0xe0] sm:$0xff] %v1686_v60  ;;  %1771 = vst [vmem:[%s3553_s2 + $0xe8] sm:$0xff] %v1687_v38 }
 0x274   :  { %v2338_v0 = vpop.eup %2337  ;;  %v1688_v9 = vsub.f32 %v2757_v7, %v1631_v49  ;;  %v1689_v44 = vsub.f32 %v3805_v36, %v1631_v49  ;;  %v1465_v62 = vpop.xlane.xlu1 %1464  ;;  %v3806_v7 = vld [vmem:[#allocation21_spill] sm:$0xff] }
 0x275   :  { %v1565_v47 = vmul.f32 0.6931472, %v2338_v0  ;;  %2343 = vlog2.f32 %v1465_v62 }
 0x276   :  { %1772 = vst [vmem:[%s3553_s2 + $0xf0] sm:$0xff] %v1688_v9  ;;  %1773 = vst [vmem:[%s3553_s2 + $0xf8] sm:$0xff] %v1689_v44  ;;  %v3816_v9 = vld [vmem:[#allocation29_spill] sm:$0xff]  ;;  %v3817_v44 = vld [vmem:[#allocation30_spill] sm:$0xff] }
 0x277   :  { %v2340_v34 = vpop.eup %2339  ;;  %v1632_v1 = vadd.f32 %v1565_v47, %v3017_v26 }
 0x278   :  { %v1567_v6 = vmul.f32 0.6931472, %v2340_v34 }
 0x279   :  { %v1690_v5 = vsub.f32 %v2765_v20, %v1632_v1  ;;  %v1691_v19 = vsub.f32 %v3806_v7, %v1632_v1  ;;  %v1468_v17 = vpop.xlane.xlu0 %1467 }
 0x27a   :  { %v1633_v56 = vadd.f32 %v1567_v6, %v3023_v40  ;;  %2345 = vlog2.f32 %v1468_v17  ;;  %v3818_v6 = vld [vmem:[#allocation73_spill] sm:$0xff] }
 0x27b   :  { %1774 = vst [vmem:[%s3553_s2 + $0x100] sm:$0xff] %v1690_v5  ;;  %1775 = vst [vmem:[%s3553_s2 + $0x108] sm:$0xff] %v1691_v19  ;;  %v3819_v19 = vld [vmem:[#allocation31_spill] sm:$0xff] }
 0x27c   :  { %v2342_v30 = vpop.eup %2341  ;;  %v1692_v26 = vsub.f32 %v2769_v32, %v1633_v56  ;;  %v1693_v8 = vsub.f32 %v3807_v12, %v1633_v56  ;;  %v1471_v20 = vpop.xlane.xlu1 %1470  ;;  %v3808_v32 = vld [vmem:[#allocation23_spill] sm:$0xff]  ;;  %v3820_v56 = vld [vmem:[#allocation32_spill] sm:$0xff]  ;;  %v3821_v12 = vld [vmem:[#allocation74_spill] sm:$0xff] }
 0x27d   :  { %v1569_v16 = vmul.f32 0.6931472, %v2342_v30  ;;  %2347 = vlog2.f32 %v1471_v20 }
 0x27e   :  { %1776 = vst [vmem:[%s3553_s2 + $0x110] sm:$0xff] %v1692_v26  ;;  %1777 = vst [vmem:[%s3553_s2 + $0x118] sm:$0xff] %v1693_v8 }
 0x27f   :  { %v2344_v40 = vpop.eup %2343  ;;  %v1634_v29 = vadd.f32 %v1569_v16, %v3029_v46  ;;  %v3822_v16 = vld [vmem:[#allocation33_spill] sm:$0xff] }
 0x280   :  { %v1571_v14 = vmul.f32 0.6931472, %v2344_v40 }
 0x281   :  { %v1694_v63 = vsub.f32 %v2777_v48, %v1634_v29  ;;  %v1695_v52 = vsub.f32 %v3808_v32, %v1634_v29  ;;  %v1474_v24 = vpop.xlane.xlu0 %1473  ;;  %v3823_v29 = vld [vmem:[#allocation34_spill] sm:$0xff] }
 0x282   :  { %v1635_v23 = vadd.f32 %v1571_v14, %v3035_v35  ;;  %2349 = vlog2.f32 %v1474_v24  ;;  %v3824_v24 = vld [vmem:[#allocation75_spill] sm:$0xff] }
 0x283   :  { %1778 = vst [vmem:[%s3553_s2 + $0x120] sm:$0xff] %v1694_v63  ;;  %1779 = vst [vmem:[%s3553_s2 + $0x128] sm:$0xff] %v1695_v52 }
 0x284   :  { %v2346_v21 = vpop.eup %2345  ;;  %v1696_v46 = vsub.f32 %v2781_v59, %v1635_v23  ;;  %v1697_v10 = vsub.f32 %v3809_v45, %v1635_v23  ;;  %v1477_v48 = vpop.xlane.xlu1 %1476  ;;  %v3810_v59 = vld [vmem:[#allocation25_spill] sm:$0xff] }
 0x285   :  { %v1573_v25 = vmul.f32 0.6931472, %v2346_v21  ;;  %2351 = vlog2.f32 %v1477_v48 }
 0x286   :  { %1780 = vst [vmem:[%s3553_s2 + $0x130] sm:$0xff] %v1696_v46  ;;  %1781 = vst [vmem:[%s3553_s2 + $0x138] sm:$0xff] %v1697_v10  ;;  %v3825_v46 = vld [vmem:[#allocation35_spill] sm:$0xff]  ;;  %v3826_v10 = vld [vmem:[#allocation36_spill] sm:$0xff] }
 0x287   :  { %v2348_v35 = vpop.eup %2347  ;;  %v1636_v2 = vadd.f32 %v1573_v25, %v3041_v3 }
 0x288   :  { %v1575_v31 = vmul.f32 0.6931472, %v2348_v35  ;;  %v3827_v35 = vld [vmem:[#allocation76_spill] sm:$0xff] }
 0x289   :  { %v1698_v37 = vsub.f32 %v2789_v13, %v1636_v2  ;;  %v1699_v41 = vsub.f32 %v3810_v59, %v1636_v2  ;;  %v1480_v22 = vpop.xlane.xlu0 %1479 }
 0x28a   :  { %v1637_v50 = vadd.f32 %v1575_v31, %v3047_v54  ;;  %2353 = vlog2.f32 %v1480_v22 }
 0x28b   :  { %1782 = vst [vmem:[%s3553_s2 + $0x140] sm:$0xff] %v1698_v37  ;;  %1783 = vst [vmem:[%s3553_s2 + $0x148] sm:$0xff] %v1699_v41  ;;  %v3828_v37 = vld [vmem:[#allocation37_spill] sm:$0xff]  ;;  %v3829_v41 = vld [vmem:[#allocation38_spill] sm:$0xff] }
 0x28c   :  { %v2350_v15 = vpop.eup %2349  ;;  %v1700_v3 = vsub.f32 %v2793_v28, %v1637_v50  ;;  %v1701_v55 = vsub.f32 %v3811_v33, %v1637_v50  ;;  %v1483_v13 = vpop.xlane.xlu1 %1482  ;;  %v3814_v28 = vld [vmem:[#allocation28_spill] sm:$0xff]  ;;  %v3830_v33 = vld [vmem:[#allocation77_spill] sm:$0xff] }
 0x28d   :  { %v1577_v42 = vmul.f32 0.6931472, %v2350_v15  ;;  %2355 = vlog2.f32 %v1483_v13 }
 0x28e   :  { %1784 = vst [vmem:[%s3553_s2 + $0x150] sm:$0xff] %v1700_v3  ;;  %1785 = vst [vmem:[%s3553_s2 + $0x158] sm:$0xff] %v1701_v55 }
 0x28f   :  { %v2352_v54 = vpop.eup %2351  ;;  %v1638_v18 = vadd.f32 %v1577_v42, %v3812_v4  ;;  %v3831_v42 = vld [vmem:[#allocation39_spill] sm:$0xff]  ;;  %v3832_v4 = vld [vmem:[#allocation40_spill] sm:$0xff] }
 0x290   :  { %v1579_v58 = vmul.f32 0.6931472, %v2352_v54 }
 0x291   :  { %v1702_v60 = vsub.f32 %v3813_v27, %v1638_v18  ;;  %v1703_v51 = vsub.f32 %v3814_v28, %v1638_v18  ;;  %v1486_v38 = vpop.xlane.xlu0 %1485  ;;  %v3833_v27 = vld [vmem:[#allocation78_spill] sm:$0xff] }
 0x292   :  { %v1639_v49 = vadd.f32 %v1579_v58, %v3815_v61  ;;  %2357 = vlog2.f32 %v1486_v38  ;;  %v3835_v61 = vld [vmem:[#allocation42_spill] sm:$0xff] }
 0x293   :  { %1786 = vst [vmem:[%s3553_s2 + $0x160] sm:$0xff] %v1702_v60  ;;  %1787 = vst [vmem:[%s3553_s2 + $0x168] sm:$0xff] %v1703_v51  ;;  %v3834_v51 = vld [vmem:[#allocation41_spill] sm:$0xff] }
 0x294   :  { %v2354_v0 = vpop.eup %2353  ;;  %v1704_v36 = vsub.f32 %v3816_v9, %v1639_v49  ;;  %v1705_v62 = vsub.f32 %v3817_v44, %v1639_v49  ;;  %v1489_v47 = vpop.xlane.xlu1 %1488  ;;  %v3836_v44 = vld [vmem:[#allocation79_spill] sm:$0xff] }
 0x295   :  { %v1581_v34 = vmul.f32 0.6931472, %v2354_v0  ;;  %2359 = vlog2.f32 %v1489_v47 }
 0x296   :  { %1788 = vst [vmem:[%s3553_s2 + $0x170] sm:$0xff] %v1704_v36  ;;  %1789 = vst [vmem:[%s3553_s2 + $0x178] sm:$0xff] %v1705_v62 }
 0x297   :  { %v2356_v1 = vpop.eup %2355  ;;  %v1640_v5 = vadd.f32 %v1581_v34, %v3818_v6  ;;  %v3837_v34 = vld [vmem:[#allocation43_spill] sm:$0xff]  ;;  %v3838_v6 = vld [vmem:[#allocation44_spill] sm:$0xff] }
 0x298   :  { %v1583_v7 = vmul.f32 0.6931472, %v2356_v1 }
 0x299   :  { %v1706_v17 = vsub.f32 %v3819_v19, %v1640_v5  ;;  %v1707_v30 = vsub.f32 %v3820_v56, %v1640_v5  ;;  %v1492_v26 = vpop.xlane.xlu0 %1491  ;;  %v3839_v19 = vld [vmem:[#allocation80_spill] sm:$0xff] }
 0x29a   :  { %v1641_v8 = vadd.f32 %v1583_v7, %v3821_v12  ;;  %2361 = vlog2.f32 %v1492_v26  ;;  %v3840_v26 = vld [vmem:[#allocation45_spill] sm:$0xff] }
 0x29b   :  { %1790 = vst [vmem:[%s3553_s2 + $0x180] sm:$0xff] %v1706_v17  ;;  %1791 = vst [vmem:[%s3553_s2 + $0x188] sm:$0xff] %v1707_v30 }
 0x29c   :  { %v2358_v20 = vpop.eup %2357  ;;  %v1708_v40 = vsub.f32 %v3822_v16, %v1641_v8  ;;  %v1709_v14 = vsub.f32 %v3823_v29, %v1641_v8  ;;  %v1495_v63 = vpop.xlane.xlu1 %1494  ;;  %v3841_v8 = vld [vmem:[#allocation46_spill] sm:$0xff] }
 0x29d   :  { %v1585_v32 = vmul.f32 0.6931472, %v2358_v20  ;;  %2363 = vlog2.f32 %v1495_v63  ;;  %v3842_v63 = vld [vmem:[#allocation47_spill] sm:$0xff] }
 0x29e   :  { %1792 = vst [vmem:[%s3553_s2 + $0x190] sm:$0xff] %v1708_v40  ;;  %1793 = vst [vmem:[%s3553_s2 + $0x198] sm:$0xff] %v1709_v14 }
 0x29f   :  { %v2360_v52 = vpop.eup %2359  ;;  %v1642_v23 = vadd.f32 %v1585_v32, %v3824_v24 }
 0x2a0   :  { %v1587_v21 = vmul.f32 0.6931472, %v2360_v52  ;;  %v3843_v52 = vld [vmem:[#allocation48_spill] sm:$0xff] }
 0x2a1   :  { %v1710_v45 = vsub.f32 %v3825_v46, %v1642_v23  ;;  %v1711_v48 = vsub.f32 %v3826_v10, %v1642_v23  ;;  %v1498_v25 = vpop.xlane.xlu0 %1497 }
 0x2a2   :  { %v1643_v2 = vadd.f32 %v1587_v21, %v3827_v35  ;;  %2365 = vlog2.f32 %v1498_v25  ;;  %v3844_v21 = vld [vmem:[#allocation81_spill] sm:$0xff]  ;;  %v3846_v25 = vld [vmem:[#allocation50_spill] sm:$0xff] }
 0x2a3   :  { %1794 = vst [vmem:[%s3553_s2 + $0x1a0] sm:$0xff] %v1710_v45  ;;  %1795 = vst [vmem:[%s3553_s2 + $0x1a8] sm:$0xff] %v1711_v48 }
 0x2a4   :  { %v2362_v31 = vpop.eup %2361  ;;  %v1712_v59 = vsub.f32 %v3828_v37, %v1643_v2  ;;  %v1713_v22 = vsub.f32 %v3829_v41, %v1643_v2  ;;  %v1501_v50 = vpop.xlane.xlu1 %1500  ;;  %v3847_v37 = vld [vmem:[#allocation82_spill] sm:$0xff] }
 0x2a5   :  { %v1589_v15 = vmul.f32 0.6931472, %v2362_v31  ;;  %2367 = vlog2.f32 %v1501_v50 }
 0x2a6   :  { %1796 = vst [vmem:[%s3553_s2 + $0x1b0] sm:$0xff] %v1712_v59  ;;  %1797 = vst [vmem:[%s3553_s2 + $0x1b8] sm:$0xff] %v1713_v22  ;;  %v3848_v22 = vld [vmem:[#allocation51_spill] sm:$0xff] }
 0x2a7   :  { %v2364_v3 = vpop.eup %2363  ;;  %v1644_v55 = vadd.f32 %v1589_v15, %v3830_v33  ;;  %v3849_v15 = vld [vmem:[#allocation52_spill] sm:$0xff]  ;;  %v3850_v33 = vld [vmem:[#allocation83_spill] sm:$0xff] }
 0x2a8   :  { %v1591_v13 = vmul.f32 0.6931472, %v2364_v3 }
 0x2a9   :  { %v1714_v54 = vsub.f32 %v3831_v42, %v1644_v55  ;;  %v1715_v18 = vsub.f32 %v3832_v4, %v1644_v55  ;;  %v1504_v58 = vpop.xlane.xlu0 %1503 }
 0x2aa   :  { %v1645_v60 = vadd.f32 %v1591_v13, %v3833_v27  ;;  %2369 = vlog2.f32 %v1504_v58  ;;  %v3851_v13 = vld [vmem:[#allocation53_spill] sm:$0xff] }
 0x2ab   :  { %1798 = vst [vmem:[%s3553_s2 + $0x1c0] sm:$0xff] %v1714_v54  ;;  %1799 = vst [vmem:[%s3553_s2 + $0x1c8] sm:$0xff] %v1715_v18  ;;  %v3852_v54 = vld [vmem:[#allocation54_spill] sm:$0xff] }
 0x2ac   :  { %v2366_v28 = vpop.eup %2365  ;;  %v1716_v38 = vsub.f32 %v3834_v51, %v1645_v60  ;;  %v1717_v49 = vsub.f32 %v3835_v61, %v1645_v60  ;;  %v1507_v0 = vpop.xlane.xlu1 %1506  ;;  %v3853_v51 = vld [vmem:[#allocation84_spill] sm:$0xff] }
 0x2ad   :  { %v1593_v9 = vmul.f32 0.6931472, %v2366_v28  ;;  %2371 = vlog2.f32 %v1507_v0 }
 0x2ae   :  { %1800 = vst [vmem:[%s3553_s2 + $0x1d0] sm:$0xff] %v1716_v38  ;;  %1801 = vst [vmem:[%s3553_s2 + $0x1d8] sm:$0xff] %v1717_v49  ;;  %v3854_v49 = vld [vmem:[#allocation55_spill] sm:$0xff] }
 0x2af   :  { %v2368_v36 = vpop.eup %2367  ;;  %v1646_v62 = vadd.f32 %v1593_v9, %v3836_v44  ;;  %v3855_v9 = vld [vmem:[#allocation56_spill] sm:$0xff] }
 0x2b0   :  { %v1595_v47 = vmul.f32 0.6931472, %v2368_v36 }
 0x2b1   :  { %v1718_v1 = vsub.f32 %v3837_v34, %v1646_v62  ;;  %v1719_v5 = vsub.f32 %v3838_v6, %v1646_v62  ;;  %v1510_v7 = vpop.xlane.xlu0 %1509  ;;  %v3856_v62 = vld [vmem:[#allocation57_spill] sm:$0xff] }
 0x2b2   :  { %v1647_v17 = vadd.f32 %v1595_v47, %v3839_v19  ;;  %2373 = vlog2.f32 %v1510_v7 }
 0x2b3   :  { %1802 = vst [vmem:[%s3553_s2 + $0x1e0] sm:$0xff] %v1718_v1  ;;  %1803 = vst [vmem:[%s3553_s2 + $0x1e8] sm:$0xff] %v1719_v5  ;;  %v1513_v56 = vpop.xlane.xlu1 %1512 }
 0x2b4   :  { %v2370_v30 = vpop.eup %2369  ;;  %v1720_v12 = vsub.f32 %v3840_v26, %v1647_v17  ;;  %v1721_v20 = vsub.f32 %v3841_v8, %v1647_v17  ;;  %2375 = vlog2.f32 %v1513_v56  ;;  %v3857_v56 = vld [vmem:[#allocation61_spill] sm:$0xff]  ;;  %v3858_v26 = vld [vmem:[#allocation58_spill] sm:$0xff] }
 0x2b5   :  { %v1597_v16 = vmul.f32 0.6931472, %v2370_v30  ;;  %v3859_v8 = vld [vmem:[#allocation62_spill] sm:$0xff] }
 0x2b6   :  { %1804 = vst [vmem:[%s3553_s2 + $0x1f0] sm:$0xff] %v1720_v12  ;;  %1805 = vst [vmem:[%s3553_s2 + $0x1f8] sm:$0xff] %v1721_v20 }
 0x2b7   :  { %v2372_v40 = vpop.eup %2371  ;;  %v1648_v29 = vadd.f32 %v1597_v16, %v3113_v53  ;;  %v3845_v53 = vld [vmem:[#allocation49_spill] sm:$0xff]  ;;  %v3860_v16 = vld [vmem:[#allocation64_spill] sm:$0xff] }
 0x2b8   :  { %v1599_v14 = vmul.f32 0.6931472, %v2372_v40 }
 0x2b9   :  { %v1722_v32 = vsub.f32 %v3842_v63, %v1648_v29  ;;  %v1723_v24 = vsub.f32 %v3843_v52, %v1648_v29  ;;  %v1516_v23 = vpop.xlane.xlu0 %1515  ;;  %v3862_v52 = vld [vmem:[#allocation65_spill] sm:$0xff] }
 0x2ba   :  { %v1649_v46 = vadd.f32 %v1599_v14, %v3844_v21  ;;  %2377 = vlog2.f32 %v1516_v23  ;;  %v3861_v14 = vld [vmem:[#allocation85_spill] sm:$0xff]  ;;  %v3863_v23 = vld [vmem:[#allocation66_spill] sm:$0xff] }
 0x2bb   :  { %1806 = vst [vmem:[%s3553_s2 + $0x200] sm:$0xff] %v1722_v32  ;;  %1807 = vst [vmem:[%s3553_s2 + $0x208] sm:$0xff] %v1723_v24  ;;  %v1519_v45 = vpop.xlane.xlu1 %1518 }
 0x2bc   :  { %v2374_v10 = vpop.eup %2373  ;;  %v1724_v48 = vsub.f32 %v3845_v53, %v1649_v46  ;;  %v1725_v35 = vsub.f32 %v3846_v25, %v1649_v46  ;;  %2379 = vlog2.f32 %v1519_v45  ;;  %v3864_v46 = vld [vmem:[#allocation86_spill] sm:$0xff] }
 0x2bd   :  { %v1601_v2 = vmul.f32 0.6931472, %v2374_v10  ;;  %v3865_v10 = vld [vmem:[#allocation67_spill] sm:$0xff] }
 0x2be   :  { %v2376_v31 = vpop.eup %2375  ;;  %1808 = vst [vmem:[%s3553_s2 + $0x210] sm:$0xff] %v1724_v48  ;;  %1809 = vst [vmem:[%s3553_s2 + $0x218] sm:$0xff] %v1725_v35  ;;  %v3866_v48 = vld [vmem:[#allocation69_spill] sm:$0xff] }
 0x2bf   :  { %v1650_v59 = vadd.f32 %v1601_v2, %v3847_v37  ;;  %v1603_v41 = vmul.f32 0.6931472, %v2376_v31 }
 0x2c1   :  { %v1726_v50 = vsub.f32 %v3848_v22, %v1650_v59  ;;  %v1727_v3 = vsub.f32 %v3849_v15, %v1650_v59  ;;  %v1651_v55 = vadd.f32 %v1603_v41, %v3850_v33 }
 0x2c2   :  { %v1522_v18 = vpop.xlane.xlu0 %1521 }
 0x2c3   :  { %1810 = vst [vmem:[%s3553_s2 + $0x220] sm:$0xff] %v1726_v50  ;;  %1811 = vst [vmem:[%s3553_s2 + $0x228] sm:$0xff] %v1727_v3  ;;  %v1728_v42 = vsub.f32 %v3851_v13, %v1651_v55  ;;  %v1729_v4 = vsub.f32 %v3852_v54, %v1651_v55  ;;  %2381 = vlog2.f32 %v1522_v18 }
 0x2c4   :  { %v2378_v58 = vpop.eup %2377  ;;  %v1525_v60 = vpop.xlane.xlu1 %1524 }
 0x2c5   :  { %1812 = vst [vmem:[%s3553_s2 + $0x230] sm:$0xff] %v1728_v42  ;;  %1813 = vst [vmem:[%s3553_s2 + $0x238] sm:$0xff] %v1729_v4  ;;  %v1605_v27 = vmul.f32 0.6931472, %v2378_v58  ;;  %2383 = vlog2.f32 %v1525_v60 }
 0x2c6   :  { %v2380_v28 = vpop.eup %2379 }
 0x2c7   :  { %v1652_v38 = vadd.f32 %v1605_v27, %v3853_v51  ;;  %v1607_v61 = vmul.f32 0.6931472, %v2380_v28 }
 0x2c9   :  { %v1730_v0 = vsub.f32 %v3854_v49, %v1652_v38  ;;  %v1731_v36 = vsub.f32 %v3855_v9, %v1652_v38  ;;  %v1653_v44 = vadd.f32 %v1607_v61, %v3143_v11 }
 0x2ca   :  { %v1528_v1 = vpop.xlane.xlu0 %1527 }
 0x2cb   :  { %1814 = vst [vmem:[%s3553_s2 + $0x240] sm:$0xff] %v1730_v0  ;;  %1815 = vst [vmem:[%s3553_s2 + $0x248] sm:$0xff] %v1731_v36  ;;  %v1732_v47 = vsub.f32 %v3856_v62, %v1653_v44  ;;  %v1733_v34 = vsub.f32 %v3778_v39, %v1653_v44  ;;  %2385 = vlog2.f32 %v1528_v1 }
 0x2cc   :  { %v1531_v11 = vpop.xlane.xlu1 %1530 }
 0x2cd   :  { %1816 = vst [vmem:[%s3553_s2 + $0x250] sm:$0xff] %v1732_v47  ;;  %1817 = vst [vmem:[%s3553_s2 + $0x258] sm:$0xff] %v1733_v34  ;;  %v2382_v6 = vpop.eup %2381  ;;  %2387 = vlog2.f32 %v1531_v11 }
 0x2ce   :  { %v1609_v5 = vmul.f32 0.6931472, %v2382_v6 }
 0x2cf   :  { %v2384_v7 = vpop.eup %2383 }
 0x2d0   :  { %v1654_v19 = vadd.f32 %v1609_v5, %v3149_v57  ;;  %v1611_v17 = vmul.f32 0.6931472, %v2384_v7 }
 0x2d2   :  { %v1734_v39 = vsub.f32 %v2909_v43, %v1654_v19  ;;  %v1735_v30 = vsub.f32 %v3857_v56, %v1654_v19  ;;  %v1655_v12 = vadd.f32 %v1611_v17, %v3858_v26 }
 0x2d4   :  { %1818 = vst [vmem:[%s3553_s2 + $0x260] sm:$0xff] %v1734_v39  ;;  %1819 = vst [vmem:[%s3553_s2 + $0x268] sm:$0xff] %v1735_v30  ;;  %v1736_v20 = vsub.f32 %v3859_v8, %v1655_v12  ;;  %v1737_v40 = vsub.f32 %v3860_v16, %v1655_v12 }
 0x2d5   :  { %v2386_v57 = vpop.eup %2385 }
 0x2d6   :  { %1820 = vst [vmem:[%s3553_s2 + $0x270] sm:$0xff] %v1736_v20  ;;  %1821 = vst [vmem:[%s3553_s2 + $0x278] sm:$0xff] %v1737_v40  ;;  %v1613_v43 = vmul.f32 0.6931472, %v2386_v57 }
 0x2d7   :  { %v2388_v29 = vpop.eup %2387 }
 0x2d8   :  { %v1656_v63 = vadd.f32 %v1613_v43, %v3861_v14  ;;  %v1615_v32 = vmul.f32 0.6931472, %v2388_v29 }
 0x2da   :  { %v1738_v24 = vsub.f32 %v3862_v52, %v1656_v63  ;;  %v1739_v21 = vsub.f32 %v3863_v23, %v1656_v63  ;;  %v1657_v45 = vadd.f32 %v1615_v32, %v3864_v46 }
 0x2dc   :  { %1822 = vst [vmem:[%s3553_s2 + $0x280] sm:$0xff] %v1738_v24  ;;  %1823 = vst [vmem:[%s3553_s2 + $0x288] sm:$0xff] %v1739_v21  ;;  %v1740_v53 = vsub.f32 %v3865_v10, %v1657_v45  ;;  %v1741_v25 = vsub.f32 %v3866_v48, %v1657_v45 }
 0x2de   :  { %1824 = vst [vmem:[%s3553_s2 + $0x290] sm:$0xff] %v1740_v53  ;;  %1825 = vst [vmem:[%s3553_s2 + $0x298] sm:$0xff] %v1741_v25 }

</bundles_post_ra>
